<compile_context>
chip_gen: v5e
topology: v5e:2x2
jax: 0.10.0
libtpu: 0.0.40
codegen_flags: <defaults>
</compile_context>

<pallas_src>
import jax
import jax.numpy as jnp
from jax.experimental import pallas as pl
from jax.experimental.pallas import tpu as pltpu


# ----------------------------------------------------------------------------
# Fused Block kernel
# ----------------------------------------------------------------------------
def _build_block_kernel(layer_meta, has_skip, *, H, W, stride, Ho, Wo, Cpad,
                        cin, cout, mm_dtype):
    """Builds the fused kernel for a static layer configuration.

    layer_meta: tuple of (ci, co, pre_relu) per SeparableConv+BN layer.
    Ref order: x, (dwk, pw, scale, bias) per layer,
               [skip_w, skip_scale, skip_bias], out, pad_scratch.
    """
    n_layers = len(layer_meta)

    def kernel(*refs):
        x_ref = refs[0]
        layer_refs = [refs[1 + 4 * i:5 + 4 * i] for i in range(n_layers)]
        idx = 1 + 4 * n_layers
        skip_refs = refs[idx:idx + 3] if has_skip else None
        idx += 3 if has_skip else 0
        o_ref = refs[idx]
        pad_ref = refs[idx + 1]

        # Conv halo: write ONLY the 1-pixel border (zeros).  The interior is
        # fully overwritten per layer and interior writes never touch the
        # border, so the zero halo stays valid for every conv layer
        # (relu(0) = 0 keeps it consistent with post-ReLU padding).
        zrow = jnp.zeros((1, W + 2, Cpad), jnp.float32)
        zcol = jnp.zeros((H + 2, 1, Cpad), jnp.float32)
        pad_ref[0:1, :, :] = zrow
        pad_ref[H + 1:H + 2, :, :] = zrow
        pad_ref[:, 0:1, :] = zcol
        pad_ref[:, W + 1:W + 2, :] = zcol

        act = x_ref[...]                                       # (H, W, cin) f32
        for li, (ci, co, pre_relu) in enumerate(layer_meta):
            dw_ref, pw_ref, sc_ref, bs_ref = layer_refs[li]
            a = jnp.maximum(act, 0.0) if pre_relu else act     # ReLU (hoisted)
            pad_ref[1:H + 1, 1:W + 1, :ci] = a

            # Depthwise 3x3 on the VPU: 9 shifted broadcast MACs in f32,
            # accumulator initialised with tap 0 (no zeros materialisation).
            d = pad_ref[0:H, 0:W, :ci] * dw_ref[0, :].reshape(1, 1, ci)
            for t in range(1, 9):
                dy, dx = divmod(t, 3)
                d = d + (pad_ref[dy:dy + H, dx:dx + W, :ci]
                         * dw_ref[t, :].reshape(1, 1, ci))

            # Pointwise 1x1 -> a single MXU matmul (bf16 operands, f32 acc).
            y = jnp.dot(d.reshape(H * W, ci).astype(mm_dtype), pw_ref[...],
                        preferred_element_type=jnp.float32)
            y = y * sc_ref[...] + bs_ref[...]                  # folded eval BN
            act = y.reshape(H, W, co)

        if stride != 1:
            # 3x3 / stride-s / pad-1 max pool, computed only at strided output
            # points.  Only the border is refilled (-inf); interior overwritten.
            ninf_row = jnp.full((1, W + 2, Cpad), -jnp.inf, jnp.float32)
            ninf_col = jnp.full((H + 2, 1, Cpad), -jnp.inf, jnp.float32)
            pad_ref[0:1, :, :] = ninf_row
            pad_ref[H + 1:H + 2, :, :] = ninf_row
            pad_ref[:, 0:1, :] = ninf_col
            pad_ref[:, W + 1:W + 2, :] = ninf_col
            pad_ref[1:H + 1, 1:W + 1, :cout] = act
            pooled = pad_ref[pl.ds(0, Ho, stride), pl.ds(0, Wo, stride), :]
            for t in range(1, 9):
                dy, dx = divmod(t, 3)
                win = pad_ref[pl.ds(dy, Ho, stride), pl.ds(dx, Wo, stride), :]
                pooled = jnp.maximum(pooled, win)
            z = pooled[:, :, :cout]
        else:
            z = act

        # Skip / residual epilogue (fused into the same kernel).
        if has_skip:
            wsk_ref, ssk_ref, bsk_ref = skip_refs
            if stride != 1:
                xs = x_ref[pl.ds(0, Ho, stride), pl.ds(0, Wo, stride), :]
            else:
                xs = x_ref[...]
            ysk = jnp.dot(xs.reshape(Ho * Wo, cin).astype(mm_dtype),
                          wsk_ref[...], preferred_element_type=jnp.float32)
            ysk = ysk * ssk_ref[...] + bsk_ref[...]
            o_ref[...] = z + ysk.reshape(Ho, Wo, cout)
        else:
            o_ref[...] = z + x_ref[...]

    return kernel


def block_forward(x, params, matmul_dtype=jnp.bfloat16):
    """x: (N, H, W, Cin) float32 -> (N, Ho, Wo, Cout). One fused pallas_call."""
    N, H, W, cin = x.shape
    layers = params["layers"]
    stride = params["stride"]
    skip = params["skip"]

    layer_meta = tuple((int(l["pw"].shape[0]), int(l["pw"].shape[1]),
                        bool(l["pre_relu"])) for l in layers)
    cout = layer_meta[-1][1]
    if skip is None:
        # Plain-residual branch is only valid under this invariant.
        assert stride == 1 and cin == cout, (
            "Block without skip conv requires stride == 1 and c_in == c_out")
    Ho = (H - 1) // stride + 1
    Wo = (W - 1) // stride + 1
    Cpad = max([cin] + [co for (_, co, _) in layer_meta])

    kernel = _build_block_kernel(layer_meta, skip is not None, H=H, W=W,
                                 stride=stride, Ho=Ho, Wo=Wo, Cpad=Cpad,
                                 cin=cin, cout=cout, mm_dtype=matmul_dtype)

    inputs = [x]
    in_specs = [pl.BlockSpec((None, H, W, cin), lambda n: (n, 0, 0, 0))]
    for (ci, co, _), layer in zip(layer_meta, layers):
        inputs += [layer["dwk"],                       # depthwise taps, f32 (VPU)
                   layer["pw"].astype(matmul_dtype),   # pointwise, bf16 (MXU)
                   layer["scale"], layer["bias"]]
        in_specs += [
            pl.BlockSpec((9, ci), lambda n: (0, 0)),
            pl.BlockSpec((ci, co), lambda n: (0, 0)),
            pl.BlockSpec((1, co), lambda n: (0, 0)),
            pl.BlockSpec((1, co), lambda n: (0, 0)),
        ]
    if skip is not None:
        inputs += [skip["w"].astype(matmul_dtype), skip["scale"], skip["bias"]]
        in_specs += [
            pl.BlockSpec((cin, cout), lambda n: (0, 0)),
            pl.BlockSpec((1, cout), lambda n: (0, 0)),
            pl.BlockSpec((1, cout), lambda n: (0, 0)),
        ]

    return pl.pallas_call(
        kernel,
        out_shape=jax.ShapeDtypeStruct((N, Ho, Wo, cout), jnp.float32),
        grid=(N,),
        in_specs=in_specs,
        out_specs=pl.BlockSpec((None, Ho, Wo, cout), lambda n: (n, 0, 0, 0)),
        scratch_shapes=[pltpu.VMEM((H + 2, W + 2, Cpad), jnp.float32)],
        compiler_params=pltpu.CompilerParams(
            dimension_semantics=("parallel",),
            vmem_limit_bytes=64 * 1024 * 1024),
    )(*inputs)


# ----------------------------------------------------------------------------
# Block parameters (deterministic init)
# ----------------------------------------------------------------------------
def _bn_fold(key, c):
    kg, kb, km, kv = jax.random.split(key, 4)
    gamma = 1.0 + 0.1 * jax.random.normal(kg, (c,), jnp.float32)
    beta = 0.1 * jax.random.normal(kb, (c,), jnp.float32)
    mean = 0.1 * jax.random.normal(km, (c,), jnp.float32)
    var = 1.0 + 0.1 * jnp.abs(jax.random.normal(kv, (c,), jnp.float32))
    scale = gamma / jnp.sqrt(var + 1e-5)
    bias = beta - mean * scale
    return scale.reshape(1, c), bias.reshape(1, c)


def init_block_params(key, c_in, c_out, reps, stride, start_with_relu, grow_first):
    # mirror the PyTorch constructor's layer list
    sep_dims = []
    c = c_in
    if grow_first:
        sep_dims.append((c_in, c_out))
        c = c_out
    for _ in range(reps - 1):
        sep_dims.append((c, c))
    if not grow_first:
        sep_dims.append((c_in, c_out))

    layers = []
    for i, (ci, co) in enumerate(sep_dims):
        key, k_dw, k_pw, k_bn = jax.random.split(key, 4)
        dw = 0.3 * jax.random.normal(k_dw, (3, 3, 1, ci), jnp.float32)  # HWIO depthwise
        pw = 0.3 * jax.random.normal(k_pw, (ci, co), jnp.float32)
        scale, bias = _bn_fold(k_bn, co)
        dwk = dw[:, :, 0, :].reshape(9, ci)        # (tap=dy*3+dx, ci) for the VPU loop
        layers.append(dict(dw=dw, pw=pw, dwk=dwk, scale=scale, bias=bias,
                           pre_relu=(True if i > 0 else start_with_relu)))

    skip = None
    if c_out != c_in or stride != 1:
        key, k_w, k_bn = jax.random.split(key, 3)
        w = 0.3 * jax.random.normal(k_w, (c_in, c_out), jnp.float32)
        s_scale, s_bias = _bn_fold(k_bn, c_out)
        skip = dict(w=w, scale=s_scale, bias=s_bias)

    return dict(layers=layers, stride=stride, skip=skip)


# ----------------------------------------------------------------------------
# Pure-JAX reference (independent of the kernels) for correctness checking
# ----------------------------------------------------------------------------
def block_reference(x, params):
    def sep_ref(z, layer):
        if layer["pre_relu"]:
            z = jnp.maximum(z, 0.0)
        cin = z.shape[-1]
        y = jax.lax.conv_general_dilated(
            z, layer["dw"], (1, 1), ((1, 1), (1, 1)),
            dimension_numbers=("NHWC", "HWIO", "NHWC"),
            feature_group_count=cin)
        y = jnp.einsum("nhwc,cd->nhwd", y, layer["pw"],
                       precision=jax.lax.Precision.HIGHEST)
        return y * layer["scale"][0] + layer["bias"][0]

    z = x
    for layer in params["layers"]:
        z = sep_ref(z, layer)
    s = params["stride"]
    if s != 1:
        z = jax.lax.reduce_window(z, -jnp.inf, jax.lax.max,
                                  (1, 3, 3, 1), (1, s, s, 1),
                                  ((0, 0), (1, 1), (1, 1), (0, 0)))
    skip = params["skip"]
    if skip is not None:
        y = x[:, ::s, ::s, :] if s != 1 else x
        y = jnp.einsum("nhwc,cd->nhwd", y, skip["w"],
                       precision=jax.lax.Precision.HIGHEST)
        y = y * skip["scale"][0] + skip["bias"][0]
    else:
        y = x
    return z + y


def _check(out, ref, tag, atol, rtol):
    if not jnp.allclose(out, ref, atol=atol, rtol=rtol):
        max_err = float(jnp.max(jnp.abs(out - ref)))
        raise AssertionError(f"{tag}: kernel/reference mismatch, max abs err = {max_err}")


# ----------------------------------------------------------------------------
if __name__ == "__main__":
    # Config A: grow_first, stride=2 -> strided max pool + 1x1 strided skip conv.
    N, c_in, c_out, H, W = 2, 4, 8, 16, 16
    reps, stride = 2, 2
    start_with_relu, grow_first = True, True

    key = jax.random.PRNGKey(0)
    k_x, k_p = jax.random.split(key)

    # PyTorch-style NCHW example input, transposed once to the kernel's NHWC layout
    x_nchw = jax.random.normal(k_x, (N, c_in, H, W), jnp.float32)
    x = jnp.transpose(x_nchw, (0, 2, 3, 1))

    params = init_block_params(k_p, c_in, c_out, reps, stride,
                               start_with_relu, grow_first)
    ref = block_reference(x, params)
    Ho = (H - 1) // stride + 1

    # bf16-MXU path (the performance configuration; loose tol reflects bf16 operands).
    out = jax.block_until_ready(block_forward(x, params))
    assert out.shape == (N, Ho, Ho, c_out), out.shape
    _check(out, ref, "configA/bf16", atol=3e-2, rtol=3e-2)

    # f32-MXU path (tight structural / numerical check against the reference).
    out32 = jax.block_until_ready(block_forward(x, params, matmul_dtype=jnp.float32))
    _check(out32, ref, "configA/f32", atol=1e-3, rtol=1e-3)

    # Config B: stride=1, c_in == c_out (no skip conv), start_with_relu=False,
    # grow_first=False -> exercises the plain residual branch (no pool / no skip).
    xb = jax.random.normal(jax.random.PRNGKey(1), (2, 16, 16, 8), jnp.float32)
    params_b = init_block_params(jax.random.PRNGKey(2), 8, 8, 2, 1, False, False)
    ref_b = block_reference(xb, params_b)

    out_b = jax.block_until_ready(block_forward(xb, params_b))
    assert out_b.shape == (2, 16, 16, 8), out_b.shape
    _check(out_b, ref_b, "configB/bf16", atol=3e-2, rtol=3e-2)

    out_b32 = jax.block_until_ready(block_forward(xb, params_b, matmul_dtype=jnp.float32))
    _check(out_b32, ref_b, "configB/f32", atol=1e-3, rtol=1e-3)

    print("KERNEL_OK")
</pallas_src>

<mosaic_0001>
module attributes {stable_mosaic.version = 11 : i64} {
  func.func @kernel(%arg0: i32, %arg1: memref<1x16x16x4xf32, #tpu.memory_space<vmem>>, %arg2: memref<9x4xf32, #tpu.memory_space<vmem>>, %arg3: memref<4x8xbf16, #tpu.memory_space<vmem>>, %arg4: memref<1x8xf32, #tpu.memory_space<vmem>>, %arg5: memref<1x8xf32, #tpu.memory_space<vmem>>, %arg6: memref<9x8xf32, #tpu.memory_space<vmem>>, %arg7: memref<8x8xbf16, #tpu.memory_space<vmem>>, %arg8: memref<1x8xf32, #tpu.memory_space<vmem>>, %arg9: memref<1x8xf32, #tpu.memory_space<vmem>>, %arg10: memref<4x8xbf16, #tpu.memory_space<vmem>>, %arg11: memref<1x8xf32, #tpu.memory_space<vmem>>, %arg12: memref<1x8xf32, #tpu.memory_space<vmem>>, %arg13: memref<1x8x8x8xf32, #tpu.memory_space<vmem>>, %arg14: memref<18x18x8xf32, #tpu.memory_space<vmem>>) attributes {dimension_semantics = [#tpu.dimension_semantics<parallel>], iteration_bounds = array<i64: 2>, scalar_prefetch = 0 : i64, scratch_operands = 1 : i64, tpu.core_type = #tpu.core_type<tc>, window_params = [{transform_indices = @transform_0, window_bounds = array<i64: 1, 16, 16, 4>}, {pipeline_mode = #tpu.pipeline_mode<synchronous>, transform_indices = @transform_1, window_bounds = array<i64: 9, 4>}, {pipeline_mode = #tpu.pipeline_mode<synchronous>, transform_indices = @transform_2, window_bounds = array<i64: 4, 8>}, {pipeline_mode = #tpu.pipeline_mode<synchronous>, transform_indices = @transform_3, window_bounds = array<i64: 1, 8>}, {pipeline_mode = #tpu.pipeline_mode<synchronous>, transform_indices = @transform_4, window_bounds = array<i64: 1, 8>}, {pipeline_mode = #tpu.pipeline_mode<synchronous>, transform_indices = @transform_5, window_bounds = array<i64: 9, 8>}, {pipeline_mode = #tpu.pipeline_mode<synchronous>, transform_indices = @transform_6, window_bounds = array<i64: 8, 8>}, {pipeline_mode = #tpu.pipeline_mode<synchronous>, transform_indices = @transform_7, window_bounds = array<i64: 1, 8>}, {pipeline_mode = #tpu.pipeline_mode<synchronous>, transform_indices = @transform_8, window_bounds = array<i64: 1, 8>}, {pipeline_mode = #tpu.pipeline_mode<synchronous>, transform_indices = @transform_9, window_bounds = array<i64: 4, 8>}, {pipeline_mode = #tpu.pipeline_mode<synchronous>, transform_indices = @transform_10, window_bounds = array<i64: 1, 8>}, {pipeline_mode = #tpu.pipeline_mode<synchronous>, transform_indices = @transform_11, window_bounds = array<i64: 1, 8>}, {transform_indices = @transform_12, window_bounds = array<i64: 1, 8, 8, 8>}]} {
    %cst = arith.constant 0.000000e+00 : f32
    %0 = vector.broadcast %cst : f32 to vector<1x18x8xf32>
    %cst_0 = arith.constant 0.000000e+00 : f32
    %1 = vector.broadcast %cst_0 : f32 to vector<18x1x8xf32>
    %c0 = arith.constant 0 : index
    %c0_1 = arith.constant 0 : index
    %c0_2 = arith.constant 0 : index
    %2 = vector.load %arg14[%c0, %c0_1, %c0_2] : memref<18x18x8xf32, #tpu.memory_space<vmem>>, vector<1x18x8xf32>
    tpu.vector_store %arg14[%c0, %c0_1, %c0_2], %0 {strides = array<i32>} : memref<18x18x8xf32, #tpu.memory_space<vmem>>, vector<1x18x8xf32>,
    %c17 = arith.constant 17 : index
    %c0_3 = arith.constant 0 : index
    %c0_4 = arith.constant 0 : index
    %3 = vector.load %arg14[%c17, %c0_3, %c0_4] : memref<18x18x8xf32, #tpu.memory_space<vmem>>, vector<1x18x8xf32>
    tpu.vector_store %arg14[%c17, %c0_3, %c0_4], %0 {strides = array<i32>} : memref<18x18x8xf32, #tpu.memory_space<vmem>>, vector<1x18x8xf32>,
    %c0_5 = arith.constant 0 : index
    %c0_6 = arith.constant 0 : index
    %c0_7 = arith.constant 0 : index
    %4 = vector.load %arg14[%c0_5, %c0_6, %c0_7] : memref<18x18x8xf32, #tpu.memory_space<vmem>>, vector<18x1x8xf32>
    tpu.vector_store %arg14[%c0_5, %c0_6, %c0_7], %1 {strides = array<i32>} : memref<18x18x8xf32, #tpu.memory_space<vmem>>, vector<18x1x8xf32>,
    %c0_8 = arith.constant 0 : index
    %c17_9 = arith.constant 17 : index
    %c0_10 = arith.constant 0 : index
    %5 = vector.load %arg14[%c0_8, %c17_9, %c0_10] : memref<18x18x8xf32, #tpu.memory_space<vmem>>, vector<18x1x8xf32>
    tpu.vector_store %arg14[%c0_8, %c17_9, %c0_10], %1 {strides = array<i32>} : memref<18x18x8xf32, #tpu.memory_space<vmem>>, vector<18x1x8xf32>,
    %c0_11 = arith.constant 0 : index
    %c0_12 = arith.constant 0 : index
    %c0_13 = arith.constant 0 : index
    %c0_14 = arith.constant 0 : index
    %6 = vector.load %arg1[%c0_11, %c0_12, %c0_13, %c0_14] : memref<1x16x16x4xf32, #tpu.memory_space<vmem>>, vector<1x16x16x4xf32>
    %7 = vector.shape_cast %6 : vector<1x16x16x4xf32> to vector<16x16x4xf32>
    %cst_15 = arith.constant 0.000000e+00 : f32
    %8 = vector.broadcast %cst_15 : f32 to vector<16x16x4xf32>
    %9 = arith.maximumf %7, %8 : vector<16x16x4xf32>
    %c1 = arith.constant 1 : index
    %c1_16 = arith.constant 1 : index
    %c0_17 = arith.constant 0 : index
    %10 = vector.load %arg14[%c1, %c1_16, %c0_17] : memref<18x18x8xf32, #tpu.memory_space<vmem>>, vector<16x16x4xf32>
    tpu.vector_store %arg14[%c1, %c1_16, %c0_17], %9 {strides = array<i32>} : memref<18x18x8xf32, #tpu.memory_space<vmem>>, vector<16x16x4xf32>,
    %c0_18 = arith.constant 0 : index
    %c0_19 = arith.constant 0 : index
    %c0_20 = arith.constant 0 : index
    %11 = vector.load %arg14[%c0_18, %c0_19, %c0_20] : memref<18x18x8xf32, #tpu.memory_space<vmem>>, vector<16x16x4xf32>
    %c0_21 = arith.constant 0 : index
    %c0_22 = arith.constant 0 : index
    %12 = vector.load %arg2[%c0_21, %c0_22] : memref<9x4xf32, #tpu.memory_space<vmem>>, vector<1x4xf32>
    %13 = vector.shape_cast %12 : vector<1x4xf32> to vector<4xf32>
    %14 = vector.shape_cast %13 : vector<4xf32> to vector<1x1x4xf32>
    %15 = vector.broadcast %14 : vector<1x1x4xf32> to vector<16x16x4xf32>
    %16 = arith.mulf %11, %15 : vector<16x16x4xf32>
    %c0_23 = arith.constant 0 : index
    %c1_24 = arith.constant 1 : index
    %c0_25 = arith.constant 0 : index
    %17 = vector.load %arg14[%c0_23, %c1_24, %c0_25] : memref<18x18x8xf32, #tpu.memory_space<vmem>>, vector<16x16x4xf32>
    %c1_26 = arith.constant 1 : index
    %c0_27 = arith.constant 0 : index
    %18 = vector.load %arg2[%c1_26, %c0_27] : memref<9x4xf32, #tpu.memory_space<vmem>>, vector<1x4xf32>
    %19 = vector.shape_cast %18 : vector<1x4xf32> to vector<4xf32>
    %20 = vector.shape_cast %19 : vector<4xf32> to vector<1x1x4xf32>
    %21 = vector.broadcast %20 : vector<1x1x4xf32> to vector<16x16x4xf32>
    %22 = arith.mulf %17, %21 : vector<16x16x4xf32>
    %23 = arith.addf %16, %22 : vector<16x16x4xf32>
    %c0_28 = arith.constant 0 : index
    %c2 = arith.constant 2 : index
    %c0_29 = arith.constant 0 : index
    %24 = vector.load %arg14[%c0_28, %c2, %c0_29] : memref<18x18x8xf32, #tpu.memory_space<vmem>>, vector<16x16x4xf32>
    %c2_30 = arith.constant 2 : index
    %c0_31 = arith.constant 0 : index
    %25 = vector.load %arg2[%c2_30, %c0_31] : memref<9x4xf32, #tpu.memory_space<vmem>>, vector<1x4xf32>
    %26 = vector.shape_cast %25 : vector<1x4xf32> to vector<4xf32>
    %27 = vector.shape_cast %26 : vector<4xf32> to vector<1x1x4xf32>
    %28 = vector.broadcast %27 : vector<1x1x4xf32> to vector<16x16x4xf32>
    %29 = arith.mulf %24, %28 : vector<16x16x4xf32>
    %30 = arith.addf %23, %29 : vector<16x16x4xf32>
    %c1_32 = arith.constant 1 : index
    %c0_33 = arith.constant 0 : index
    %c0_34 = arith.constant 0 : index
    %31 = vector.load %arg14[%c1_32, %c0_33, %c0_34] : memref<18x18x8xf32, #tpu.memory_space<vmem>>, vector<16x16x4xf32>
    %c3 = arith.constant 3 : index
    %c0_35 = arith.constant 0 : index
    %32 = vector.load %arg2[%c3, %c0_35] : memref<9x4xf32, #tpu.memory_space<vmem>>, vector<1x4xf32>
    %33 = vector.shape_cast %32 : vector<1x4xf32> to vector<4xf32>
    %34 = vector.shape_cast %33 : vector<4xf32> to vector<1x1x4xf32>
    %35 = vector.broadcast %34 : vector<1x1x4xf32> to vector<16x16x4xf32>
    %36 = arith.mulf %31, %35 : vector<16x16x4xf32>
    %37 = arith.addf %30, %36 : vector<16x16x4xf32>
    %c1_36 = arith.constant 1 : index
    %c1_37 = arith.constant 1 : index
    %c0_38 = arith.constant 0 : index
    %38 = vector.load %arg14[%c1_36, %c1_37, %c0_38] : memref<18x18x8xf32, #tpu.memory_space<vmem>>, vector<16x16x4xf32>
    %c4 = arith.constant 4 : index
    %c0_39 = arith.constant 0 : index
    %39 = vector.load %arg2[%c4, %c0_39] : memref<9x4xf32, #tpu.memory_space<vmem>>, vector<1x4xf32>
    %40 = vector.shape_cast %39 : vector<1x4xf32> to vector<4xf32>
    %41 = vector.shape_cast %40 : vector<4xf32> to vector<1x1x4xf32>
    %42 = vector.broadcast %41 : vector<1x1x4xf32> to vector<16x16x4xf32>
    %43 = arith.mulf %38, %42 : vector<16x16x4xf32>
    %44 = arith.addf %37, %43 : vector<16x16x4xf32>
    %c1_40 = arith.constant 1 : index
    %c2_41 = arith.constant 2 : index
    %c0_42 = arith.constant 0 : index
    %45 = vector.load %arg14[%c1_40, %c2_41, %c0_42] : memref<18x18x8xf32, #tpu.memory_space<vmem>>, vector<16x16x4xf32>
    %c5 = arith.constant 5 : index
    %c0_43 = arith.constant 0 : index
    %46 = vector.load %arg2[%c5, %c0_43] : memref<9x4xf32, #tpu.memory_space<vmem>>, vector<1x4xf32>
    %47 = vector.shape_cast %46 : vector<1x4xf32> to vector<4xf32>
    %48 = vector.shape_cast %47 : vector<4xf32> to vector<1x1x4xf32>
    %49 = vector.broadcast %48 : vector<1x1x4xf32> to vector<16x16x4xf32>
    %50 = arith.mulf %45, %49 : vector<16x16x4xf32>
    %51 = arith.addf %44, %50 : vector<16x16x4xf32>
    %c2_44 = arith.constant 2 : index
    %c0_45 = arith.constant 0 : index
    %c0_46 = arith.constant 0 : index
    %52 = vector.load %arg14[%c2_44, %c0_45, %c0_46] : memref<18x18x8xf32, #tpu.memory_space<vmem>>, vector<16x16x4xf32>
    %c6 = arith.constant 6 : index
    %c0_47 = arith.constant 0 : index
    %53 = vector.load %arg2[%c6, %c0_47] : memref<9x4xf32, #tpu.memory_space<vmem>>, vector<1x4xf32>
    %54 = vector.shape_cast %53 : vector<1x4xf32> to vector<4xf32>
    %55 = vector.shape_cast %54 : vector<4xf32> to vector<1x1x4xf32>
    %56 = vector.broadcast %55 : vector<1x1x4xf32> to vector<16x16x4xf32>
    %57 = arith.mulf %52, %56 : vector<16x16x4xf32>
    %58 = arith.addf %51, %57 : vector<16x16x4xf32>
    %c2_48 = arith.constant 2 : index
    %c1_49 = arith.constant 1 : index
    %c0_50 = arith.constant 0 : index
    %59 = vector.load %arg14[%c2_48, %c1_49, %c0_50] : memref<18x18x8xf32, #tpu.memory_space<vmem>>, vector<16x16x4xf32>
    %c7 = arith.constant 7 : index
    %c0_51 = arith.constant 0 : index
    %60 = vector.load %arg2[%c7, %c0_51] : memref<9x4xf32, #tpu.memory_space<vmem>>, vector<1x4xf32>
    %61 = vector.shape_cast %60 : vector<1x4xf32> to vector<4xf32>
    %62 = vector.shape_cast %61 : vector<4xf32> to vector<1x1x4xf32>
    %63 = vector.broadcast %62 : vector<1x1x4xf32> to vector<16x16x4xf32>
    %64 = arith.mulf %59, %63 : vector<16x16x4xf32>
    %65 = arith.addf %58, %64 : vector<16x16x4xf32>
    %c2_52 = arith.constant 2 : index
    %c2_53 = arith.constant 2 : index
    %c0_54 = arith.constant 0 : index
    %66 = vector.load %arg14[%c2_52, %c2_53, %c0_54] : memref<18x18x8xf32, #tpu.memory_space<vmem>>, vector<16x16x4xf32>
    %c8 = arith.constant 8 : index
    %c0_55 = arith.constant 0 : index
    %67 = vector.load %arg2[%c8, %c0_55] : memref<9x4xf32, #tpu.memory_space<vmem>>, vector<1x4xf32>
    %68 = vector.shape_cast %67 : vector<1x4xf32> to vector<4xf32>
    %69 = vector.shape_cast %68 : vector<4xf32> to vector<1x1x4xf32>
    %70 = vector.broadcast %69 : vector<1x1x4xf32> to vector<16x16x4xf32>
    %71 = arith.mulf %66, %70 : vector<16x16x4xf32>
    %72 = arith.addf %65, %71 : vector<16x16x4xf32>
    %73 = vector.shape_cast %72 : vector<16x16x4xf32> to vector<256x4xf32>
    %74 = arith.truncf %73 : vector<256x4xf32> to vector<256x4xbf16>
    %c0_56 = arith.constant 0 : index
    %c0_57 = arith.constant 0 : index
    %75 = vector.load %arg3[%c0_56, %c0_57] : memref<4x8xbf16, #tpu.memory_space<vmem>>, vector<4x8xbf16>
    %cst_58 = arith.constant dense<0.000000e+00> : vector<256x8xf32>
    %76 = tpu.matmul %74, %75, %cst_58 {dimension_numbers = #tpu.dot_dimension_numbers<[1], [0], [0], [1], [0, 0, 1, 1], [], []>} : vector<256x4xbf16>, vector<4x8xbf16>, vector<256x8xf32> -> vector<256x8xf32>
    %c0_59 = arith.constant 0 : index
    %c0_60 = arith.constant 0 : index
    %77 = vector.load %arg4[%c0_59, %c0_60] : memref<1x8xf32, #tpu.memory_space<vmem>>, vector<1x8xf32>
    %78 = vector.broadcast %77 : vector<1x8xf32> to vector<256x8xf32>
    %79 = arith.mulf %76, %78 : vector<256x8xf32>
    %c0_61 = arith.constant 0 : index
    %c0_62 = arith.constant 0 : index
    %80 = vector.load %arg5[%c0_61, %c0_62] : memref<1x8xf32, #tpu.memory_space<vmem>>, vector<1x8xf32>
    %81 = vector.broadcast %80 : vector<1x8xf32> to vector<256x8xf32>
    %82 = arith.addf %79, %81 : vector<256x8xf32>
    %83 = vector.shape_cast %82 : vector<256x8xf32> to vector<16x16x8xf32>
    %cst_63 = arith.constant 0.000000e+00 : f32
    %84 = vector.broadcast %cst_63 : f32 to vector<16x16x8xf32>
    %85 = arith.maximumf %83, %84 : vector<16x16x8xf32>
    %c1_64 = arith.constant 1 : index
    %c1_65 = arith.constant 1 : index
    %c0_66 = arith.constant 0 : index
    %86 = vector.load %arg14[%c1_64, %c1_65, %c0_66] : memref<18x18x8xf32, #tpu.memory_space<vmem>>, vector<16x16x8xf32>
    tpu.vector_store %arg14[%c1_64, %c1_65, %c0_66], %85 {strides = array<i32>} : memref<18x18x8xf32, #tpu.memory_space<vmem>>, vector<16x16x8xf32>,
    %c0_67 = arith.constant 0 : index
    %c0_68 = arith.constant 0 : index
    %c0_69 = arith.constant 0 : index
    %87 = vector.load %arg14[%c0_67, %c0_68, %c0_69] : memref<18x18x8xf32, #tpu.memory_space<vmem>>, vector<16x16x8xf32>
    %c0_70 = arith.constant 0 : index
    %c0_71 = arith.constant 0 : index
    %88 = vector.load %arg6[%c0_70, %c0_71] : memref<9x8xf32, #tpu.memory_space<vmem>>, vector<1x8xf32>
    %89 = vector.shape_cast %88 : vector<1x8xf32> to vector<8xf32>
    %90 = vector.shape_cast %89 : vector<8xf32> to vector<1x1x8xf32>
    %91 = vector.broadcast %90 : vector<1x1x8xf32> to vector<16x16x8xf32>
    %92 = arith.mulf %87, %91 : vector<16x16x8xf32>
    %c0_72 = arith.constant 0 : index
    %c1_73 = arith.constant 1 : index
    %c0_74 = arith.constant 0 : index
    %93 = vector.load %arg14[%c0_72, %c1_73, %c0_74] : memref<18x18x8xf32, #tpu.memory_space<vmem>>, vector<16x16x8xf32>
    %c1_75 = arith.constant 1 : index
    %c0_76 = arith.constant 0 : index
    %94 = vector.load %arg6[%c1_75, %c0_76] : memref<9x8xf32, #tpu.memory_space<vmem>>, vector<1x8xf32>
    %95 = vector.shape_cast %94 : vector<1x8xf32> to vector<8xf32>
    %96 = vector.shape_cast %95 : vector<8xf32> to vector<1x1x8xf32>
    %97 = vector.broadcast %96 : vector<1x1x8xf32> to vector<16x16x8xf32>
    %98 = arith.mulf %93, %97 : vector<16x16x8xf32>
    %99 = arith.addf %92, %98 : vector<16x16x8xf32>
    %c0_77 = arith.constant 0 : index
    %c2_78 = arith.constant 2 : index
    %c0_79 = arith.constant 0 : index
    %100 = vector.load %arg14[%c0_77, %c2_78, %c0_79] : memref<18x18x8xf32, #tpu.memory_space<vmem>>, vector<16x16x8xf32>
    %c2_80 = arith.constant 2 : index
    %c0_81 = arith.constant 0 : index
    %101 = vector.load %arg6[%c2_80, %c0_81] : memref<9x8xf32, #tpu.memory_space<vmem>>, vector<1x8xf32>
    %102 = vector.shape_cast %101 : vector<1x8xf32> to vector<8xf32>
    %103 = vector.shape_cast %102 : vector<8xf32> to vector<1x1x8xf32>
    %104 = vector.broadcast %103 : vector<1x1x8xf32> to vector<16x16x8xf32>
    %105 = arith.mulf %100, %104 : vector<16x16x8xf32>
    %106 = arith.addf %99, %105 : vector<16x16x8xf32>
    %c1_82 = arith.constant 1 : index
    %c0_83 = arith.constant 0 : index
    %c0_84 = arith.constant 0 : index
    %107 = vector.load %arg14[%c1_82, %c0_83, %c0_84] : memref<18x18x8xf32, #tpu.memory_space<vmem>>, vector<16x16x8xf32>
    %c3_85 = arith.constant 3 : index
    %c0_86 = arith.constant 0 : index
    %108 = vector.load %arg6[%c3_85, %c0_86] : memref<9x8xf32, #tpu.memory_space<vmem>>, vector<1x8xf32>
    %109 = vector.shape_cast %108 : vector<1x8xf32> to vector<8xf32>
    %110 = vector.shape_cast %109 : vector<8xf32> to vector<1x1x8xf32>
    %111 = vector.broadcast %110 : vector<1x1x8xf32> to vector<16x16x8xf32>
    %112 = arith.mulf %107, %111 : vector<16x16x8xf32>
    %113 = arith.addf %106, %112 : vector<16x16x8xf32>
    %c1_87 = arith.constant 1 : index
    %c1_88 = arith.constant 1 : index
    %c0_89 = arith.constant 0 : index
    %114 = vector.load %arg14[%c1_87, %c1_88, %c0_89] : memref<18x18x8xf32, #tpu.memory_space<vmem>>, vector<16x16x8xf32>
    %c4_90 = arith.constant 4 : index
    %c0_91 = arith.constant 0 : index
    %115 = vector.load %arg6[%c4_90, %c0_91] : memref<9x8xf32, #tpu.memory_space<vmem>>, vector<1x8xf32>
    %116 = vector.shape_cast %115 : vector<1x8xf32> to vector<8xf32>
    %117 = vector.shape_cast %116 : vector<8xf32> to vector<1x1x8xf32>
    %118 = vector.broadcast %117 : vector<1x1x8xf32> to vector<16x16x8xf32>
    %119 = arith.mulf %114, %118 : vector<16x16x8xf32>
    %120 = arith.addf %113, %119 : vector<16x16x8xf32>
    %c1_92 = arith.constant 1 : index
    %c2_93 = arith.constant 2 : index
    %c0_94 = arith.constant 0 : index
    %121 = vector.load %arg14[%c1_92, %c2_93, %c0_94] : memref<18x18x8xf32, #tpu.memory_space<vmem>>, vector<16x16x8xf32>
    %c5_95 = arith.constant 5 : index
    %c0_96 = arith.constant 0 : index
    %122 = vector.load %arg6[%c5_95, %c0_96] : memref<9x8xf32, #tpu.memory_space<vmem>>, vector<1x8xf32>
    %123 = vector.shape_cast %122 : vector<1x8xf32> to vector<8xf32>
    %124 = vector.shape_cast %123 : vector<8xf32> to vector<1x1x8xf32>
    %125 = vector.broadcast %124 : vector<1x1x8xf32> to vector<16x16x8xf32>
    %126 = arith.mulf %121, %125 : vector<16x16x8xf32>
    %127 = arith.addf %120, %126 : vector<16x16x8xf32>
    %c2_97 = arith.constant 2 : index
    %c0_98 = arith.constant 0 : index
    %c0_99 = arith.constant 0 : index
    %128 = vector.load %arg14[%c2_97, %c0_98, %c0_99] : memref<18x18x8xf32, #tpu.memory_space<vmem>>, vector<16x16x8xf32>
    %c6_100 = arith.constant 6 : index
    %c0_101 = arith.constant 0 : index
    %129 = vector.load %arg6[%c6_100, %c0_101] : memref<9x8xf32, #tpu.memory_space<vmem>>, vector<1x8xf32>
    %130 = vector.shape_cast %129 : vector<1x8xf32> to vector<8xf32>
    %131 = vector.shape_cast %130 : vector<8xf32> to vector<1x1x8xf32>
    %132 = vector.broadcast %131 : vector<1x1x8xf32> to vector<16x16x8xf32>
    %133 = arith.mulf %128, %132 : vector<16x16x8xf32>
    %134 = arith.addf %127, %133 : vector<16x16x8xf32>
    %c2_102 = arith.constant 2 : index
    %c1_103 = arith.constant 1 : index
    %c0_104 = arith.constant 0 : index
    %135 = vector.load %arg14[%c2_102, %c1_103, %c0_104] : memref<18x18x8xf32, #tpu.memory_space<vmem>>, vector<16x16x8xf32>
    %c7_105 = arith.constant 7 : index
    %c0_106 = arith.constant 0 : index
    %136 = vector.load %arg6[%c7_105, %c0_106] : memref<9x8xf32, #tpu.memory_space<vmem>>, vector<1x8xf32>
    %137 = vector.shape_cast %136 : vector<1x8xf32> to vector<8xf32>
    %138 = vector.shape_cast %137 : vector<8xf32> to vector<1x1x8xf32>
    %139 = vector.broadcast %138 : vector<1x1x8xf32> to vector<16x16x8xf32>
    %140 = arith.mulf %135, %139 : vector<16x16x8xf32>
    %141 = arith.addf %134, %140 : vector<16x16x8xf32>
    %c2_107 = arith.constant 2 : index
    %c2_108 = arith.constant 2 : index
    %c0_109 = arith.constant 0 : index
    %142 = vector.load %arg14[%c2_107, %c2_108, %c0_109] : memref<18x18x8xf32, #tpu.memory_space<vmem>>, vector<16x16x8xf32>
    %c8_110 = arith.constant 8 : index
    %c0_111 = arith.constant 0 : index
    %143 = vector.load %arg6[%c8_110, %c0_111] : memref<9x8xf32, #tpu.memory_space<vmem>>, vector<1x8xf32>
    %144 = vector.shape_cast %143 : vector<1x8xf32> to vector<8xf32>
    %145 = vector.shape_cast %144 : vector<8xf32> to vector<1x1x8xf32>
    %146 = vector.broadcast %145 : vector<1x1x8xf32> to vector<16x16x8xf32>
    %147 = arith.mulf %142, %146 : vector<16x16x8xf32>
    %148 = arith.addf %141, %147 : vector<16x16x8xf32>
    %149 = vector.shape_cast %148 : vector<16x16x8xf32> to vector<256x8xf32>
    %150 = arith.truncf %149 : vector<256x8xf32> to vector<256x8xbf16>
    %c0_112 = arith.constant 0 : index
    %c0_113 = arith.constant 0 : index
    %151 = vector.load %arg7[%c0_112, %c0_113] : memref<8x8xbf16, #tpu.memory_space<vmem>>, vector<8x8xbf16>
    %cst_114 = arith.constant dense<0.000000e+00> : vector<256x8xf32>
    %152 = tpu.matmul %150, %151, %cst_114 {dimension_numbers = #tpu.dot_dimension_numbers<[1], [0], [0], [1], [0, 0, 1, 1], [], []>} : vector<256x8xbf16>, vector<8x8xbf16>, vector<256x8xf32> -> vector<256x8xf32>
    %c0_115 = arith.constant 0 : index
    %c0_116 = arith.constant 0 : index
    %153 = vector.load %arg8[%c0_115, %c0_116] : memref<1x8xf32, #tpu.memory_space<vmem>>, vector<1x8xf32>
    %154 = vector.broadcast %153 : vector<1x8xf32> to vector<256x8xf32>
    %155 = arith.mulf %152, %154 : vector<256x8xf32>
    %c0_117 = arith.constant 0 : index
    %c0_118 = arith.constant 0 : index
    %156 = vector.load %arg9[%c0_117, %c0_118] : memref<1x8xf32, #tpu.memory_space<vmem>>, vector<1x8xf32>
    %157 = vector.broadcast %156 : vector<1x8xf32> to vector<256x8xf32>
    %158 = arith.addf %155, %157 : vector<256x8xf32>
    %159 = vector.shape_cast %158 : vector<256x8xf32> to vector<16x16x8xf32>
    %cst_119 = arith.constant 0xFF800000 : f32
    %160 = vector.broadcast %cst_119 : f32 to vector<1x18x8xf32>
    %cst_120 = arith.constant 0xFF800000 : f32
    %161 = vector.broadcast %cst_120 : f32 to vector<18x1x8xf32>
    %c0_121 = arith.constant 0 : index
    %c0_122 = arith.constant 0 : index
    %c0_123 = arith.constant 0 : index
    %162 = vector.load %arg14[%c0_121, %c0_122, %c0_123] : memref<18x18x8xf32, #tpu.memory_space<vmem>>, vector<1x18x8xf32>
    tpu.vector_store %arg14[%c0_121, %c0_122, %c0_123], %160 {strides = array<i32>} : memref<18x18x8xf32, #tpu.memory_space<vmem>>, vector<1x18x8xf32>,
    %c17_124 = arith.constant 17 : index
    %c0_125 = arith.constant 0 : index
    %c0_126 = arith.constant 0 : index
    %163 = vector.load %arg14[%c17_124, %c0_125, %c0_126] : memref<18x18x8xf32, #tpu.memory_space<vmem>>, vector<1x18x8xf32>
    tpu.vector_store %arg14[%c17_124, %c0_125, %c0_126], %160 {strides = array<i32>} : memref<18x18x8xf32, #tpu.memory_space<vmem>>, vector<1x18x8xf32>,
    %c0_127 = arith.constant 0 : index
    %c0_128 = arith.constant 0 : index
    %c0_129 = arith.constant 0 : index
    %164 = vector.load %arg14[%c0_127, %c0_128, %c0_129] : memref<18x18x8xf32, #tpu.memory_space<vmem>>, vector<18x1x8xf32>
    tpu.vector_store %arg14[%c0_127, %c0_128, %c0_129], %161 {strides = array<i32>} : memref<18x18x8xf32, #tpu.memory_space<vmem>>, vector<18x1x8xf32>,
    %c0_130 = arith.constant 0 : index
    %c17_131 = arith.constant 17 : index
    %c0_132 = arith.constant 0 : index
    %165 = vector.load %arg14[%c0_130, %c17_131, %c0_132] : memref<18x18x8xf32, #tpu.memory_space<vmem>>, vector<18x1x8xf32>
    tpu.vector_store %arg14[%c0_130, %c17_131, %c0_132], %161 {strides = array<i32>} : memref<18x18x8xf32, #tpu.memory_space<vmem>>, vector<18x1x8xf32>,
    %c1_133 = arith.constant 1 : index
    %c1_134 = arith.constant 1 : index
    %c0_135 = arith.constant 0 : index
    %166 = vector.load %arg14[%c1_133, %c1_134, %c0_135] : memref<18x18x8xf32, #tpu.memory_space<vmem>>, vector<16x16x8xf32>
    tpu.vector_store %arg14[%c1_133, %c1_134, %c0_135], %159 {strides = array<i32>} : memref<18x18x8xf32, #tpu.memory_space<vmem>>, vector<16x16x8xf32>,
    %c0_136 = arith.constant 0 : index
    %c0_137 = arith.constant 0 : index
    %c0_138 = arith.constant 0 : index
    %167 = tpu.strided_load %arg14[%c0_136, %c0_137, %c0_138] {strides = array<i32: 2, 2, 1>} : memref<18x18x8xf32, #tpu.memory_space<vmem>>, vector<8x8x8xf32>
    %c0_139 = arith.constant 0 : index
    %c1_140 = arith.constant 1 : index
    %c0_141 = arith.constant 0 : index
    %168 = tpu.strided_load %arg14[%c0_139, %c1_140, %c0_141] {strides = array<i32: 2, 2, 1>} : memref<18x18x8xf32, #tpu.memory_space<vmem>>, vector<8x8x8xf32>
    %169 = arith.maximumf %167, %168 : vector<8x8x8xf32>
    %c0_142 = arith.constant 0 : index
    %c2_143 = arith.constant 2 : index
    %c0_144 = arith.constant 0 : index
    %170 = tpu.strided_load %arg14[%c0_142, %c2_143, %c0_144] {strides = array<i32: 2, 2, 1>} : memref<18x18x8xf32, #tpu.memory_space<vmem>>, vector<8x8x8xf32>
    %171 = arith.maximumf %169, %170 : vector<8x8x8xf32>
    %c1_145 = arith.constant 1 : index
    %c0_146 = arith.constant 0 : index
    %c0_147 = arith.constant 0 : index
    %172 = tpu.strided_load %arg14[%c1_145, %c0_146, %c0_147] {strides = array<i32: 2, 2, 1>} : memref<18x18x8xf32, #tpu.memory_space<vmem>>, vector<8x8x8xf32>
    %173 = arith.maximumf %171, %172 : vector<8x8x8xf32>
    %c1_148 = arith.constant 1 : index
    %c1_149 = arith.constant 1 : index
    %c0_150 = arith.constant 0 : index
    %174 = tpu.strided_load %arg14[%c1_148, %c1_149, %c0_150] {strides = array<i32: 2, 2, 1>} : memref<18x18x8xf32, #tpu.memory_space<vmem>>, vector<8x8x8xf32>
    %175 = arith.maximumf %173, %174 : vector<8x8x8xf32>
    %c1_151 = arith.constant 1 : index
    %c2_152 = arith.constant 2 : index
    %c0_153 = arith.constant 0 : index
    %176 = tpu.strided_load %arg14[%c1_151, %c2_152, %c0_153] {strides = array<i32: 2, 2, 1>} : memref<18x18x8xf32, #tpu.memory_space<vmem>>, vector<8x8x8xf32>
    %177 = arith.maximumf %175, %176 : vector<8x8x8xf32>
    %c2_154 = arith.constant 2 : index
    %c0_155 = arith.constant 0 : index
    %c0_156 = arith.constant 0 : index
    %178 = tpu.strided_load %arg14[%c2_154, %c0_155, %c0_156] {strides = array<i32: 2, 2, 1>} : memref<18x18x8xf32, #tpu.memory_space<vmem>>, vector<8x8x8xf32>
    %179 = arith.maximumf %177, %178 : vector<8x8x8xf32>
    %c2_157 = arith.constant 2 : index
    %c1_158 = arith.constant 1 : index
    %c0_159 = arith.constant 0 : index
    %180 = tpu.strided_load %arg14[%c2_157, %c1_158, %c0_159] {strides = array<i32: 2, 2, 1>} : memref<18x18x8xf32, #tpu.memory_space<vmem>>, vector<8x8x8xf32>
    %181 = arith.maximumf %179, %180 : vector<8x8x8xf32>
    %c2_160 = arith.constant 2 : index
    %c2_161 = arith.constant 2 : index
    %c0_162 = arith.constant 0 : index
    %182 = tpu.strided_load %arg14[%c2_160, %c2_161, %c0_162] {strides = array<i32: 2, 2, 1>} : memref<18x18x8xf32, #tpu.memory_space<vmem>>, vector<8x8x8xf32>
    %183 = arith.maximumf %181, %182 : vector<8x8x8xf32>
    %c0_163 = arith.constant 0 : index
    %c0_164 = arith.constant 0 : index
    %c0_165 = arith.constant 0 : index
    %c0_166 = arith.constant 0 : index
    %184 = tpu.strided_load %arg1[%c0_163, %c0_164, %c0_165, %c0_166] {strides = array<i32: 1, 2, 2, 1>} : memref<1x16x16x4xf32, #tpu.memory_space<vmem>>, vector<1x8x8x4xf32>
    %185 = vector.shape_cast %184 : vector<1x8x8x4xf32> to vector<8x8x4xf32>
    %186 = vector.shape_cast %185 : vector<8x8x4xf32> to vector<64x4xf32>
    %187 = arith.truncf %186 : vector<64x4xf32> to vector<64x4xbf16>
    %c0_167 = arith.constant 0 : index
    %c0_168 = arith.constant 0 : index
    %188 = vector.load %arg10[%c0_167, %c0_168] : memref<4x8xbf16, #tpu.memory_space<vmem>>, vector<4x8xbf16>
    %cst_169 = arith.constant dense<0.000000e+00> : vector<64x8xf32>
    %189 = tpu.matmul %187, %188, %cst_169 {dimension_numbers = #tpu.dot_dimension_numbers<[1], [0], [0], [1], [0, 0, 1, 1], [], []>} : vector<64x4xbf16>, vector<4x8xbf16>, vector<64x8xf32> -> vector<64x8xf32>
    %c0_170 = arith.constant 0 : index
    %c0_171 = arith.constant 0 : index
    %190 = vector.load %arg11[%c0_170, %c0_171] : memref<1x8xf32, #tpu.memory_space<vmem>>, vector<1x8xf32>
    %191 = vector.broadcast %190 : vector<1x8xf32> to vector<64x8xf32>
    %192 = arith.mulf %189, %191 : vector<64x8xf32>
    %c0_172 = arith.constant 0 : index
    %c0_173 = arith.constant 0 : index
    %193 = vector.load %arg12[%c0_172, %c0_173] : memref<1x8xf32, #tpu.memory_space<vmem>>, vector<1x8xf32>
    %194 = vector.broadcast %193 : vector<1x8xf32> to vector<64x8xf32>
    %195 = arith.addf %192, %194 : vector<64x8xf32>
    %196 = vector.shape_cast %195 : vector<64x8xf32> to vector<8x8x8xf32>
    %197 = arith.addf %183, %196 : vector<8x8x8xf32>
    %c0_174 = arith.constant 0 : index
    %c0_175 = arith.constant 0 : index
    %c0_176 = arith.constant 0 : index
    %c0_177 = arith.constant 0 : index
    %198 = vector.load %arg13[%c0_174, %c0_175, %c0_176, %c0_177] : memref<1x8x8x8xf32, #tpu.memory_space<vmem>>, vector<1x8x8x8xf32>
    %199 = vector.shape_cast %198 : vector<1x8x8x8xf32> to vector<8x8x8xf32>
    %200 = vector.shape_cast %197 : vector<8x8x8xf32> to vector<1x8x8x8xf32>
    tpu.vector_store %arg13[%c0_174, %c0_175, %c0_176, %c0_177], %200 {strides = array<i32>} : memref<1x8x8x8xf32, #tpu.memory_space<vmem>>, vector<1x8x8x8xf32>,
    return
  }
  func.func @transform_0(%arg0: i32) -> (i32, i32, i32, i32) {
    %c0_i32 = arith.constant 0 : i32
    %c0_i32_0 = arith.constant 0 : i32
    %c0_i32_1 = arith.constant 0 : i32
    %c0_i32_2 = arith.constant 0 : i32
    return %arg0, %c0_i32, %c0_i32_0, %c0_i32_1 : i32, i32, i32, i32
  }
  func.func @transform_1(%arg0: i32) -> (i32, i32) {
    %c0_i32 = arith.constant 0 : i32
    %c0_i32_0 = arith.constant 0 : i32
    %c0_i32_1 = arith.constant 0 : i32
    return %c0_i32, %c0_i32_0 : i32, i32
  }
  func.func @transform_2(%arg0: i32) -> (i32, i32) {
    %c0_i32 = arith.constant 0 : i32
    %c0_i32_0 = arith.constant 0 : i32
    %c0_i32_1 = arith.constant 0 : i32
    return %c0_i32, %c0_i32_0 : i32, i32
  }
  func.func @transform_3(%arg0: i32) -> (i32, i32) {
    %c0_i32 = arith.constant 0 : i32
    %c0_i32_0 = arith.constant 0 : i32
    %c0_i32_1 = arith.constant 0 : i32
    return %c0_i32, %c0_i32_0 : i32, i32
  }
  func.func @transform_4(%arg0: i32) -> (i32, i32) {
    %c0_i32 = arith.constant 0 : i32
    %c0_i32_0 = arith.constant 0 : i32
    %c0_i32_1 = arith.constant 0 : i32
    return %c0_i32, %c0_i32_0 : i32, i32
  }
  func.func @transform_5(%arg0: i32) -> (i32, i32) {
    %c0_i32 = arith.constant 0 : i32
    %c0_i32_0 = arith.constant 0 : i32
    %c0_i32_1 = arith.constant 0 : i32
    return %c0_i32, %c0_i32_0 : i32, i32
  }
  func.func @transform_6(%arg0: i32) -> (i32, i32) {
    %c0_i32 = arith.constant 0 : i32
    %c0_i32_0 = arith.constant 0 : i32
    %c0_i32_1 = arith.constant 0 : i32
    return %c0_i32, %c0_i32_0 : i32, i32
  }
  func.func @transform_7(%arg0: i32) -> (i32, i32) {
    %c0_i32 = arith.constant 0 : i32
    %c0_i32_0 = arith.constant 0 : i32
    %c0_i32_1 = arith.constant 0 : i32
    return %c0_i32, %c0_i32_0 : i32, i32
  }
  func.func @transform_8(%arg0: i32) -> (i32, i32) {
    %c0_i32 = arith.constant 0 : i32
    %c0_i32_0 = arith.constant 0 : i32
    %c0_i32_1 = arith.constant 0 : i32
    return %c0_i32, %c0_i32_0 : i32, i32
  }
  func.func @transform_9(%arg0: i32) -> (i32, i32) {
    %c0_i32 = arith.constant 0 : i32
    %c0_i32_0 = arith.constant 0 : i32
    %c0_i32_1 = arith.constant 0 : i32
    return %c0_i32, %c0_i32_0 : i32, i32
  }
  func.func @transform_10(%arg0: i32) -> (i32, i32) {
    %c0_i32 = arith.constant 0 : i32
    %c0_i32_0 = arith.constant 0 : i32
    %c0_i32_1 = arith.constant 0 : i32
    return %c0_i32, %c0_i32_0 : i32, i32
  }
  func.func @transform_11(%arg0: i32) -> (i32, i32) {
    %c0_i32 = arith.constant 0 : i32
    %c0_i32_0 = arith.constant 0 : i32
    %c0_i32_1 = arith.constant 0 : i32
    return %c0_i32, %c0_i32_0 : i32, i32
  }
  func.func @transform_12(%arg0: i32) -> (i32, i32, i32, i32) {
    %c0_i32 = arith.constant 0 : i32
    %c0_i32_0 = arith.constant 0 : i32
    %c0_i32_1 = arith.constant 0 : i32
    %c0_i32_2 = arith.constant 0 : i32
    return %arg0, %c0_i32, %c0_i32_0, %c0_i32_1 : i32, i32, i32, i32
  }
}

</mosaic_0001>

<bundles_post_ra>
// kernel: tpu_custom_call.1
= control target key start
LH: loop header
LB: loop body
LE: loop exit
PB: predicated region body
PF: predicated region fallthrough
CT: control target
= control target key end

     0   :  { %s5678_s0 = inlined_call_operand.vmem [shape: f32[2,16,16,4], index: 0, kind: input, shape index: {}]   ;;  %s5679_s1 = inlined_call_operand.vmem [shape: f32[9,4], index: 1, kind: input, shape index: {}]   ;;  %s5680_s2 = inlined_call_operand.vmem [shape: bf16[4,8], index: 2, kind: input, shape index: {}]   ;;  %s5681_s3 = inlined_call_operand.vmem [shape: f32[1,8], index: 3, kind: input, shape index: {}]   ;;  %s5682_s4 = inlined_call_operand.vmem [shape: f32[1,8], index: 4, kind: input, shape index: {}]   ;;  %s5683_s5 = inlined_call_operand.vmem [shape: f32[9,8], index: 5, kind: input, shape index: {}]   ;;  %s5684_s6 = inlined_call_operand.vmem [shape: bf16[8,8], index: 6, kind: input, shape index: {}]   ;;  %s5685_s7 = inlined_call_operand.vmem [shape: f32[1,8], index: 7, kind: input, shape index: {}]   ;;  %s5686_s8 = inlined_call_operand.vmem [shape: f32[1,8], index: 8, kind: input, shape index: {}]   ;;  %s5687_s9 = inlined_call_operand.vmem [shape: bf16[4,8], index: 9, kind: input, shape index: {}]   ;;  %s5688_s10 = inlined_call_operand.vmem [shape: f32[1,8], index: 10, kind: input, shape index: {}]   ;;  %s5689_s11 = inlined_call_operand.vmem [shape: f32[1,8], index: 11, kind: input, shape index: {}]   ;;  %s5690_s12 = inlined_call_operand.hbm [shape: f32[2,8,8,8], index: 12, kind: output, shape index: {}]  }
   0x1   :  { %5726 = sst [smem:[#allocation18_spill]] %s5678_s0 }
   0x2   :  { %5727 = sst [smem:[#allocation19_spill]] %s5679_s1 }
   0x3   :  { %17 = vsyncpa [#allocation4], 0 }
   0x4   :  { %19 = vsyncpa [#allocation4 + $0x1], 0  ;;  %s3569_s21 = smov 0   ;;  %s3571_s22 = smov 0  }
   0x5   :  { %s3573_s23 = smov 0   ;;  %s3575_s24 = smov 0  }
   0x6 LB: > { %s3590_s25 = sadd.s32 4294967295, %s3498_s24   ;;  %s3289_s26 = sadd.s32 4294967294, %s3498_s24   ;;  %s3498_s24 = sphi %s3575_s24, %s5786_s24   ;;  %s3494_s23 = sphi %s3573_s23, %s5785_s23   ;;  %s3490_s22 = sphi %s3571_s22, %s5784_s22   ;;  %s3486_s21 = sphi %s3569_s21, %s5783_s21  }
   0x7   : > { %s3594_s27 = sadd.s32 1, %s3498_s24   ;;  %s289_s28 = sadd.s32 1, %s3494_s23 }
   0x8   : > { %s286_s29 = ssub.s32 %s3498_s24, %s3594_s27  ;;  %p299_p0 = scmp.ne.s32.totalorder %s3494_s23, %s3490_s22 }
   0x9   : > { %p287_p1 = scmp.eq.s32.totalorder %s286_s29, 0  ;;  %p300_p2 = scmp.eq.s32.totalorder %s3590_s25, 1 }
   0xa   : > { %p305_p3 = scmp.ne.s32.totalorder %s3490_s22, %s3486_s21  ;;  %p306_p4 = scmp.eq.s32.totalorder %s3289_s26, 1 }
   0xb   : > { %s3605_s30 = scalar_select %p287_p1, %s3494_s23, %s289_s28  }
   0xc   : > { %p3607_p5 = por %p300_p2, %p299_p0  ;;  %p3611_p6 = por %p306_p4, %p305_p3 }
   0xd   : > { %p3292_p7 = scmp.ge.s32.totalorder %s3498_s24, 1  ;;  %p365_p8 = scmp.lt.s32.totalorder %s3498_s24, 3 }
   0xf   : > { %p366_p9 = pnand %p3292_p7, %p365_p8 }
  0x11   : > { %369 = sbr.rel (%p366_p9) target bundleno = 648 (0x288), region = 68 }
  0x16   : > { %v1424_v0 = vld [vmem:[%s5680_s2] sm:$0x3]  ;;  %vm1473_vm0 = vcmask 1041408   ;;  %p407_p10 = scmp.lt.s32.totalorder %s3590_s25, 1  ;;  %vm413_vm1 = vcmask 64512   ;;  %v3500_v2 = vmov 0.0  }
  0x17   : > { %v1475_v1 = vsel %vm1473_vm0, %v1424_v0, 0  ;;  %414 = vst.msk [vmem:[#allocation2] sm:$0xff] %vm413_vm1, %v3500_v2  ;;  %vm416_vm2 = vcmask 58368   ;;  %vm422_vm3 = vcmask 57344   ;;  %s5730_s1 = sld [smem:[#allocation19_spill]]  ;;  %vm524_vm4 = vcmask 31744  }
  0x18   : > { %1484 = vmatpush.bf16.msra.mxu0 %v1475_v1  ;;  %s408_s17 = scalar_select %p407_p10, %s3590_s25, 1  ;;  %415 = vst.msk [vmem:[#allocation2 + $0x8] sm:$0xff] %vm413_vm1, %v3500_v2  ;;  %3346 = vmatpush.bf16.msra.mxu3 %v1475_v1  ;;  %vm2617_vm5 = vcmask 1043456  }
  0x19   : > { %417 = vst.msk [vmem:[#allocation2 + $0x10] sm:$0x3] %vm416_vm2, %v3500_v2  ;;  %s5731_s0 = sld [smem:[#allocation18_spill]]  ;;  %s404_s28 = sand.u32 1, %s3490_s22  }
  0x1a   : > { %s3344_s18 = sshll.u32 %s408_s17, 8  ;;  %423 = vst.msk [vmem:[#allocation2] sm:$0x1] %vm422_vm3, %v3500_v2  ;;  %s3293_s17 = sshll.u32 %s404_s28, 6 }
  0x1b   : > { %424 = vst.msk [vmem:[#allocation2 + $0x18] sm:$0x1] %vm422_vm3, %v3500_v2  ;;  %s3345_s19 = sshll.u32 %s3590_s25, 6  ;;  %s3166_s25 = scalar_lea.sflag [#allocation4], %s404_s28 }
  0x1c   : > { %425 = vst.msk [vmem:[#allocation2 + $0x30] sm:$0x1] %vm422_vm3, %v3500_v2  ;;  %s3177_s26 = scalar_lea.hbm %s5690_s12, %s3345_s19 }
  0x1d   : > { %v3634_v3 = vld [vmem:[%s5730_s1] ss:$0 sm:$0xff]  ;;  %v3646_v4 = vld [vmem:[%s5730_s1 + $0x1] ss:$0 sm:$0xff]  ;;  %441 = vst.msk [vmem:[#allocation2 + $0x11] sm:$0x1] %vm422_vm3, %v3500_v2 }
  0x1e   : > { %442 = vst.msk [vmem:[#allocation2 + $0x29] sm:$0x1] %vm422_vm3, %v3500_v2  ;;  %v3661_v12 = vld [vmem:[%s5730_s1 + $0x2] ss:$0 sm:$0xff]  ;;  %v3676_v24 = vld [vmem:[%s5730_s1 + $0x3] ss:$0 sm:$0xff] }
  0x1f   : > { %s3639_s29 = scalar_lea.vmem %s5731_s0, %s3344_s18  ;;  %443 = vst.msk [vmem:[#allocation2 + $0x41] sm:$0x1] %vm422_vm3, %v3500_v2  ;;  %v558_v14 = vld [vmem:[#allocation2 + $0x8] sm:$0xff]  ;;  %v3682_v26 = vld [vmem:[%s5730_s1 + $0x4] ss:$0 sm:$0xff]  ;;  %s5612_s18 = scalar_lea.vmem [#allocation3], %s3293_s17 }
  0x20   : > { %v459_v5 = vld [vmem:[%s3639_s29] sm:$0xff]  ;;  %v460_v6 = vld [vmem:[%s3639_s29 + $0x8] sm:$0xff]  ;;  %v461_v7 = vld [vmem:[%s3639_s29 + $0x10] sm:$0xff]  ;;  %v592_v17 = vmul.f32 %v3634_v3, %v558_v14  ;;  %419 = vst.msk [vmem:[#allocation2 + $0x198] sm:$0xff] %vm413_vm1, %v3500_v2  ;;  %s3178_s15 = sshll.u32 %s5612_s18, 4  ;;  %s3180_s16 = sshll.u32 %s3177_s26, 4  ;;  %s3179_s15 = int_to_ptr.vmem [resolvable:$true] %s3178_s15  ;;  %s3181_s16 = int_to_ptr.hbm [resolvable:$true] %s3180_s16 }
  0x21   : > { %v462_v8 = vld [vmem:[%s3639_s29 + $0x18] sm:$0xff]  ;;  %v491_v9 = vmax.f32 %v459_v5, 0.0  ;;  %v492_v10 = vmax.f32 %v460_v6, 0.0  ;;  %v493_v11 = vmax.f32 %v461_v7, 0.0  ;;  %v623_v15 = vld [vmem:[#allocation2 + $0x1] sm:$0xff]  ;;  %v624_v18 = vld [vmem:[#allocation2 + $0x9] sm:$0xff] }
  0x22   : > { %v494_v13 = vmax.f32 %v462_v8, 0.0  ;;  %v721_v16 = vld [vmem:[#allocation2 + $0x2] sm:$0xff]  ;;  %v657_v19 = vmul.f32 %v3646_v4, %v623_v15  ;;  %v658_v21 = vmul.f32 %v3646_v4, %v624_v18  ;;  %420 = vst.msk [vmem:[#allocation2 + $0x1a0] sm:$0xff] %vm413_vm1, %v3500_v2  ;;  %s3450_s17 = sshra.s32 %s3181_s16, 4  ;;  %s3456_s26 = scalar_lea.hbm %s5690_s12, 128  ;;  %s3451_s17 = int_to_ptr.hbm [resolvable:$true] %s3450_s17 }
  0x23   : > { %525 = vst.msk [vmem:[#allocation2 + $0x19] sm:$0xff] %vm524_vm4, %v491_v9  ;;  %v557_v20 = vld [vmem:[#allocation2] sm:$0xff]  ;;  %v755_v23 = vmul.f32 %v3661_v12, %v721_v16  ;;  %v3726_v50 = vld [vmem:[%s5730_s1 + $0x8] ss:$0 sm:$0xff]  ;;  %s3452_s19 = scalar_lea.hbm %s3451_s17, 64  ;;  %p3457_p0 = scmp.lt.s32.totalorder %s3451_s17, %s5690_s12 }
  0x24   : > { %526 = vst.msk [vmem:[#allocation2 + $0x21] sm:$0xff] %vm524_vm4, %v492_v10  ;;  %v591_v22 = vmul.f32 %v3634_v3, %v557_v20  ;;  %v690_v25 = vadd.f32 %v658_v21, %v592_v17  ;;  %v722_v28 = vld [vmem:[#allocation2 + $0xa] sm:$0xff]  ;;  %v3687_v29 = vld [vmem:[%s5730_s1 + $0x5] ss:$0 sm:$0xff]  ;;  %v3697_v32 = vld [vmem:[%s5730_s1 + $0x6] ss:$0 sm:$0xff]  ;;  %p3453_p11 = scmp.ne.s32.totalorder %s3451_s17, %s3452_s19  ;;  %p3458_p1 = scmp.lt.s32.totalorder %s3456_s26, %s3452_s19 }
  0x25   : > { %527 = vst.msk [vmem:[#allocation2 + $0x31] sm:$0xff] %vm524_vm4, %v493_v11  ;;  %v756_v30 = vmul.f32 %v3661_v12, %v722_v28  ;;  %v3714_v45 = vld [vmem:[%s5730_s1 + $0x7] ss:$0 sm:$0xff] }
  0x26   : > { %528 = vst.msk [vmem:[#allocation2 + $0x39] sm:$0xff] %vm524_vm4, %v494_v13  ;;  %v689_v27 = vadd.f32 %v657_v19, %v591_v22  ;;  %v463_v21 = vld [vmem:[%s3639_s29 + $0x20] sm:$0xff]  ;;  %v464_v22 = vld [vmem:[%s3639_s29 + $0x28] sm:$0xff]  ;;  %p3454_p12 = pnand %p3453_p11, %p3607_p5  ;;  %p3459_p2 = por %p3458_p1, %p3457_p0 }
  0x27   : > { %421 = vst.msk [vmem:[#allocation2 + $0x1a8] sm:$0x3] %vm416_vm2, %v3500_v2  ;;  %v788_v33 = vadd.f32 %v756_v30, %v690_v25  ;;  %v495_v30 = vmax.f32 %v463_v21, 0.0 }
  0x28   : > { %v787_v31 = vadd.f32 %v755_v23, %v689_v27  ;;  %426 = vst.msk [vmem:[#allocation2 + $0x48] sm:$0x1] %vm422_vm3, %v3500_v2  ;;  %p3455_p13 = pneg %p3454_p12 }
  0x29   : > { %427 = vst.msk [vmem:[#allocation2 + $0x60] sm:$0x1] %vm422_vm3, %v3500_v2 }
  0x2a   : > { %v819_v34 = vld [vmem:[#allocation2 + $0x18] sm:$0xff]  ;;  %428 = vst.msk [vmem:[#allocation2 + $0x78] sm:$0x1] %vm422_vm3, %v3500_v2  ;;  %p3460_p3 = pnand %p3459_p2, %p3455_p13 }
  0x2b   : > { %v917_v35 = vld [vmem:[#allocation2 + $0x19] sm:$0xff]  ;;  %v853_v37 = vmul.f32 %v3676_v24, %v819_v34  ;;  %v918_v38 = vld [vmem:[#allocation2 + $0x21] sm:$0xff]  ;;  %429 = vst.msk [vmem:[#allocation2 + $0x90] sm:$0x1] %vm422_vm3, %v3500_v2  ;;  %v593_v11 = vmul.f32 %v3634_v3, %v819_v34 }
  0x2c   : > { %v820_v36 = vld [vmem:[#allocation2 + $0x20] sm:$0xff]  ;;  %v951_v39 = vmul.f32 %v3682_v26, %v917_v35  ;;  %v952_v42 = vmul.f32 %v3682_v26, %v918_v38  ;;  %v3709_v44 = vld [vmem:[#allocation2 + $0x30] sm:$0xff]  ;;  %430 = vst.msk [vmem:[#allocation2 + $0xa8] sm:$0x1] %vm422_vm3, %v3500_v2  ;;  %v659_v13 = vmul.f32 %v3646_v4, %v917_v35  ;;  %v660_v15 = vmul.f32 %v3646_v4, %v918_v38 }
  0x2d   : > { %v1015_v40 = vld [vmem:[#allocation2 + $0x1a] sm:$0xff]  ;;  %v854_v41 = vmul.f32 %v3676_v24, %v820_v36  ;;  %v1016_v43 = vld [vmem:[#allocation2 + $0x22] sm:$0xff]  ;;  %v885_v46 = vadd.f32 %v853_v37, %v787_v31  ;;  %v3721_v49 = vld [vmem:[#allocation2 + $0x31] sm:$0xff]  ;;  %v1148_v56 = vmul.f32 %v3697_v32, %v3709_v44  ;;  %431 = vst.msk [vmem:[#allocation2 + $0xc0] sm:$0x1] %vm422_vm3, %v3500_v2  ;;  %v594_v14 = vmul.f32 %v3634_v3, %v820_v36 }
  0x2e   : > { %v1049_v47 = vmul.f32 %v3687_v29, %v1015_v40  ;;  %v3719_v48 = vld [vmem:[#allocation2 + $0x38] sm:$0xff]  ;;  %v1050_v52 = vmul.f32 %v3687_v29, %v1016_v43  ;;  %432 = vst.msk [vmem:[#allocation2 + $0xd8] sm:$0x1] %vm422_vm3, %v3500_v2  ;;  %v1246_v61 = vmul.f32 %v3714_v45, %v3721_v49  ;;  %v691_v17 = vadd.f32 %v659_v13, %v593_v11 }
  0x2f   : > { %v886_v51 = vadd.f32 %v854_v41, %v788_v33  ;;  %v3731_v53 = vld [vmem:[#allocation2 + $0x39] sm:$0xff]  ;;  %v983_v55 = vadd.f32 %v951_v39, %v885_v46  ;;  %v1149_v59 = vmul.f32 %v3697_v32, %v3719_v48  ;;  %433 = vst.msk [vmem:[#allocation2 + $0xf0] sm:$0x1] %vm422_vm3, %v3500_v2  ;;  %v757_v18 = vmul.f32 %v3661_v12, %v1015_v40  ;;  %v465_v33 = vld [vmem:[%s3639_s29 + $0x30] sm:$0xff]  ;;  %v468_v46 = vld [vmem:[%s3639_s29 + $0x48] sm:$0xff] }
  0x30   : > { %v3733_v54 = vld [vmem:[#allocation2 + $0x32] sm:$0xff]  ;;  %v3739_v57 = vld [vmem:[#allocation2 + $0x3a] sm:$0xff]  ;;  %v1247_v63 = vmul.f32 %v3714_v45, %v3731_v53  ;;  %434 = vst.msk [vmem:[#allocation2 + $0x108] sm:$0x1] %vm422_vm3, %v3500_v2  ;;  %v692_v19 = vadd.f32 %v660_v15, %v594_v14  ;;  %v758_v20 = vmul.f32 %v3661_v12, %v1016_v43  ;;  %v855_v25 = vmul.f32 %v3676_v24, %v3709_v44 }
  0x31   : > { %v984_v58 = vadd.f32 %v952_v42, %v886_v51  ;;  %v1081_v60 = vadd.f32 %v1049_v47, %v983_v55  ;;  %v1344_v1 = vmul.f32 %v3726_v50, %v3733_v54  ;;  %435 = vst.msk [vmem:[#allocation2 + $0x120] sm:$0x1] %vm422_vm3, %v3500_v2  ;;  %v1345_v6 = vmul.f32 %v3726_v50, %v3739_v57  ;;  %v466_v36 = vld [vmem:[%s3639_s29 + $0x38] sm:$0xff]  ;;  %v467_v43 = vld [vmem:[%s3639_s29 + $0x40] sm:$0xff] }
  0x32   : > { %436 = vst.msk [vmem:[#allocation2 + $0x138] sm:$0x1] %vm422_vm3, %v3500_v2  ;;  %v789_v23 = vadd.f32 %v757_v18, %v691_v17  ;;  %v790_v27 = vadd.f32 %v758_v20, %v692_v19  ;;  %v856_v28 = vmul.f32 %v3676_v24, %v3719_v48  ;;  %v496_v31 = vmax.f32 %v464_v22, 0.0 }
  0x33   : > { %v1082_v62 = vadd.f32 %v1050_v52, %v984_v58  ;;  %v1180_v0 = vadd.f32 %v1148_v56, %v1081_v60  ;;  %437 = vst.msk [vmem:[#allocation2 + $0x150] sm:$0x1] %vm422_vm3, %v3500_v2  ;;  %v953_v35 = vmul.f32 %v3682_v26, %v3721_v49  ;;  %v595_v37 = vmul.f32 %v3634_v3, %v3709_v44 }
  0x34   : > { %438 = vst.msk [vmem:[#allocation2 + $0x168] sm:$0x1] %vm422_vm3, %v3500_v2  ;;  %v887_v34 = vadd.f32 %v855_v25, %v789_v23  ;;  %v661_v38 = vmul.f32 %v3646_v4, %v3721_v49  ;;  %v888_v39 = vadd.f32 %v856_v28, %v790_v27  ;;  %v954_v40 = vmul.f32 %v3682_v26, %v3731_v53 }
  0x35   : > { %v1181_v5 = vadd.f32 %v1149_v59, %v1082_v62  ;;  %v1278_v7 = vadd.f32 %v1246_v61, %v1180_v0  ;;  %439 = vst.msk [vmem:[#allocation2 + $0x180] sm:$0x1] %vm422_vm3, %v3500_v2  ;;  %v596_v41 = vmul.f32 %v3634_v3, %v3719_v48  ;;  %v662_v42 = vmul.f32 %v3646_v4, %v3731_v53 }
  0x36   : > { %444 = vst.msk [vmem:[#allocation2 + $0x59] sm:$0x1] %vm422_vm3, %v3500_v2  ;;  %v497_v44 = vmax.f32 %v465_v33, 0.0  ;;  %v1051_v47 = vmul.f32 %v3687_v29, %v3733_v54  ;;  %v1052_v49 = vmul.f32 %v3687_v29, %v3739_v57  ;;  %v498_v51 = vmax.f32 %v466_v36, 0.0 }
  0x37   : > { %v1279_v8 = vadd.f32 %v1247_v63, %v1181_v5  ;;  %v1376_v9 = vadd.f32 %v1344_v1, %v1278_v7  ;;  %445 = vst.msk [vmem:[#allocation2 + $0x71] sm:$0x1] %vm422_vm3, %v3500_v2  ;;  %v985_v52 = vadd.f32 %v953_v35, %v887_v34  ;;  %v693_v48 = vadd.f32 %v661_v38, %v595_v37 }
  0x38   : > { %446 = vst.msk [vmem:[#allocation2 + $0x89] sm:$0x1] %vm422_vm3, %v3500_v2  ;;  %v759_v53 = vmul.f32 %v3661_v12, %v3733_v54  ;;  %v499_v55 = vmax.f32 %v467_v43, 0.0  ;;  %v986_v56 = vadd.f32 %v954_v40, %v888_v39  ;;  %v694_v58 = vadd.f32 %v662_v42, %v596_v41 }
  0x39   : > { %v1377_v10 = vadd.f32 %v1345_v6, %v1279_v8  ;;  %447 = vst.msk [vmem:[#allocation2 + $0xa1] sm:$0x1] %vm422_vm3, %v3500_v2  ;;  %v760_v59 = vmul.f32 %v3661_v12, %v3739_v57  ;;  %v500_v60 = vmax.f32 %v468_v46, 0.0  ;;  %v1083_v61 = vadd.f32 %v1051_v47, %v985_v52 }
  0x3a   : > { %448 = vst.msk [vmem:[#allocation2 + $0xb9] sm:$0x1] %vm422_vm3, %v3500_v2  ;;  %v791_v62 = vadd.f32 %v759_v53, %v693_v48  ;;  %v1084_v63 = vadd.f32 %v1052_v49, %v986_v56 }
  0x3b   : > { %v1408_v16 = vpack.c.bf16 %v1377_v10, %v1376_v9  ;;  %449 = vst.msk [vmem:[#allocation2 + $0xd1] sm:$0x1] %vm422_vm3, %v3500_v2  ;;  %v792_v1 = vadd.f32 %v760_v59, %v694_v58 }
  0x3c   : > { %450 = vst.msk [vmem:[#allocation2 + $0xe9] sm:$0x1] %vm422_vm3, %v3500_v2 }
  0x3d   : > { %3296 = vmatmul.msk.bf16.vlgmr.msra.gmra.mxu0 %vm524_vm4, %v1408_v16  ;;  %451 = vst.msk [vmem:[#allocation2 + $0x101] sm:$0x1] %vm422_vm3, %v3500_v2 }
  0x3e   : > { %452 = vst.msk [vmem:[#allocation2 + $0x119] sm:$0x1] %vm422_vm3, %v3500_v2 }
  0x3f   : > { %453 = vst.msk [vmem:[#allocation2 + $0x131] sm:$0x1] %vm422_vm3, %v3500_v2 }
  0x40   : > { %454 = vst.msk [vmem:[#allocation2 + $0x149] sm:$0x1] %vm422_vm3, %v3500_v2 }
  0x41   : > { %455 = vst.msk [vmem:[#allocation2 + $0x161] sm:$0x1] %vm422_vm3, %v3500_v2 }
  0x42   : > { %456 = vst.msk [vmem:[#allocation2 + $0x179] sm:$0x1] %vm422_vm3, %v3500_v2 }
  0x43   : > { %457 = vst.msk [vmem:[#allocation2 + $0x191] sm:$0x1] %vm422_vm3, %v3500_v2 }
  0x44   : > { %529 = vst.msk [vmem:[#allocation2 + $0x49] sm:$0xff] %vm524_vm4, %v495_v30 }
  0x45   : > { %530 = vst.msk [vmem:[#allocation2 + $0x51] sm:$0xff] %vm524_vm4, %v496_v31 }
  0x46   : > { %440 = vst.msk [vmem:[#allocation2 + $0x198] sm:$0x1] %vm422_vm3, %v3500_v2 }
  0x47   : > { %458 = vst.msk [vmem:[#allocation2 + $0x1a9] sm:$0x1] %vm422_vm3, %v3500_v2 }
  0x48   : > { %531 = vst.msk [vmem:[#allocation2 + $0x61] sm:$0xff] %vm524_vm4, %v497_v44 }
  0x49   : > { %532 = vst.msk [vmem:[#allocation2 + $0x69] sm:$0xff] %vm524_vm4, %v498_v51 }
  0x4a   : > { %533 = vst.msk [vmem:[#allocation2 + $0x79] sm:$0xff] %vm524_vm4, %v499_v55 }
  0x4b   : > { %v1116_v54 = vld [vmem:[#allocation2 + $0x48] sm:$0xff]  ;;  %534 = vst.msk [vmem:[#allocation2 + $0x81] sm:$0xff] %vm524_vm4, %v500_v60 }
  0x4c   : > { %v1214_v0 = vld [vmem:[#allocation2 + $0x49] sm:$0xff]  ;;  %v1150_v5 = vmul.f32 %v3697_v32, %v1116_v54  ;;  %v1215_v6 = vld [vmem:[#allocation2 + $0x51] sm:$0xff]  ;;  %v857_v8 = vmul.f32 %v3676_v24, %v1116_v54  ;;  %v597_v51 = vmul.f32 %v3634_v3, %v1116_v54 }
  0x4d   : > { %v1117_v2 = vld [vmem:[#allocation2 + $0x50] sm:$0xff]  ;;  %v1248_v57 = vmul.f32 %v3714_v45, %v1214_v0  ;;  %v955_v9 = vmul.f32 %v3682_v26, %v1214_v0  ;;  %v1249_v11 = vmul.f32 %v3714_v45, %v1215_v6  ;;  %v956_v19 = vmul.f32 %v3682_v26, %v1215_v6 }
  0x4e   : > { %v1312_v7 = vld [vmem:[#allocation2 + $0x4a] sm:$0xff]  ;;  %v1151_v10 = vmul.f32 %v3697_v32, %v1117_v2  ;;  %v1313_v13 = vld [vmem:[#allocation2 + $0x52] sm:$0xff]  ;;  %v858_v15 = vmul.f32 %v3676_v24, %v1117_v2  ;;  %v1182_v16 = vadd.f32 %v1150_v5, %v1083_v61  ;;  %v889_v18 = vadd.f32 %v857_v8, %v791_v62 }
  0x4f   : > { %v1346_v14 = vmul.f32 %v3726_v50, %v1312_v7  ;;  %v1347_v17 = vmul.f32 %v3726_v50, %v1313_v13  ;;  %v1053_v22 = vmul.f32 %v3687_v29, %v1312_v7  ;;  %v1054_v23 = vmul.f32 %v3687_v29, %v1313_v13  ;;  %v3856_v25 = vld [vmem:[#allocation2 + $0x60] sm:$0xff] }
  0x50   : > { %v1183_v20 = vadd.f32 %v1151_v10, %v1084_v63  ;;  %v890_v21 = vadd.f32 %v858_v15, %v792_v1  ;;  %v3858_v27 = vld [vmem:[#allocation2 + $0x61] sm:$0xff]  ;;  %v1280_v28 = vadd.f32 %v1248_v57, %v1182_v16  ;;  %v987_v30 = vadd.f32 %v955_v9, %v889_v18  ;;  %v1217_v34 = vld [vmem:[#allocation2 + $0x69] sm:$0xff]  ;;  %v470_v16 = vld [vmem:[%s3639_s29 + $0x58] sm:$0xff] }
  0x51   : > { %v1119_v31 = vld [vmem:[#allocation2 + $0x68] sm:$0xff]  ;;  %v1152_v33 = vmul.f32 %v3697_v32, %v3856_v25  ;;  %v1250_v35 = vmul.f32 %v3714_v45, %v3858_v27  ;;  %v1251_v40 = vmul.f32 %v3714_v45, %v1217_v34  ;;  %v598_v52 = vmul.f32 %v3634_v3, %v1117_v2  ;;  %v3877_v2 = vld [vmem:[#allocation2 + $0x78] sm:$0xff]  ;;  %v469_v15 = vld [vmem:[%s3639_s29 + $0x50] sm:$0xff] }
  0x52   : > { %v1314_v36 = vld [vmem:[#allocation2 + $0x62] sm:$0xff]  ;;  %v1281_v37 = vadd.f32 %v1249_v11, %v1183_v20  ;;  %v988_v38 = vadd.f32 %v956_v19, %v890_v21  ;;  %v1153_v39 = vmul.f32 %v3697_v32, %v1119_v31  ;;  %v1315_v41 = vld [vmem:[#allocation2 + $0x6a] sm:$0xff]  ;;  %v1378_v42 = vadd.f32 %v1346_v14, %v1280_v28  ;;  %v3892_v14 = vld [vmem:[#allocation2 + $0x7a] sm:$0xff] }
  0x53   : > { %v1085_v43 = vadd.f32 %v1053_v22, %v987_v30  ;;  %v1348_v44 = vmul.f32 %v3726_v50, %v1314_v36  ;;  %v1349_v46 = vmul.f32 %v3726_v50, %v1315_v41  ;;  %v663_v53 = vmul.f32 %v3646_v4, %v1214_v0  ;;  %v3879_v0 = vld [vmem:[#allocation2 + $0x80] sm:$0xff] }
  0x54   : > { %v1379_v47 = vadd.f32 %v1347_v17, %v1281_v37  ;;  %v1086_v49 = vadd.f32 %v1054_v23, %v988_v38  ;;  %v664_v55 = vmul.f32 %v3646_v4, %v1215_v6  ;;  %v761_v56 = vmul.f32 %v3661_v12, %v1312_v7  ;;  %v3885_v7 = vld [vmem:[#allocation2 + $0x79] sm:$0xff]  ;;  %v3887_v8 = vld [vmem:[#allocation2 + $0x81] sm:$0xff] }
  0x55   : > { %v1184_v48 = vadd.f32 %v1152_v33, %v1085_v43  ;;  %v762_v60 = vmul.f32 %v3661_v12, %v1313_v13  ;;  %v859_v61 = vmul.f32 %v3676_v24, %v3856_v25  ;;  %v695_v63 = vadd.f32 %v663_v53, %v597_v51  ;;  %v3909_v33 = vld [vmem:[#allocation2 + $0x82] sm:$0xff] }
  0x56   : > { %v1409_v58 = vpack.c.bf16 %v1379_v47, %v1378_v42  ;;  %v1185_v59 = vadd.f32 %v1153_v39, %v1086_v49  ;;  %v696_v54 = vadd.f32 %v664_v55, %v598_v52  ;;  %v860_v1 = vmul.f32 %v3676_v24, %v1119_v31  ;;  %v477_v55 = vld [vmem:[%s3639_s29 + $0x90] sm:$0xff] }
  0x57   : > { %v1282_v62 = vadd.f32 %v1250_v35, %v1184_v48  ;;  %v957_v6 = vmul.f32 %v3682_v26, %v3858_v27  ;;  %v958_v57 = vmul.f32 %v3682_v26, %v1217_v34  ;;  %v793_v10 = vadd.f32 %v761_v56, %v695_v63  ;;  %v476_v48 = vld [vmem:[%s3639_s29 + $0x88] sm:$0xff]  ;;  %v478_v56 = vld [vmem:[%s3639_s29 + $0x98] sm:$0xff] }
  0x58   : > { %3297 = vmatmul.msk.bf16.gmra.mxu0 %vm524_vm4, %v1409_v58  ;;  %v1283_v5 = vadd.f32 %v1251_v40, %v1185_v59  ;;  %v794_v11 = vadd.f32 %v762_v60, %v696_v54  ;;  %v1055_v13 = vmul.f32 %v3687_v29, %v1314_v36  ;;  %v1056_v18 = vmul.f32 %v3687_v29, %v1315_v41 }
  0x59   : > { %v3889_v9 = vadd.f32 %v1348_v44, %v1282_v62  ;;  %v1154_v19 = vmul.f32 %v3697_v32, %v3877_v2  ;;  %v1155_v20 = vmul.f32 %v3697_v32, %v3879_v0  ;;  %v891_v21 = vadd.f32 %v859_v61, %v793_v10  ;;  %v479_v62 = vld [vmem:[%s3639_s29 + $0xa0] sm:$0xff] }
  0x5a   : > { %v3896_v17 = vadd.f32 %v1349_v46, %v1283_v5  ;;  %v892_v22 = vadd.f32 %v860_v1, %v794_v11  ;;  %v1252_v23 = vmul.f32 %v3714_v45, %v3885_v7  ;;  %v1253_v28 = vmul.f32 %v3714_v45, %v3887_v8  ;;  %v480_v1 = vld [vmem:[%s3639_s29 + $0xa8] sm:$0xff] }
  0x5b   : > { %v1350_v35 = vmul.f32 %v3726_v50, %v3892_v14  ;;  %v501_v37 = vmax.f32 %v469_v15, 0.0  ;;  %v502_v38 = vmax.f32 %v470_v16, 0.0  ;;  %v989_v39 = vadd.f32 %v957_v6, %v891_v21  ;;  %v471_v15 = vld [vmem:[%s3639_s29 + $0x60] sm:$0xff]  ;;  %v472_v16 = vld [vmem:[%s3639_s29 + $0x68] sm:$0xff] }
  0x5c   : > { %v1410_v30 = vpack.c.bf16 %v3896_v17, %v3889_v9  ;;  %v990_v40 = vadd.f32 %v958_v57, %v892_v22  ;;  %v599_v42 = vmul.f32 %v3634_v3, %v3856_v25  ;;  %v600_v43 = vmul.f32 %v3634_v3, %v1119_v31 }
  0x5d   : > { %535 = vst.msk [vmem:[#allocation2 + $0x91] sm:$0xff] %vm524_vm4, %v501_v37  ;;  %v665_v44 = vmul.f32 %v3646_v4, %v3858_v27  ;;  %v666_v46 = vmul.f32 %v3646_v4, %v1217_v34  ;;  %v763_v47 = vmul.f32 %v3661_v12, %v1314_v36  ;;  %v764_v49 = vmul.f32 %v3661_v12, %v1315_v41  ;;  %v475_v27 = vld [vmem:[%s3639_s29 + $0x80] sm:$0xff] }
  0x5e   : > { %v1087_v51 = vadd.f32 %v1055_v13, %v989_v39  ;;  %v1088_v52 = vadd.f32 %v1056_v18, %v990_v40  ;;  %v1351_v25 = vmul.f32 %v3726_v50, %v3909_v33  ;;  %536 = vst.msk [vmem:[#allocation2 + $0x99] sm:$0xff] %vm524_vm4, %v502_v38  ;;  %v861_v31 = vmul.f32 %v3676_v24, %v3877_v2 }
  0x5f   : > { %v697_v53 = vadd.f32 %v665_v44, %v599_v42  ;;  %v698_v34 = vadd.f32 %v666_v46, %v600_v43  ;;  %v862_v36 = vmul.f32 %v3676_v24, %v3879_v0  ;;  %v959_v41 = vmul.f32 %v3682_v26, %v3885_v7 }
  0x60   : > { %v1186_v58 = vadd.f32 %v1154_v19, %v1087_v51  ;;  %v1187_v59 = vadd.f32 %v1155_v20, %v1088_v52  ;;  %v960_v60 = vmul.f32 %v3682_v26, %v3887_v8  ;;  %v1057_v61 = vmul.f32 %v3687_v29, %v3892_v14 }
  0x61   : > { %v795_v63 = vadd.f32 %v763_v47, %v697_v53  ;;  %v796_v54 = vadd.f32 %v764_v49, %v698_v34  ;;  %v507_v5 = vmax.f32 %v475_v27, 0.0  ;;  %v508_v6 = vmax.f32 %v476_v48, 0.0 }
  0x62   : > { %v1284_v57 = vadd.f32 %v1252_v23, %v1186_v58  ;;  %v1285_v10 = vadd.f32 %v1253_v28, %v1187_v59  ;;  %v509_v11 = vmax.f32 %v477_v55, 0.0  ;;  %v510_v13 = vmax.f32 %v478_v56, 0.0 }
  0x63   : > { %v893_v18 = vadd.f32 %v861_v31, %v795_v63  ;;  %v894_v19 = vadd.f32 %v862_v36, %v796_v54  ;;  %v1058_v20 = vmul.f32 %v3687_v29, %v3909_v33  ;;  %v511_v21 = vmax.f32 %v479_v62, 0.0  ;;  %541 = vst.msk [vmem:[#allocation2 + $0xd9] sm:$0xff] %vm524_vm4, %v507_v5 }
  0x64   : > { %v3946_v22 = vadd.f32 %v1350_v35, %v1284_v57  ;;  %v3948_v37 = vadd.f32 %v1351_v25, %v1285_v10  ;;  %v3950_v38 = vld [vmem:[#allocation2 + $0x90] sm:$0xff]  ;;  %v512_v28 = vmax.f32 %v480_v1, 0.0  ;;  %542 = vst.msk [vmem:[#allocation2 + $0xe1] sm:$0xff] %vm524_vm4, %v508_v6  ;;  %v503_v39 = vmax.f32 %v471_v15, 0.0 }
  0x65   : > { %v3952_v23 = vld [vmem:[#allocation2 + $0x91] sm:$0xff]  ;;  %v991_v40 = vadd.f32 %v959_v41, %v893_v18  ;;  %v992_v42 = vadd.f32 %v960_v60, %v894_v19  ;;  %v1156_v44 = vmul.f32 %v3697_v32, %v3950_v38  ;;  %v3959_v46 = vld [vmem:[#allocation2 + $0x99] sm:$0xff]  ;;  %543 = vst.msk [vmem:[#allocation2 + $0xf1] sm:$0xff] %vm524_vm4, %v509_v11  ;;  %v504_v47 = vmax.f32 %v472_v16, 0.0 }
  0x66   : > { %v3955_v43 = vld [vmem:[#allocation2 + $0x98] sm:$0xff]  ;;  %v1254_v52 = vmul.f32 %v3714_v45, %v3952_v23  ;;  %v1255_v25 = vmul.f32 %v3714_v45, %v3959_v46  ;;  %544 = vst.msk [vmem:[#allocation2 + $0xf9] sm:$0xff] %vm524_vm4, %v510_v13  ;;  %v601_v34 = vmul.f32 %v3634_v3, %v3877_v2  ;;  %v602_v36 = vmul.f32 %v3634_v3, %v3879_v0 }
  0x67   : > { %v3961_v35 = vld [vmem:[#allocation2 + $0x92] sm:$0xff]  ;;  %v1157_v51 = vmul.f32 %v3697_v32, %v3955_v43  ;;  %v3972_v31 = vld [vmem:[#allocation2 + $0x9a] sm:$0xff]  ;;  %v1089_v27 = vadd.f32 %v1057_v61, %v991_v40  ;;  %v1090_v48 = vadd.f32 %v1058_v20, %v992_v42  ;;  %545 = vst.msk [vmem:[#allocation2 + $0x109] sm:$0xff] %vm524_vm4, %v511_v21  ;;  %v667_v9 = vmul.f32 %v3646_v4, %v3885_v7 }
  0x68   : > { %3298 = vmatmul.msk.bf16.gmra.mxu0 %vm524_vm4, %v1410_v30  ;;  %v1352_v53 = vmul.f32 %v3726_v50, %v3961_v35  ;;  %546 = vst.msk [vmem:[#allocation2 + $0x111] sm:$0xff] %vm524_vm4, %v512_v28  ;;  %v668_v17 = vmul.f32 %v3646_v4, %v3887_v8  ;;  %v1353_v55 = vmul.f32 %v3726_v50, %v3972_v31 }
  0x69   : > { %v1188_v30 = vadd.f32 %v1156_v44, %v1089_v27  ;;  %v1189_v41 = vadd.f32 %v1157_v51, %v1090_v48  ;;  %537 = vst.msk [vmem:[#allocation2 + $0xa9] sm:$0xff] %vm524_vm4, %v503_v39  ;;  %v765_v56 = vmul.f32 %v3661_v12, %v3892_v14  ;;  %v699_v0 = vadd.f32 %v667_v9, %v601_v34 }
  0x6a   : > { %v3996_v2 = vld [vmem:[#allocation2 + $0xd8] sm:$0xff]  ;;  %538 = vst.msk [vmem:[#allocation2 + $0xb1] sm:$0xff] %vm524_vm4, %v504_v47  ;;  %v700_v7 = vadd.f32 %v668_v17, %v602_v36  ;;  %v766_v8 = vmul.f32 %v3661_v12, %v3909_v33  ;;  %v863_v59 = vmul.f32 %v3676_v24, %v3950_v38  ;;  %v864_v13 = vmul.f32 %v3676_v24, %v3955_v43 }
  0x6b   : > { %5732 = vst [vmem:[#allocation6_spill] sm:$0xff] %v3996_v2  ;;  %v3998_v58 = vld [vmem:[#allocation2 + $0xd9] sm:$0xff]  ;;  %v1286_v60 = vadd.f32 %v1254_v52, %v1188_v30  ;;  %v1287_v61 = vadd.f32 %v1255_v25, %v1189_v41  ;;  %v609_v14 = vmul.f32 %v3634_v3, %v3996_v2  ;;  %v4009_v63 = vld [vmem:[#allocation2 + $0xe1] sm:$0xff]  ;;  %v797_v28 = vadd.f32 %v765_v56, %v699_v0 }
  0x6c   : > { %5733 = vst [vmem:[#allocation7_spill] sm:$0xff] %v3998_v58  ;;  %v4005_v62 = vld [vmem:[#allocation2 + $0xe0] sm:$0xff]  ;;  %v675_v54 = vmul.f32 %v3646_v4, %v3998_v58  ;;  %v676_v5 = vmul.f32 %v3646_v4, %v4009_v63  ;;  %v4023_v10 = vld [vmem:[#allocation2 + $0xf0] sm:$0xff]  ;;  %v962_v49 = vmul.f32 %v3682_v26, %v3959_v46  ;;  %v482_v2 = vld [vmem:[%s3639_s29 + $0xb8] sm:$0xff] }
  0x6d   : > { %5734 = vst [vmem:[#allocation8_spill] sm:$0xff] %v4005_v62  ;;  %v4013_v1 = vld [vmem:[#allocation2 + $0xda] sm:$0xff]  ;;  %v610_v33 = vmul.f32 %v3634_v3, %v4005_v62  ;;  %v4019_v6 = vld [vmem:[#allocation2 + $0xe2] sm:$0xff]  ;;  %v4025_v11 = vld [vmem:[#allocation2 + $0xf1] sm:$0xff]  ;;  %v4029_v15 = vadd.f32 %v1352_v53, %v1286_v60  ;;  %v4039_v39 = vadd.f32 %v1353_v55, %v1287_v61  ;;  %v871_v42 = vmul.f32 %v3676_v24, %v4023_v10 }
  0x6e   : > { %5735 = vst [vmem:[#allocation9_spill] sm:$0xff] %v4009_v63  ;;  %v773_v57 = vmul.f32 %v3661_v12, %v4013_v1  ;;  %v707_v16 = vadd.f32 %v675_v54, %v609_v14  ;;  %v774_v18 = vmul.f32 %v3661_v12, %v4019_v6  ;;  %v4033_v19 = vld [vmem:[#allocation2 + $0xf8] sm:$0xff]  ;;  %v4047_v51 = vld [vmem:[#allocation2 + $0x108] sm:$0xff]  ;;  %v969_v27 = vmul.f32 %v3682_v26, %v4025_v11 }
  0x6f   : > { %5736 = vst [vmem:[#allocation10_spill] sm:$0xff] %v4013_v1  ;;  %v4035_v20 = vld [vmem:[#allocation2 + $0xf9] sm:$0xff]  ;;  %v708_v40 = vadd.f32 %v676_v5, %v610_v33  ;;  %v872_v44 = vmul.f32 %v3676_v24, %v4033_v19  ;;  %v4049_v52 = vld [vmem:[#allocation2 + $0x109] sm:$0xff]  ;;  %v4059_v36 = vld [vmem:[#allocation2 + $0x111] sm:$0xff]  ;;  %v1166_v41 = vmul.f32 %v3697_v32, %v4047_v51 }
  0x70   : > { %5737 = vst [vmem:[#allocation11_spill] sm:$0xff] %v4019_v6  ;;  %v4037_v21 = vld [vmem:[#allocation2 + $0xf2] sm:$0xff]  ;;  %v4045_v47 = vld [vmem:[#allocation2 + $0xfa] sm:$0xff]  ;;  %v805_v25 = vadd.f32 %v773_v57, %v707_v16  ;;  %v970_v48 = vmul.f32 %v3682_v26, %v4035_v20  ;;  %v4061_v9 = vld [vmem:[#allocation2 + $0x10a] sm:$0xff]  ;;  %v1264_v60 = vmul.f32 %v3714_v45, %v4049_v52  ;;  %v1265_v61 = vmul.f32 %v3714_v45, %v4059_v36 }
  0x71   : > { %5738 = vst [vmem:[#allocation12_spill] sm:$0xff] %v4045_v47  ;;  %v1067_v53 = vmul.f32 %v3687_v29, %v4037_v21  ;;  %v4057_v34 = vld [vmem:[#allocation2 + $0x110] sm:$0xff]  ;;  %v806_v17 = vadd.f32 %v774_v18, %v708_v40  ;;  %v1068_v30 = vmul.f32 %v3687_v29, %v4045_v47  ;;  %v1362_v14 = vmul.f32 %v3726_v50, %v4061_v9  ;;  %v4077_v54 = vld [vmem:[#allocation2 + $0xa8] sm:$0xff] }
  0x72   : > { %v1167_v55 = vmul.f32 %v3697_v32, %v4057_v34  ;;  %v4069_v56 = vld [vmem:[#allocation2 + $0x112] sm:$0xff]  ;;  %v903_v0 = vadd.f32 %v871_v42, %v805_v25  ;;  %5739 = vst [vmem:[#allocation13_spill] sm:$0xff] %v4077_v54  ;;  %v798_v57 = vadd.f32 %v766_v8, %v700_v7  ;;  %v895_v16 = vadd.f32 %v863_v59, %v797_v28  ;;  %v4083_v40 = vld [vmem:[#allocation2 + $0xa9] sm:$0xff] }
  0x73   : > { %v904_v33 = vadd.f32 %v872_v44, %v806_v17  ;;  %v1363_v5 = vmul.f32 %v3726_v50, %v4069_v56  ;;  %v4081_v18 = vld [vmem:[#allocation2 + $0xb0] sm:$0xff]  ;;  %5740 = vst [vmem:[#allocation14_spill] sm:$0xff] %v4083_v40  ;;  %v961_v25 = vmul.f32 %v3682_v26, %v3952_v23  ;;  %v1059_v44 = vmul.f32 %v3687_v29, %v3961_v35 }
  0x74   : > { %v1001_v42 = vadd.f32 %v969_v27, %v903_v0  ;;  %v4091_v17 = vld [vmem:[#allocation2 + $0xb1] sm:$0xff]  ;;  %v896_v8 = vadd.f32 %v864_v13, %v798_v57  ;;  %v1060_v59 = vmul.f32 %v3687_v29, %v3972_v31  ;;  %v1158_v28 = vmul.f32 %v3697_v32, %v4077_v54 }
  0x75   : > { %5741 = vst [vmem:[#allocation15_spill] sm:$0xff] %v4091_v17  ;;  %v4093_v6 = vld [vmem:[#allocation2 + $0xaa] sm:$0xff]  ;;  %v1002_v7 = vadd.f32 %v970_v48, %v904_v33  ;;  %v4099_v27 = vld [vmem:[#allocation2 + $0xb2] sm:$0xff]  ;;  %v993_v63 = vadd.f32 %v961_v25, %v895_v16  ;;  %v1159_v58 = vmul.f32 %v3697_v32, %v4081_v18  ;;  %v1256_v62 = vmul.f32 %v3714_v45, %v4083_v40 }
  0x76   : > { %v481_v0 = vld [vmem:[%s3639_s29 + $0xb0] sm:$0xff]  ;;  %v1099_v1 = vadd.f32 %v1067_v53, %v1001_v42  ;;  %v994_v13 = vadd.f32 %v962_v49, %v896_v8  ;;  %v1257_v33 = vmul.f32 %v3714_v45, %v4091_v17  ;;  %v1354_v57 = vmul.f32 %v3726_v50, %v4093_v6 }
  0x77   : > { %v1100_v48 = vadd.f32 %v1068_v30, %v1002_v7  ;;  %v5742_v54 = vpack.c.bf16 %v3948_v37, %v3946_v22  ;;  %v1091_v16 = vadd.f32 %v1059_v44, %v993_v63  ;;  %v1355_v42 = vmul.f32 %v3726_v50, %v4099_v27 }
  0x78   : > { %v1198_v53 = vadd.f32 %v1166_v41, %v1099_v1  ;;  %v513_v25 = vmax.f32 %v481_v0, 0.0  ;;  %v1092_v30 = vadd.f32 %v1060_v59, %v994_v13  ;;  %v514_v49 = vmax.f32 %v482_v2, 0.0 }
  0x79   : > { %3299 = vmatmul.msk.bf16.gmra.mxu0 %vm524_vm4, %v5742_v54  ;;  %v1199_v40 = vadd.f32 %v1167_v55, %v1100_v48  ;;  %v611_v7 = vmul.f32 %v3634_v3, %v4023_v10  ;;  %v1190_v17 = vadd.f32 %v1158_v28, %v1091_v16  ;;  %v612_v22 = vmul.f32 %v3634_v3, %v4033_v19 }
  0x7a   : > { %v1296_v8 = vadd.f32 %v1264_v60, %v1198_v53  ;;  %547 = vst.msk [vmem:[#allocation2 + $0x121] sm:$0xff] %vm524_vm4, %v513_v25  ;;  %v677_v37 = vmul.f32 %v3646_v4, %v4025_v11  ;;  %v1191_v1 = vadd.f32 %v1159_v58, %v1092_v30  ;;  %v678_v2 = vmul.f32 %v3646_v4, %v4035_v20 }
  0x7b   : > { %v1297_v63 = vadd.f32 %v1265_v61, %v1199_v40  ;;  %548 = vst.msk [vmem:[#allocation2 + $0x129] sm:$0xff] %vm524_vm4, %v514_v49  ;;  %v775_v41 = vmul.f32 %v3661_v12, %v4037_v21  ;;  %v1288_v60 = vadd.f32 %v1256_v62, %v1190_v17  ;;  %v776_v44 = vmul.f32 %v3661_v12, %v4045_v47  ;;  %v473_v61 = vld [vmem:[%s3639_s29 + $0x70] sm:$0xff] }
  0x7c   : > { %v1394_v55 = vadd.f32 %v1362_v14, %v1296_v8  ;;  %v709_v54 = vadd.f32 %v677_v37, %v611_v7  ;;  %v1289_v28 = vadd.f32 %v1257_v33, %v1191_v1  ;;  %v710_v0 = vadd.f32 %v678_v2, %v612_v22  ;;  %v474_v14 = vld [vmem:[%s3639_s29 + $0x78] sm:$0xff] }
  0x7d   : > { %v1395_v59 = vadd.f32 %v1363_v5, %v1297_v63  ;;  %v873_v58 = vmul.f32 %v3676_v24, %v4047_v51  ;;  %v4134_v40 = vadd.f32 %v1354_v57, %v1288_v60  ;;  %v874_v13 = vmul.f32 %v3676_v24, %v4057_v34 }
  0x7e   : > { %v807_v48 = vadd.f32 %v775_v41, %v709_v54  ;;  %v971_v62 = vmul.f32 %v3682_v26, %v4049_v52  ;;  %v4141_v53 = vadd.f32 %v1355_v42, %v1289_v28  ;;  %v808_v5 = vadd.f32 %v776_v44, %v710_v0 }
  0x7f   : > { %v1417_v17 = vpack.c.bf16 %v1395_v59, %v1394_v55  ;;  %v972_v33 = vmul.f32 %v3682_v26, %v4059_v36  ;;  %v1412_v16 = vpack.c.bf16 %v4039_v39, %v4029_v15  ;;  %v1069_v25 = vmul.f32 %v3687_v29, %v4061_v9 }
  0x80   : > { %v905_v57 = vadd.f32 %v873_v58, %v807_v48  ;;  %v505_v30 = vmax.f32 %v473_v61, 0.0  ;;  %v1413_v49 = vpack.c.bf16 %v4141_v53, %v4134_v40  ;;  %v906_v7 = vadd.f32 %v874_v13, %v808_v5  ;;  %v5743_v13 = vld [vmem:[#allocation13_spill] sm:$0xff] }
  0x81   : > { %3305 = vmatmul.msk.bf16.vlgmr.msra.gmra.mxu3 %vm524_vm4, %v1417_v17  ;;  %v1070_v42 = vmul.f32 %v3687_v29, %v4069_v56  ;;  %v4154_v8 = vld [vmem:[#allocation2 + $0x120] sm:$0xff]  ;;  %v506_v37 = vmax.f32 %v474_v14, 0.0  ;;  %v603_v41 = vmul.f32 %v3634_v3, %v3950_v38  ;;  %v604_v55 = vmul.f32 %v3634_v3, %v3955_v43 }
  0x82   : > { %v4156_v22 = vld [vmem:[#allocation2 + $0x121] sm:$0xff]  ;;  %v1003_v15 = vadd.f32 %v971_v62, %v905_v57  ;;  %v1168_v63 = vmul.f32 %v3697_v32, %v4154_v8  ;;  %v4162_v1 = vld [vmem:[#allocation2 + $0x129] sm:$0xff]  ;;  %539 = vst.msk [vmem:[#allocation2 + $0xc1] sm:$0xff] %vm524_vm4, %v505_v30  ;;  %v1004_v60 = vadd.f32 %v972_v33, %v906_v7  ;;  %v669_v38 = vmul.f32 %v3646_v4, %v3952_v23  ;;  %v5745_v30 = vld [vmem:[#allocation15_spill] sm:$0xff] }
  0x83   : > { %v4158_v39 = vld [vmem:[#allocation2 + $0x128] sm:$0xff]  ;;  %v1266_v44 = vmul.f32 %v3714_v45, %v4156_v22  ;;  %v1267_v59 = vmul.f32 %v3714_v45, %v4162_v1  ;;  %540 = vst.msk [vmem:[#allocation2 + $0xc9] sm:$0xff] %vm524_vm4, %v506_v37  ;;  %v670_v43 = vmul.f32 %v3646_v4, %v3959_v46  ;;  %v767_v61 = vmul.f32 %v3661_v12, %v3961_v35  ;;  %v483_v23 = vld [vmem:[%s3639_s29 + $0xc0] sm:$0xff]  ;;  %v5744_v46 = vld [vmem:[#allocation14_spill] sm:$0xff] }
  0x84   : > { %v4164_v2 = vld [vmem:[#allocation2 + $0x122] sm:$0xff]  ;;  %v1169_v54 = vmul.f32 %v3697_v32, %v4158_v39  ;;  %v1101_v28 = vadd.f32 %v1069_v25, %v1003_v15  ;;  %v4178_v0 = vld [vmem:[#allocation2 + $0x12a] sm:$0xff]  ;;  %v1102_v58 = vadd.f32 %v1070_v42, %v1004_v60  ;;  %v768_v48 = vmul.f32 %v3661_v12, %v3972_v31 }
  0x85   : > { %v1364_v3 = vmul.f32 %v3726_v50, %v4164_v2  ;;  %v865_v62 = vmul.f32 %v3676_v24, %v5743_v13  ;;  %v701_v17 = vadd.f32 %v669_v38, %v603_v41  ;;  %v702_v5 = vadd.f32 %v670_v43, %v604_v55  ;;  %v484_v57 = vld [vmem:[%s3639_s29 + $0xc8] sm:$0xff] }
  0x86   : > { %v1200_v14 = vadd.f32 %v1168_v63, %v1101_v28  ;;  %v866_v33 = vmul.f32 %v3676_v24, %v4081_v18  ;;  %v1201_v25 = vadd.f32 %v1169_v54, %v1102_v58  ;;  %v1365_v4 = vmul.f32 %v3726_v50, %v4178_v0 }
  0x87   : > { %v963_v35 = vmul.f32 %v3682_v26, %v5744_v46  ;;  %v964_v12 = vmul.f32 %v3682_v26, %v5745_v30  ;;  %v799_v7 = vadd.f32 %v767_v61, %v701_v17  ;;  %v800_v42 = vadd.f32 %v768_v48, %v702_v5 }
  0x88   : > { %v1298_v31 = vadd.f32 %v1266_v44, %v1200_v14  ;;  %v1061_v24 = vmul.f32 %v3687_v29, %v4093_v6  ;;  %v1299_v37 = vadd.f32 %v1267_v59, %v1201_v25  ;;  %v1062_v15 = vmul.f32 %v3687_v29, %v4099_v27  ;;  %v4220_v59 = vld [vmem:[%s5730_s1] ss:$0 sm:$0xff] }
  0x89   : > { %3300 = vmatmul.msk.bf16.gmra.mxu0 %vm524_vm4, %v1412_v16  ;;  %v4207_v63 = vld [vmem:[#allocation2 + $0xc0] sm:$0xff]  ;;  %v515_v55 = vmax.f32 %v483_v23, 0.0  ;;  %v516_v60 = vmax.f32 %v484_v57, 0.0  ;;  %v897_v26 = vadd.f32 %v865_v62, %v799_v7  ;;  %v898_v28 = vadd.f32 %v866_v33, %v800_v42 }
  0x8a   : > { %v4209_v41 = vld [vmem:[#allocation2 + $0xc1] sm:$0xff]  ;;  %v1396_v54 = vadd.f32 %v1364_v3, %v1298_v31  ;;  %v4213_v44 = vld [vmem:[#allocation2 + $0xc9] sm:$0xff]  ;;  %v613_v29 = vmul.f32 %v4220_v59, %v4047_v51  ;;  %v1397_v43 = vadd.f32 %v1365_v4, %v1299_v37  ;;  %v1160_v3 = vmul.f32 %v3697_v32, %v4207_v63 }
  0x8b   : > { %v4211_v16 = vld [vmem:[#allocation2 + $0xc8] sm:$0xff]  ;;  %v1258_v61 = vmul.f32 %v3714_v45, %v4209_v41  ;;  %549 = vst.msk [vmem:[#allocation2 + $0x139] sm:$0xff] %vm524_vm4, %v515_v55  ;;  %v995_v48 = vadd.f32 %v963_v35, %v897_v26  ;;  %v996_v62 = vadd.f32 %v964_v12, %v898_v28  ;;  %v1259_v14 = vmul.f32 %v3714_v45, %v4213_v44  ;;  %v4243_v33 = vld [vmem:[%s5730_s1 + $0x1] ss:$0 sm:$0xff]  ;;  %v4252_v35 = vld [vmem:[%s5730_s1 + $0x2] ss:$0 sm:$0xff] }
  0x8c   : > { %v4215_v38 = vld [vmem:[#allocation2 + $0xc2] sm:$0xff]  ;;  %v1161_v58 = vmul.f32 %v3697_v32, %v4211_v16  ;;  %550 = vst.msk [vmem:[#allocation2 + $0x141] sm:$0xff] %vm524_vm4, %v516_v60  ;;  %v1418_v17 = vpack.c.bf16 %v1397_v43, %v1396_v54  ;;  %v4236_v5 = vld [vmem:[#allocation2 + $0xca] sm:$0xff]  ;;  %v614_v32 = vmul.f32 %v4220_v59, %v4057_v34  ;;  %v679_v23 = vmul.f32 %v4243_v33, %v4049_v52 }
  0x8d   : > { %v1356_v51 = vmul.f32 %v3726_v50, %v4215_v38  ;;  %v680_v57 = vmul.f32 %v4243_v33, %v4059_v36  ;;  %v1093_v25 = vadd.f32 %v1061_v24, %v995_v48  ;;  %v1094_v4 = vadd.f32 %v1062_v15, %v996_v62  ;;  %v4261_v52 = vld [vmem:[%s5730_s1 + $0x3] ss:$0 sm:$0xff]  ;;  %v4282_v26 = vld [vmem:[%s5730_s1 + $0x5] ss:$0 sm:$0xff] }
  0x8e   : > { %v777_v34 = vmul.f32 %v4252_v35, %v4061_v9  ;;  %v778_v12 = vmul.f32 %v4252_v35, %v4069_v56  ;;  %v711_v31 = vadd.f32 %v679_v23, %v613_v29  ;;  %v875_v36 = vmul.f32 %v4261_v52, %v4154_v8  ;;  %v4272_v56 = vld [vmem:[%s5730_s1 + $0x4] ss:$0 sm:$0xff] }
  0x8f   : > { %v712_v7 = vadd.f32 %v680_v57, %v614_v32  ;;  %v876_v42 = vmul.f32 %v4261_v52, %v4158_v39  ;;  %v1192_v24 = vadd.f32 %v1160_v3, %v1093_v25  ;;  %v1193_v37 = vadd.f32 %v1161_v58, %v1094_v4  ;;  %v4299_v57 = vld [vmem:[%s5730_s1 + $0x6] ss:$0 sm:$0xff] }
  0x90   : > { %v1357_v9 = vmul.f32 %v3726_v50, %v4236_v5  ;;  %v973_v15 = vmul.f32 %v4272_v56, %v4156_v22  ;;  %v809_v55 = vadd.f32 %v777_v34, %v711_v31  ;;  %v974_v54 = vmul.f32 %v4272_v56, %v4162_v1 }
  0x91   : > { %3306 = vmatmul.msk.bf16.gmra.mxu3 %vm524_vm4, %v1418_v17  ;;  %v810_v60 = vadd.f32 %v778_v12, %v712_v7  ;;  %v1071_v28 = vmul.f32 %v4282_v26, %v4164_v2  ;;  %v1290_v29 = vadd.f32 %v1258_v61, %v1192_v24  ;;  %v1291_v43 = vadd.f32 %v1259_v14, %v1193_v37 }
  0x92   : > { %v1072_v3 = vmul.f32 %v4282_v26, %v4178_v0  ;;  %v4288_v58 = vld [vmem:[#allocation2 + $0x138] sm:$0xff]  ;;  %v605_v62 = vmul.f32 %v4220_v59, %v5743_v13  ;;  %v907_v17 = vadd.f32 %v875_v36, %v809_v55  ;;  %v606_v4 = vmul.f32 %v4220_v59, %v4081_v18 }
  0x93   : > { %v4290_v48 = vld [vmem:[#allocation2 + $0x139] sm:$0xff]  ;;  %v908_v32 = vadd.f32 %v876_v42, %v810_v60  ;;  %v1170_v61 = vmul.f32 %v4299_v57, %v4288_v58  ;;  %v4303_v14 = vld [vmem:[#allocation2 + $0x141] sm:$0xff]  ;;  %v4309_v13 = vadd.f32 %v1356_v51, %v1290_v29  ;;  %v4311_v34 = vadd.f32 %v1357_v9, %v1291_v43 }
  0x94   : > { %v4294_v23 = vld [vmem:[#allocation2 + $0x140] sm:$0xff]  ;;  %v1268_v31 = vmul.f32 %v3714_v45, %v4290_v48  ;;  %v1005_v36 = vadd.f32 %v973_v15, %v907_v17  ;;  %v1269_v24 = vmul.f32 %v3714_v45, %v4303_v14  ;;  %v671_v37 = vmul.f32 %v4243_v33, %v5744_v46 }
  0x95   : > { %v4305_v25 = vld [vmem:[#allocation2 + $0x13a] sm:$0xff]  ;;  %v1171_v12 = vmul.f32 %v4299_v57, %v4294_v23  ;;  %v4317_v7 = vld [vmem:[#allocation2 + $0x142] sm:$0xff]  ;;  %v1006_v42 = vadd.f32 %v974_v54, %v908_v32  ;;  %v672_v9 = vmul.f32 %v4243_v33, %v5745_v30  ;;  %v769_v55 = vmul.f32 %v4252_v35, %v4093_v6 }
  0x96   : > { %v1366_v18 = vmul.f32 %v3726_v50, %v4305_v25  ;;  %v1367_v51 = vmul.f32 %v3726_v50, %v4317_v7  ;;  %v1103_v60 = vadd.f32 %v1071_v28, %v1005_v36  ;;  %v770_v54 = vmul.f32 %v4252_v35, %v4099_v27 }
  0x97   : > { %v1104_v45 = vadd.f32 %v1072_v3, %v1006_v42  ;;  %v703_v50 = vadd.f32 %v671_v37, %v605_v62  ;;  %v704_v46 = vadd.f32 %v672_v9, %v606_v4  ;;  %v867_v6 = vmul.f32 %v4261_v52, %v4207_v63  ;;  %v485_v62 = vld [vmem:[%s3639_s29 + $0xd0] sm:$0xff]  ;;  %v486_v42 = vld [vmem:[%s3639_s29 + $0xd8] sm:$0xff] }
  0x98   : > { %v868_v30 = vmul.f32 %v4261_v52, %v4211_v16  ;;  %v1202_v28 = vadd.f32 %v1170_v61, %v1103_v60  ;;  %v965_v43 = vmul.f32 %v4272_v56, %v4209_v41  ;;  %v966_v27 = vmul.f32 %v4272_v56, %v4213_v44  ;;  %v5746_v4 = vld [vmem:[#allocation6_spill] sm:$0xff]  ;;  %v5748_v60 = vld [vmem:[#allocation7_spill] sm:$0xff] }
  0x99   : > { %3301 = vmatmul.msk.bf16.gmra.mxu0 %vm524_vm4, %v1413_v49  ;;  %v1203_v29 = vadd.f32 %v1171_v12, %v1104_v45  ;;  %v801_v40 = vadd.f32 %v769_v55, %v703_v50  ;;  %v802_v53 = vadd.f32 %v770_v54, %v704_v46  ;;  %v1063_v49 = vmul.f32 %v4282_v26, %v4215_v38  ;;  %v5747_v12 = vld [vmem:[#allocation8_spill] sm:$0xff]  ;;  %v5749_v54 = vld [vmem:[#allocation9_spill] sm:$0xff] }
  0x9a   : > { %v1064_v3 = vmul.f32 %v4282_v26, %v4236_v5  ;;  %v1300_v17 = vadd.f32 %v1268_v31, %v1202_v28  ;;  %v1162_v61 = vmul.f32 %v4299_v57, %v5746_v4  ;;  %v1163_v36 = vmul.f32 %v4299_v57, %v5747_v12  ;;  %v4360_v55 = vld [vmem:[%s5730_s1 + $0x7] ss:$0 sm:$0xff]  ;;  %v4369_v46 = vld [vmem:[%s5730_s1 + $0x8] ss:$0 sm:$0xff] }
  0x9b   : > { %v1301_v32 = vadd.f32 %v1269_v24, %v1203_v29  ;;  %v899_v37 = vadd.f32 %v867_v6, %v801_v40  ;;  %v900_v9 = vadd.f32 %v868_v30, %v802_v53  ;;  %v1260_v45 = vmul.f32 %v4360_v55, %v5748_v60  ;;  %v5750_v6 = vld [vmem:[#allocation10_spill] sm:$0xff] }
  0x9c   : > { %v1261_v31 = vmul.f32 %v4360_v55, %v5749_v54  ;;  %v1398_v24 = vadd.f32 %v1366_v18, %v1300_v17  ;;  %v1358_v30 = vmul.f32 %v4369_v46, %v5750_v6  ;;  %v517_v28 = vmax.f32 %v485_v62, 0.0 }
  0x9d   : > { %v1399_v50 = vadd.f32 %v1367_v51, %v1301_v32  ;;  %v997_v29 = vadd.f32 %v965_v43, %v899_v37  ;;  %v998_v40 = vadd.f32 %v966_v27, %v900_v9  ;;  %v518_v53 = vmax.f32 %v486_v42, 0.0  ;;  %v5751_v42 = vld [vmem:[#allocation11_spill] sm:$0xff] }
  0x9e   : > { %v615_v15 = vmul.f32 %v4220_v59, %v4154_v8  ;;  %551 = vst.msk [vmem:[#allocation2 + $0x151] sm:$0xff] %vm524_vm4, %v517_v28  ;;  %v616_v18 = vmul.f32 %v4220_v59, %v4158_v39  ;;  %v681_v51 = vmul.f32 %v4243_v33, %v4156_v22  ;;  %v682_v17 = vmul.f32 %v4243_v33, %v4162_v1 }
  0x9f   : > { %v1419_v47 = vpack.c.bf16 %v1399_v50, %v1398_v24  ;;  %v1095_v32 = vadd.f32 %v1063_v49, %v997_v29  ;;  %v1096_v62 = vadd.f32 %v1064_v3, %v998_v40  ;;  %552 = vst.msk [vmem:[#allocation2 + $0x159] sm:$0xff] %vm524_vm4, %v518_v53  ;;  %v779_v43 = vmul.f32 %v4252_v35, %v4164_v2 }
  0xa0   : > { %v780_v8 = vmul.f32 %v4252_v35, %v4178_v0  ;;  %v713_v27 = vadd.f32 %v681_v51, %v615_v15  ;;  %v714_v39 = vadd.f32 %v682_v17, %v616_v18  ;;  %v877_v22 = vmul.f32 %v4261_v52, %v4288_v58 }
  0xa1   : > { %3307 = vmatmul.msk.bf16.gmra.mxu3 %vm524_vm4, %v1419_v47  ;;  %v878_v1 = vmul.f32 %v4261_v52, %v4294_v23  ;;  %v1194_v49 = vadd.f32 %v1162_v61, %v1095_v32  ;;  %v1195_v3 = vadd.f32 %v1163_v36, %v1096_v62  ;;  %v1359_v37 = vmul.f32 %v4369_v46, %v5751_v42 }
  0xa2   : > { %v975_v2 = vmul.f32 %v4272_v56, %v4290_v48  ;;  %v811_v9 = vadd.f32 %v779_v43, %v713_v27  ;;  %v812_v0 = vadd.f32 %v780_v8, %v714_v39  ;;  %v976_v47 = vmul.f32 %v4272_v56, %v4303_v14 }
  0xa3   : > { %v1073_v15 = vmul.f32 %v4282_v26, %v4305_v25  ;;  %v1292_v24 = vadd.f32 %v1260_v45, %v1194_v49  ;;  %v1293_v50 = vadd.f32 %v1261_v31, %v1195_v3  ;;  %v1074_v61 = vmul.f32 %v4282_v26, %v4317_v7 }
  0xa4   : > { %v607_v36 = vmul.f32 %v4220_v59, %v4207_v63  ;;  %v909_v28 = vadd.f32 %v877_v22, %v811_v9  ;;  %v910_v29 = vadd.f32 %v878_v1, %v812_v0  ;;  %v608_v40 = vmul.f32 %v4220_v59, %v4211_v16 }
  0xa5   : > { %v673_v53 = vmul.f32 %v4243_v33, %v4209_v41  ;;  %v4408_v18 = vadd.f32 %v1358_v30, %v1292_v24  ;;  %v4410_v51 = vadd.f32 %v1359_v37, %v1293_v50  ;;  %v4412_v45 = vld [vmem:[#allocation2 + $0x150] sm:$0xff]  ;;  %v674_v17 = vmul.f32 %v4243_v33, %v4213_v44 }
  0xa6   : > { %v4414_v31 = vld [vmem:[#allocation2 + $0x151] sm:$0xff]  ;;  %v771_v63 = vmul.f32 %v4252_v35, %v4215_v38  ;;  %v1007_v32 = vadd.f32 %v975_v2, %v909_v28  ;;  %v1008_v62 = vadd.f32 %v976_v47, %v910_v29  ;;  %v1172_v41 = vmul.f32 %v4299_v57, %v4412_v45  ;;  %v4424_v30 = vld [vmem:[#allocation2 + $0x159] sm:$0xff] }
  0xa7   : > { %v4420_v16 = vld [vmem:[#allocation2 + $0x158] sm:$0xff]  ;;  %v772_v8 = vmul.f32 %v4252_v35, %v4236_v5  ;;  %v5752_v44 = vpack.c.bf16 %v4311_v34, %v4309_v13  ;;  %v1415_v38 = vpack.c.bf16 %v4410_v51, %v4408_v18  ;;  %v1270_v39 = vmul.f32 %v4360_v55, %v4414_v31 }
  0xa8   : > { %v4426_v43 = vld [vmem:[#allocation2 + $0x152] sm:$0xff]  ;;  %v1173_v27 = vmul.f32 %v4299_v57, %v4420_v16  ;;  %v1271_v22 = vmul.f32 %v4360_v55, %v4424_v30  ;;  %v4442_v1 = vld [vmem:[#allocation2 + $0x15a] sm:$0xff]  ;;  %v1105_v5 = vadd.f32 %v1073_v15, %v1007_v32  ;;  %v1106_v49 = vadd.f32 %v1074_v61, %v1008_v62 }
  0xa9   : > { %3302 = vmatmul.msk.bf16.gmra.mxu0 %vm524_vm4, %v5752_v44  ;;  %v1368_v13 = vmul.f32 %v4369_v46, %v4426_v43  ;;  %v705_v34 = vadd.f32 %v673_v53, %v607_v36  ;;  %v1369_v3 = vmul.f32 %v4369_v46, %v4442_v1  ;;  %v706_v37 = vadd.f32 %v674_v17, %v608_v40  ;;  %v487_v53 = vld [vmem:[%s3639_s29 + $0xe0] sm:$0xff]  ;;  %v488_v17 = vld [vmem:[%s3639_s29 + $0xe8] sm:$0xff] }
  0xaa   : > { %v869_v2 = vmul.f32 %v4261_v52, %v5746_v4  ;;  %v870_v9 = vmul.f32 %v4261_v52, %v5747_v12  ;;  %v1204_v0 = vadd.f32 %v1172_v41, %v1105_v5  ;;  %v1205_v47 = vadd.f32 %v1173_v27, %v1106_v49 }
  0xab   : > { %v803_v15 = vadd.f32 %v771_v63, %v705_v34  ;;  %v967_v24 = vmul.f32 %v4272_v56, %v5748_v60  ;;  %v804_v50 = vadd.f32 %v772_v8, %v706_v37  ;;  %v968_v61 = vmul.f32 %v4272_v56, %v5749_v54  ;;  %v490_v34 = vld [vmem:[%s3639_s29 + $0xf8] sm:$0xff] }
  0xac   : > { %v1065_v36 = vmul.f32 %v4282_v26, %v5750_v6  ;;  %v1066_v28 = vmul.f32 %v4282_v26, %v5751_v42  ;;  %v1302_v4 = vadd.f32 %v1270_v39, %v1204_v0  ;;  %v1303_v29 = vadd.f32 %v1271_v22, %v1205_v47 }
  0xad   : > { %v901_v40 = vadd.f32 %v869_v2, %v803_v15  ;;  %v1164_v12 = vmul.f32 %v4299_v57, %v4023_v10  ;;  %v902_v60 = vadd.f32 %v870_v9, %v804_v50  ;;  %v1165_v63 = vmul.f32 %v4299_v57, %v4033_v19  ;;  %v489_v19 = vld [vmem:[%s3639_s29 + $0xf0] sm:$0xff]  ;;  %v5753_v2 = vld [vmem:[#allocation12_spill] sm:$0xff] }
  0xae   : > { %v1262_v54 = vmul.f32 %v4360_v55, %v4025_v11  ;;  %v1263_v6 = vmul.f32 %v4360_v55, %v4035_v20  ;;  %v1400_v42 = vadd.f32 %v1368_v13, %v1302_v4  ;;  %v1401_v32 = vadd.f32 %v1369_v3, %v1303_v29  ;;  %v4510_v4 = vld [vmem:[%s5682_s4] ss:$0 sm:$0xff] }
  0xaf   : > { %v999_v62 = vadd.f32 %v967_v24, %v901_v40  ;;  %v1360_v41 = vmul.f32 %v4369_v46, %v4037_v21  ;;  %v1000_v8 = vadd.f32 %v968_v61, %v902_v60  ;;  %v519_v10 = vmax.f32 %v487_v53, 0.0 }
  0xb0   : > { %v520_v44 = vmax.f32 %v488_v17, 0.0  ;;  %v617_v27 = vmul.f32 %v4220_v59, %v4288_v58  ;;  %v1420_v39 = vpack.c.bf16 %v1401_v32, %v1400_v42  ;;  %v618_v11 = vmul.f32 %v4220_v59, %v4294_v23 }
  0xb1   : > { %v1097_v22 = vadd.f32 %v1065_v36, %v999_v62  ;;  %v683_v20 = vmul.f32 %v4243_v33, %v4290_v48  ;;  %v1098_v5 = vadd.f32 %v1066_v28, %v1000_v8  ;;  %553 = vst.msk [vmem:[#allocation2 + $0x169] sm:$0xff] %vm524_vm4, %v519_v10  ;;  %v684_v21 = vmul.f32 %v4243_v33, %v4303_v14 }
  0xb2   : > { %v781_v49 = vmul.f32 %v4252_v35, %v4305_v25  ;;  %v782_v58 = vmul.f32 %v4252_v35, %v4317_v7  ;;  %3308 = vmatmul.msk.bf16.gmra.mxu3 %vm524_vm4, %v1420_v39  ;;  %554 = vst.msk [vmem:[#allocation2 + $0x171] sm:$0xff] %vm524_vm4, %v520_v44  ;;  %v879_v48 = vmul.f32 %v4261_v52, %v4412_v45  ;;  %v521_v3 = vmax.f32 %v489_v19, 0.0  ;;  %v4498_v7 = vld [vmem:[%s5681_s3] ss:$0 sm:$0xff] }
  0xb3   : > { %v1196_v13 = vadd.f32 %v1164_v12, %v1097_v22  ;;  %v715_v23 = vadd.f32 %v683_v20, %v617_v27  ;;  %v1197_v37 = vadd.f32 %v1165_v63, %v1098_v5  ;;  %v1361_v14 = vmul.f32 %v4369_v46, %v5753_v2 }
  0xb4   : > { %v716_v9 = vadd.f32 %v684_v21, %v618_v11  ;;  %v880_v25 = vmul.f32 %v4261_v52, %v4420_v16  ;;  %v977_v15 = vmul.f32 %v4272_v56, %v4414_v31  ;;  %v978_v24 = vmul.f32 %v4272_v56, %v4424_v30  ;;  %555 = vst.msk [vmem:[#allocation2 + $0x181] sm:$0xff] %vm524_vm4, %v521_v3 }
  0xb5   : > { %v1294_v0 = vadd.f32 %v1262_v54, %v1196_v13  ;;  %v813_v47 = vadd.f32 %v781_v49, %v715_v23  ;;  %v1295_v50 = vadd.f32 %v1263_v6, %v1197_v37  ;;  %v1075_v36 = vmul.f32 %v4282_v26, %v4426_v43 }
  0xb6   : > { %v814_v61 = vadd.f32 %v782_v58, %v716_v9  ;;  %v522_v28 = vmax.f32 %v490_v34, 0.0  ;;  %v1076_v12 = vmul.f32 %v4282_v26, %v4442_v1  ;;  %v619_v53 = vmul.f32 %v4220_v59, %v4412_v45 }
  0xb7   : > { %v4512_v29 = vadd.f32 %v1360_v41, %v1294_v0  ;;  %v911_v40 = vadd.f32 %v879_v48, %v813_v47  ;;  %v620_v63 = vmul.f32 %v4220_v59, %v4420_v16  ;;  %v685_v54 = vmul.f32 %v4243_v33, %v4414_v31 }
  0xb8   : > { %v912_v60 = vadd.f32 %v880_v25, %v814_v61  ;;  %556 = vst.msk [vmem:[#allocation2 + $0x189] sm:$0xff] %vm524_vm4, %v522_v28  ;;  %v4528_v42 = vadd.f32 %v1361_v14, %v1295_v50  ;;  %v1140_v32 = vld [vmem:[#allocation2 + $0x168] sm:$0xff]  ;;  %v686_v18 = vmul.f32 %v4243_v33, %v4424_v30  ;;  %v783_v31 = vmul.f32 %v4252_v35, %v4426_v43 }
  0xb9   : > { %3303 = vmatmul.msk.bf16.gmra.mxu0 %vm524_vm4, %v1415_v38  ;;  %v1009_v45 = vadd.f32 %v977_v15, %v911_v40  ;;  %v1238_v62 = vld [vmem:[#allocation2 + $0x169] sm:$0xff]  ;;  %v1174_v41 = vmul.f32 %v4299_v57, %v1140_v32  ;;  %v1239_v8 = vld [vmem:[#allocation2 + $0x171] sm:$0xff]  ;;  %v717_v5 = vadd.f32 %v685_v54, %v619_v53  ;;  %v784_v43 = vmul.f32 %v4252_v35, %v4442_v1 }
  0xba   : > { %v1486_v17 = vpop.f32.mrf.mxu0  ;;  %v1010_v51 = vadd.f32 %v978_v24, %v912_v60  ;;  %v1141_v38 = vld [vmem:[#allocation2 + $0x170] sm:$0xff]  ;;  %v1272_v16 = vmul.f32 %v4360_v55, %v1238_v62  ;;  %v1273_v39 = vmul.f32 %v4360_v55, %v1239_v8  ;;  %v718_v58 = vadd.f32 %v686_v18, %v620_v63 }
  0xbb   : > { %v1570_v6 = vmul.f32 %v4498_v7, %v1486_v17  ;;  %v1336_v10 = vld [vmem:[#allocation2 + $0x16a] sm:$0xff]  ;;  %v1107_v27 = vadd.f32 %v1075_v36, %v1009_v45  ;;  %v1175_v19 = vmul.f32 %v4299_v57, %v1141_v38  ;;  %v1337_v22 = vld [vmem:[#allocation2 + $0x172] sm:$0xff]  ;;  %v815_v23 = vadd.f32 %v783_v31, %v717_v5  ;;  %v1142_v9 = vld [vmem:[#allocation2 + $0x180] sm:$0xff] }
  0xbc   : > { %v1108_v30 = vadd.f32 %v1076_v12, %v1010_v51  ;;  %v1370_v11 = vmul.f32 %v4369_v46, %v1336_v10  ;;  %v1371_v20 = vmul.f32 %v4369_v46, %v1337_v22  ;;  %v881_v48 = vmul.f32 %v4261_v52, %v1140_v32  ;;  %v1240_v24 = vld [vmem:[#allocation2 + $0x181] sm:$0xff] }
  0xbd   : > { %v1606_v44 = vadd.f32 %v4510_v4, %v1570_v6  ;;  %v1206_v49 = vadd.f32 %v1174_v41, %v1107_v27  ;;  %v882_v34 = vmul.f32 %v4261_v52, %v1141_v38  ;;  %v816_v37 = vadd.f32 %v784_v43, %v718_v58 }
  0xbe   : > { %v1207_v13 = vadd.f32 %v1175_v19, %v1108_v30  ;;  %v979_v2 = vmul.f32 %v4272_v56, %v1238_v62  ;;  %v980_v14 = vmul.f32 %v4272_v56, %v1239_v8  ;;  %v913_v47 = vadd.f32 %v881_v48, %v815_v23 }
  0xbf   : > { %v1638_v21 = vmax.f32 %v1606_v44, 0.0  ;;  %v1304_v3 = vadd.f32 %v1272_v16, %v1206_v49  ;;  %v1077_v1 = vmul.f32 %v4282_v26, %v1336_v10  ;;  %v1143_v15 = vld [vmem:[#allocation2 + $0x188] sm:$0xff]  ;;  %v914_v36 = vadd.f32 %v882_v34, %v816_v37 }
  0xc0   : > { %v1305_v0 = vadd.f32 %v1273_v39, %v1207_v13  ;;  %v1078_v28 = vmul.f32 %v4282_v26, %v1337_v22  ;;  %v1241_v40 = vld [vmem:[#allocation2 + $0x189] sm:$0xff]  ;;  %v1416_v12 = vpack.c.bf16 %v4528_v42, %v4512_v29  ;;  %v1011_v17 = vadd.f32 %v979_v2, %v913_v47  ;;  %v1144_v2 = vld [vmem:[#allocation2 + $0x198] sm:$0xff] }
  0xc1   : > { %1670 = vst.msk [vmem:[#allocation2 + $0x19] sm:$0xff] %vm413_vm1, %v1638_v21  ;;  %v1402_v61 = vadd.f32 %v1370_v11, %v1304_v3  ;;  %v1176_v60 = vmul.f32 %v4299_v57, %v1142_v9  ;;  %v1012_v54 = vadd.f32 %v980_v14, %v914_v36  ;;  %v1177_v6 = vmul.f32 %v4299_v57, %v1143_v15  ;;  %v1338_v19 = vld [vmem:[#allocation2 + $0x182] sm:$0xff]  ;;  %v1339_v39 = vld [vmem:[#allocation2 + $0x18a] sm:$0xff] }
  0xc2   : > { %v1488_v25 = vpop.f32.mrf.mxu0  ;;  %v1403_v53 = vadd.f32 %v1371_v20, %v1305_v0  ;;  %v1274_v45 = vmul.f32 %v4360_v55, %v1240_v24  ;;  %v1109_v51 = vadd.f32 %v1077_v1, %v1011_v17  ;;  %v1275_v41 = vmul.f32 %v4360_v55, %v1241_v40  ;;  %v1145_v14 = vld [vmem:[#allocation2 + $0x1a0] sm:$0xff] }
  0xc3   : > { %v1571_v50 = vmul.f32 %v4498_v7, %v1488_v25  ;;  %v621_v16 = vmul.f32 %v4220_v59, %v1140_v32  ;;  %v1110_v44 = vadd.f32 %v1078_v28, %v1012_v54  ;;  %v622_v29 = vmul.f32 %v4220_v59, %v1141_v38  ;;  %v1702_v36 = vld [vmem:[#allocation2] sm:$0xff] }
  0xc4   : > { %v1421_v18 = vpack.c.bf16 %v1403_v53, %v1402_v61  ;;  %v687_v42 = vmul.f32 %v4243_v33, %v1238_v62  ;;  %v1208_v27 = vadd.f32 %v1176_v60, %v1109_v51  ;;  %v688_v30 = vmul.f32 %v4243_v33, %v1239_v8  ;;  %v4588_v61 = vld [vmem:[%s5683_s5 + $0x1] ss:$0 sm:$0xff]  ;;  %v1769_v53 = vld [vmem:[#allocation2 + $0x9] sm:$0xff] }
  0xc5   : > { %v1607_v63 = vadd.f32 %v4510_v4, %v1571_v50  ;;  %v785_v11 = vmul.f32 %v4252_v35, %v1336_v10  ;;  %v786_v20 = vmul.f32 %v4252_v35, %v1337_v22  ;;  %v1209_v32 = vadd.f32 %v1177_v6, %v1110_v44  ;;  %v4583_v50 = vld [vmem:[%s5683_s5] ss:$0 sm:$0xff]  ;;  %v1768_v28 = vld [vmem:[#allocation2 + $0x1] sm:$0xff] }
  0xc6   : > { %3309 = vmatmul.msk.bf16.gmra.mxu3 %vm524_vm4, %v1421_v18  ;;  %v719_v5 = vadd.f32 %v687_v42, %v621_v16  ;;  %v883_v21 = vmul.f32 %v4261_v52, %v1142_v9  ;;  %v720_v59 = vadd.f32 %v688_v30, %v622_v29  ;;  %v884_v62 = vmul.f32 %v4261_v52, %v1143_v15  ;;  %v2568_v9 = vld [vmem:[%s5684_s6] sm:$0xf]  ;;  %v1867_v42 = vld [vmem:[#allocation2 + $0xa] sm:$0xff] }
  0xc7   : > { %v1639_v31 = vmax.f32 %v1607_v63, 0.0  ;;  %v1306_v38 = vadd.f32 %v1274_v45, %v1208_v27  ;;  %v1372_v49 = vmul.f32 %v4369_v46, %v1338_v19  ;;  %v1373_v33 = vmul.f32 %v4369_v46, %v1339_v39  ;;  %v1340_v6 = vld [vmem:[#allocation2 + $0x19a] sm:$0xff]  ;;  %v1341_v45 = vld [vmem:[#allocation2 + $0x1a2] sm:$0xff] }
  0xc8   : > { %v817_v8 = vadd.f32 %v785_v11, %v719_v5  ;;  %v1307_v10 = vadd.f32 %v1275_v41, %v1209_v32  ;;  %v818_v58 = vadd.f32 %v786_v20, %v720_v59  ;;  %v981_v35 = vmul.f32 %v4272_v56, %v1240_v24  ;;  %v1243_v24 = vld [vmem:[#allocation2 + $0x1a1] sm:$0xff]  ;;  %v1964_v59 = vld [vmem:[#allocation2 + $0x18] sm:$0xff] }
  0xc9   : > { %1671 = vst.msk [vmem:[#allocation2 + $0x21] sm:$0xff] %vm413_vm1, %v1639_v31  ;;  %3304 = vmatmul.msk.bf16.gmra.mxu0 %vm524_vm4, %v1416_v12  ;;  %v982_v22 = vmul.f32 %v4272_v56, %v1241_v40  ;;  %v1079_v23 = vmul.f32 %v4282_v26, %v1338_v19  ;;  %v1080_v48 = vmul.f32 %v4282_v26, %v1339_v39  ;;  %v2619_v47 = vsel %vm2617_vm5, %v2568_v9, 0  ;;  %v1242_v26 = vld [vmem:[#allocation2 + $0x199] sm:$0xff]  ;;  %v1703_v12 = vld [vmem:[#allocation2 + $0x8] sm:$0xff]  ;;  %v4599_v41 = vld [vmem:[%s5683_s5 + $0x2] ss:$0 sm:$0xff] }
  0xca   : > { %v915_v43 = vadd.f32 %v883_v21, %v817_v8  ;;  %v916_v13 = vadd.f32 %v884_v62, %v818_v58  ;;  %v1404_v34 = vadd.f32 %v1372_v49, %v1306_v38  ;;  %v1405_v52 = vadd.f32 %v1373_v33, %v1307_v10  ;;  %2628 = vmatpush.bf16.msra.mxu1 %v2619_v47  ;;  %v1866_v29 = vld [vmem:[#allocation2 + $0x2] sm:$0xff] }
  0xcb   : > { %v1178_v25 = vmul.f32 %v4299_v57, %v1144_v2  ;;  %v1179_v56 = vmul.f32 %v4299_v57, %v1145_v14  ;;  %3348 = vmatpush.bf16.msrb.mxu3 %v2619_v47  ;;  %v1276_v40 = vmul.f32 %v4360_v55, %v1242_v26  ;;  %3347 = vmatpush.bf16.msra.mxu2 %v2619_v47  ;;  %v4610_v32 = vld [vmem:[%s5683_s5 + $0x3] ss:$0 sm:$0xff]  ;;  %v5712_v49 = vmov -inf   ;;  %v4643_v9 = vld [vmem:[%s5683_s5 + $0x6] ss:$0 sm:$0xff] }
  0xcc   : > { %v1013_v3 = vadd.f32 %v981_v35, %v915_v43  ;;  %v1014_v37 = vadd.f32 %v982_v22, %v916_v13  ;;  %v1422_v0 = vpack.c.bf16 %v1405_v52, %v1404_v34  ;;  %v1277_v54 = vmul.f32 %v4360_v55, %v1243_v24  ;;  %2782 = vst.msk [vmem:[#allocation2] sm:$0xff] %vm413_vm1, %v5712_v49  ;;  %v4629_v13 = vld [vmem:[%s5683_s5 + $0x4] ss:$0 sm:$0xff]  ;;  %v2062_v52 = vld [vmem:[#allocation2 + $0x19] sm:$0xff] }
  0xcd   : > { %v1736_v18 = vmul.f32 %v4583_v50, %v1702_v36  ;;  %v1802_v51 = vmul.f32 %v4588_v61, %v1768_v28  ;;  %v1737_v31 = vmul.f32 %v4583_v50, %v1703_v12  ;;  %v1803_v44 = vmul.f32 %v4588_v61, %v1769_v53  ;;  %2784 = vst.msk [vmem:[#allocation2 + $0x10] sm:$0x3] %vm416_vm2, %v5712_v49  ;;  %v4663_v12 = vld [vmem:[%s5683_s5 + $0x7] ss:$0 sm:$0xff] }
  0xce   : > { %v1111_v1 = vadd.f32 %v1079_v23, %v1013_v3  ;;  %v1112_v15 = vadd.f32 %v1080_v48, %v1014_v37  ;;  %v1374_v55 = vmul.f32 %v4369_v46, %v1340_v6  ;;  %v1375_v30 = vmul.f32 %v4369_v46, %v1341_v45  ;;  %2788 = vst.msk [vmem:[#allocation2] sm:$0x1] %vm422_vm3, %v5712_v49  ;;  %v4634_v23 = vld [vmem:[%s5683_s5 + $0x5] ss:$0 sm:$0xff]  ;;  %v4671_v6 = vld [vmem:[%s5683_s5 + $0x8] ss:$0 sm:$0xff] }
  0xcf   : > { %v1834_v11 = vadd.f32 %v1802_v51, %v1736_v18  ;;  %v1900_v20 = vmul.f32 %v4599_v41, %v1866_v29  ;;  %v1835_v5 = vadd.f32 %v1803_v44, %v1737_v31  ;;  %v1901_v21 = vmul.f32 %v4599_v41, %v1867_v42  ;;  %2806 = vst.msk [vmem:[#allocation2 + $0x11] sm:$0x1] %vm422_vm3, %v5712_v49 }
  0xd0   : > { %v1210_v60 = vadd.f32 %v1178_v25, %v1111_v1  ;;  %v1211_v63 = vadd.f32 %v1179_v56, %v1112_v15  ;;  %v1965_v38 = vld [vmem:[#allocation2 + $0x20] sm:$0xff]  ;;  %v1998_v58 = vmul.f32 %v4610_v32, %v1964_v59  ;;  %2783 = vst.msk [vmem:[#allocation2 + $0x8] sm:$0xff] %vm413_vm1, %v5712_v49  ;;  %v2096_v47 = vmul.f32 %v4629_v13, %v2062_v52 }
  0xd1   : > { %v1932_v10 = vadd.f32 %v1900_v20, %v1834_v11  ;;  %v1933_v22 = vadd.f32 %v1901_v21, %v1835_v5  ;;  %v1999_v43 = vmul.f32 %v4610_v32, %v1965_v38  ;;  %v2160_v3 = vld [vmem:[#allocation2 + $0x1a] sm:$0xff]  ;;  %v2161_v37 = vld [vmem:[#allocation2 + $0x22] sm:$0xff]  ;;  %2789 = vst.msk [vmem:[#allocation2 + $0x18] sm:$0x1] %vm422_vm3, %v5712_v49  ;;  %v1739_v53 = vmul.f32 %v4583_v50, %v1965_v38 }
  0xd2   : > { %v1308_v19 = vadd.f32 %v1276_v40, %v1210_v60  ;;  %v1309_v39 = vadd.f32 %v1277_v54, %v1211_v63  ;;  %v2063_v14 = vld [vmem:[#allocation2 + $0x21] sm:$0xff]  ;;  %2807 = vst.msk [vmem:[#allocation2 + $0x29] sm:$0x1] %vm422_vm3, %v5712_v49  ;;  %v2194_v1 = vmul.f32 %v4634_v23, %v2160_v3  ;;  %v2195_v63 = vmul.f32 %v4634_v23, %v2161_v37 }
  0xd3   : > { %v2030_v2 = vadd.f32 %v1998_v58, %v1932_v10  ;;  %v2031_v25 = vadd.f32 %v1999_v43, %v1933_v22  ;;  %v2097_v26 = vmul.f32 %v4629_v13, %v2063_v14  ;;  %v1738_v31 = vmul.f32 %v4583_v50, %v1964_v59 }
  0xd4   : > { %v1406_v33 = vadd.f32 %v1374_v55, %v1308_v19  ;;  %v1407_v8 = vadd.f32 %v1375_v30, %v1309_v39  ;;  %v1804_v44 = vmul.f32 %v4588_v61, %v2062_v52  ;;  %v1902_v30 = vmul.f32 %v4599_v41, %v2160_v3 }
  0xd5   : > { %v1491_v57 = vpop.f32.mrf.mxu0  ;;  %v2128_v24 = vadd.f32 %v2096_v47, %v2030_v2  ;;  %v1903_v38 = vmul.f32 %v4599_v41, %v2161_v37 }
  0xd6   : > { %v1572_v17 = vmul.f32 %v4498_v7, %v1491_v57  ;;  %3310 = vmatmul.msk.bf16.gmra.mxu3 %vm524_vm4, %v1422_v0  ;;  %v1423_v34 = vpack.c.bf16 %v1407_v8, %v1406_v33  ;;  %v2129_v57 = vadd.f32 %v2097_v26, %v2031_v25 }
  0xd7   : > { %v2226_v40 = vadd.f32 %v2194_v1, %v2128_v24 }
  0xd8   : > { %v1608_v16 = vadd.f32 %v4510_v4, %v1572_v17  ;;  %v1805_v17 = vmul.f32 %v4588_v61, %v2063_v14  ;;  %v2227_v29 = vadd.f32 %v2195_v63, %v2129_v57 }
  0xda   : > { %v1640_v27 = vmax.f32 %v1608_v16, 0.0  ;;  %v1837_v39 = vadd.f32 %v1805_v17, %v1739_v53 }
  0xdc   : > { %1672 = vst.msk [vmem:[#allocation2 + $0x31] sm:$0xff] %vm413_vm1, %v1640_v27 }
  0xdd   : > { %v1493_v62 = vpop.f32.mrf.mxu0 }
  0xde   : > { %v1573_v46 = vmul.f32 %v4498_v7, %v1493_v62  ;;  %v1836_v62 = vadd.f32 %v1804_v44, %v1738_v31 }
  0xe0   : > { %v1609_v35 = vadd.f32 %v4510_v4, %v1573_v46 }
  0xe2   : > { %v1641_v48 = vmax.f32 %v1609_v35, 0.0  ;;  %v1934_v35 = vadd.f32 %v1902_v30, %v1836_v62 }
  0xe3   : > { %v4648_v56 = vld [vmem:[#allocation2 + $0x30] sm:$0xff] }
  0xe4   : > { %1673 = vst.msk [vmem:[#allocation2 + $0x39] sm:$0xff] %vm413_vm1, %v1641_v48  ;;  %v2292_v36 = vmul.f32 %v4643_v9, %v4648_v56  ;;  %v2356_v54 = vld [vmem:[#allocation2 + $0x31] sm:$0xff]  ;;  %v2000_v46 = vmul.f32 %v4610_v32, %v4648_v56 }
  0xe5   : > { %v1496_v0 = vpop.f32.mrf.mxu0  ;;  %2790 = vst.msk [vmem:[#allocation2 + $0x30] sm:$0x1] %vm422_vm3, %v5712_v49  ;;  %v2390_v19 = vmul.f32 %v4663_v12, %v2356_v54  ;;  %v2098_v25 = vmul.f32 %v4629_v13, %v2356_v54 }
  0xe6   : > { %v1574_v15 = vmul.f32 %v4498_v7, %v1496_v0  ;;  %3311 = vmatmul.msk.bf16.gmra.mxu3 %vm524_vm4, %v1423_v34  ;;  %v2324_v18 = vadd.f32 %v2292_v36, %v2226_v40  ;;  %v1935_v34 = vadd.f32 %v1903_v38, %v1837_v39  ;;  %v2032_v52 = vadd.f32 %v2000_v46, %v1934_v35 }
  0xe8   : > { %v1610_v28 = vadd.f32 %v4510_v4, %v1574_v15  ;;  %v2422_v59 = vadd.f32 %v2390_v19, %v2324_v18  ;;  %v2130_v15 = vadd.f32 %v2098_v25, %v2032_v52 }
  0xea   : > { %v1642_v60 = vmax.f32 %v1610_v28, 0.0 }
  0xeb   : > { %v2259_v45 = vld [vmem:[#allocation2 + $0x38] sm:$0xff] }
  0xec   : > { %v2357_v51 = vld [vmem:[#allocation2 + $0x39] sm:$0xff]  ;;  %1674 = vst.msk [vmem:[#allocation2 + $0x49] sm:$0xff] %vm413_vm1, %v1642_v60  ;;  %v2293_v55 = vmul.f32 %v4643_v9, %v2259_v45  ;;  %v2001_v58 = vmul.f32 %v4610_v32, %v2259_v45  ;;  %v1741_v57 = vmul.f32 %v4583_v50, %v2259_v45 }
  0xed   : > { %v4673_v16 = vld [vmem:[#allocation2 + $0x32] sm:$0xff]  ;;  %v4679_v42 = vld [vmem:[#allocation2 + $0x3a] sm:$0xff]  ;;  %v1498_v27 = vpop.f32.mrf.mxu0  ;;  %v2391_v5 = vmul.f32 %v4663_v12, %v2357_v51  ;;  %v2099_v1 = vmul.f32 %v4629_v13, %v2357_v51  ;;  %v1807_v40 = vmul.f32 %v4588_v61, %v2357_v51 }
  0xee   : > { %2808 = vst.msk [vmem:[#allocation2 + $0x41] sm:$0x1] %vm422_vm3, %v5712_v49  ;;  %v1575_v11 = vmul.f32 %v4498_v7, %v1498_v27  ;;  %v2325_v20 = vadd.f32 %v2293_v55, %v2227_v29  ;;  %v2488_v21 = vmul.f32 %v4671_v6, %v4673_v16  ;;  %v2489_v10 = vmul.f32 %v4671_v6, %v4679_v42 }
  0xef   : > { %v2033_v37 = vadd.f32 %v2001_v58, %v1935_v34  ;;  %v2196_v0 = vmul.f32 %v4634_v23, %v4673_v16  ;;  %v2197_v17 = vmul.f32 %v4634_v23, %v4679_v42  ;;  %v1740_v29 = vmul.f32 %v4583_v50, %v4648_v56 }
  0xf0   : > { %v1611_v33 = vadd.f32 %v4510_v4, %v1575_v11  ;;  %v2423_v8 = vadd.f32 %v2391_v5, %v2325_v20  ;;  %v2520_v43 = vadd.f32 %v2488_v21, %v2422_v59  ;;  %v1806_v55 = vmul.f32 %v4588_v61, %v2356_v54 }
  0xf1   : > { %v2131_v36 = vadd.f32 %v2099_v1, %v2033_v37  ;;  %v2228_v28 = vadd.f32 %v2196_v0, %v2130_v15  ;;  %v1839_v30 = vadd.f32 %v1807_v40, %v1741_v57  ;;  %v1904_v11 = vmul.f32 %v4599_v41, %v4673_v16 }
  0xf2   : > { %v1643_v22 = vmax.f32 %v1611_v33, 0.0  ;;  %v2521_v48 = vadd.f32 %v2489_v10, %v2423_v8  ;;  %v1838_v59 = vadd.f32 %v1806_v55, %v1740_v29  ;;  %v1905_v62 = vmul.f32 %v4599_v41, %v4679_v42 }
  0xf3   : > { %v4697_v2 = vld [vmem:[#allocation2 + $0x48] sm:$0xff]  ;;  %v2229_v45 = vadd.f32 %v2197_v17, %v2131_v36 }
  0xf4   : > { %1675 = vst.msk [vmem:[#allocation2 + $0x51] sm:$0xff] %vm413_vm1, %v1643_v22  ;;  %v2552_v3 = vpack.c.bf16 %v2521_v48, %v2520_v43  ;;  %v2294_v26 = vmul.f32 %v4643_v9, %v4697_v2  ;;  %v2358_v60 = vld [vmem:[#allocation2 + $0x49] sm:$0xff]  ;;  %v2002_v38 = vmul.f32 %v4610_v32, %v4697_v2  ;;  %v1936_v10 = vadd.f32 %v1904_v11, %v1838_v59 }
  0xf5   : > { %2791 = vst.msk [vmem:[#allocation2 + $0x48] sm:$0x1] %vm422_vm3, %v5712_v49  ;;  %v2392_v39 = vmul.f32 %v4663_v12, %v2358_v60  ;;  %v1937_v43 = vadd.f32 %v1905_v62, %v1839_v30  ;;  %v1742_v57 = vmul.f32 %v4583_v50, %v4697_v2  ;;  %v1808_v40 = vmul.f32 %v4588_v61, %v2358_v60 }
  0xf6   : > { %v1501_v14 = vpop.f32.mrf.mxu0  ;;  %3312 = vmatmul.msk.bf16.vlgmr.msra.gmra.mxu1 %vm413_vm1, %v2552_v3  ;;  %v2326_v18 = vadd.f32 %v2294_v26, %v2228_v28  ;;  %v2034_v48 = vadd.f32 %v2002_v38, %v1936_v10 }
  0xf7   : > { %v1576_v47 = vmul.f32 %v4498_v7, %v1501_v14  ;;  %v2100_v14 = vmul.f32 %v4629_v13, %v2358_v60 }
  0xf8   : > { %v2424_v21 = vadd.f32 %v2392_v39, %v2326_v18 }
  0xf9   : > { %v1612_v24 = vadd.f32 %v4510_v4, %v1576_v47  ;;  %v2132_v15 = vadd.f32 %v2100_v14, %v2034_v48 }
  0xfb   : > { %v1644_v53 = vmax.f32 %v1612_v24, 0.0  ;;  %v2261_v63 = vld [vmem:[#allocation2 + $0x50] sm:$0xff] }
  0xfc   : > { %v2359_v31 = vld [vmem:[#allocation2 + $0x51] sm:$0xff]  ;;  %v2295_v51 = vmul.f32 %v4643_v9, %v2261_v63  ;;  %v2003_v8 = vmul.f32 %v4610_v32, %v2261_v63  ;;  %v1743_v18 = vmul.f32 %v4583_v50, %v2261_v63 }
  0xfd   : > { %v4714_v44 = vld [vmem:[#allocation2 + $0x4a] sm:$0xff]  ;;  %1676 = vst.msk [vmem:[#allocation2 + $0x61] sm:$0xff] %vm413_vm1, %v1644_v53  ;;  %v4721_v27 = vld [vmem:[#allocation2 + $0x52] sm:$0xff]  ;;  %v2393_v20 = vmul.f32 %v4663_v12, %v2359_v31  ;;  %v2101_v1 = vmul.f32 %v4629_v13, %v2359_v31  ;;  %v1809_v29 = vmul.f32 %v4588_v61, %v2359_v31 }
  0xfe   : > { %v1503_v19 = vpop.f32.mrf.mxu0  ;;  %2809 = vst.msk [vmem:[#allocation2 + $0x59] sm:$0x1] %vm422_vm3, %v5712_v49  ;;  %v2327_v54 = vadd.f32 %v2295_v51, %v2229_v45  ;;  %v2490_v5 = vmul.f32 %v4671_v6, %v4714_v44  ;;  %v2491_v33 = vmul.f32 %v4671_v6, %v4721_v27  ;;  %v2035_v34 = vadd.f32 %v2003_v8, %v1937_v43 }
  0xff   : > { %v1577_v56 = vmul.f32 %v4498_v7, %v1503_v19  ;;  %v2198_v25 = vmul.f32 %v4634_v23, %v4714_v44  ;;  %v2199_v45 = vmul.f32 %v4634_v23, %v4721_v27  ;;  %v1906_v59 = vmul.f32 %v4599_v41, %v4714_v44 }
 0x100   : > { %v2425_v46 = vadd.f32 %v2393_v20, %v2327_v54  ;;  %v2522_v35 = vadd.f32 %v2490_v5, %v2424_v21  ;;  %v2133_v28 = vadd.f32 %v2101_v1, %v2035_v34  ;;  %v1841_v21 = vadd.f32 %v1809_v29, %v1743_v18 }
 0x101   : > { %v1613_v16 = vadd.f32 %v4510_v4, %v1577_v56  ;;  %v2230_v53 = vadd.f32 %v2198_v25, %v2132_v15  ;;  %v1840_v56 = vadd.f32 %v1808_v40, %v1742_v57  ;;  %v1907_v10 = vmul.f32 %v4599_v41, %v4721_v27 }
 0x102   : > { %v2523_v22 = vadd.f32 %v2491_v33, %v2425_v46  ;;  %v2231_v2 = vadd.f32 %v2199_v45, %v2133_v28 }
 0x103   : > { %v1645_v58 = vmax.f32 %v1613_v16, 0.0  ;;  %v1939_v14 = vadd.f32 %v1907_v10, %v1841_v21 }
 0x104   : > { %v2553_v42 = vpack.c.bf16 %v2523_v22, %v2522_v35  ;;  %v4741_v52 = vld [vmem:[#allocation2 + $0x60] sm:$0xff]  ;;  %v1531_v3 = vpop.f32.mrf.mxu3 }
 0x105   : > { %1677 = vst.msk [vmem:[#allocation2 + $0x69] sm:$0xff] %vm413_vm1, %v1645_v58  ;;  %v1588_v0 = vmul.f32 %v4498_v7, %v1531_v3  ;;  %v2296_v26 = vmul.f32 %v4643_v9, %v4741_v52  ;;  %v2360_v51 = vld [vmem:[#allocation2 + $0x61] sm:$0xff]  ;;  %v2004_v44 = vmul.f32 %v4610_v32, %v4741_v52 }
 0x106   : > { %v1506_v37 = vpop.f32.mrf.mxu0  ;;  %2792 = vst.msk [vmem:[#allocation2 + $0x60] sm:$0x1] %vm422_vm3, %v5712_v49  ;;  %3313 = vmatmul.msk.bf16.gmra.mxu1 %vm413_vm1, %v2553_v42  ;;  %v2394_v20 = vmul.f32 %v4663_v12, %v2360_v51  ;;  %v1938_v42 = vadd.f32 %v1906_v59, %v1840_v56 }
 0x107   : > { %v1578_v47 = vmul.f32 %v4498_v7, %v1506_v37  ;;  %v1624_v24 = vadd.f32 %v4510_v4, %v1588_v0  ;;  %v2328_v39 = vadd.f32 %v2296_v26, %v2230_v53  ;;  %v1744_v53 = vmul.f32 %v4583_v50, %v4741_v52 }
 0x108   : > { %v2036_v25 = vadd.f32 %v2004_v44, %v1938_v42 }
 0x109   : > { %v1614_v36 = vadd.f32 %v4510_v4, %v1578_v47  ;;  %v1656_v17 = vmax.f32 %v1624_v24, 0.0  ;;  %v2426_v33 = vadd.f32 %v2394_v20, %v2328_v39 }
 0x10b   : > { %v1646_v55 = vmax.f32 %v1614_v36, 0.0  ;;  %1688 = vst.msk [vmem:[#allocation2 + $0xf1] sm:$0xff] %vm413_vm1, %v1656_v17  ;;  %v2102_v36 = vmul.f32 %v4629_v13, %v2360_v51  ;;  %v1810_v17 = vmul.f32 %v4588_v61, %v2360_v51 }
 0x10c   : > { %v2263_v19 = vld [vmem:[#allocation2 + $0x68] sm:$0xff]  ;;  %v1533_v31 = vpop.f32.mrf.mxu3 }
 0x10d   : > { %v2361_v30 = vld [vmem:[#allocation2 + $0x69] sm:$0xff]  ;;  %1678 = vst.msk [vmem:[#allocation2 + $0x79] sm:$0xff] %vm413_vm1, %v1646_v55  ;;  %v2297_v60 = vmul.f32 %v4643_v9, %v2263_v19  ;;  %v1589_v5 = vmul.f32 %v4498_v7, %v1533_v31  ;;  %v2005_v43 = vmul.f32 %v4610_v32, %v2263_v19  ;;  %v2134_v29 = vadd.f32 %v2102_v36, %v2036_v25 }
 0x10e   : > { %v4763_v11 = vld [vmem:[#allocation2 + $0x62] sm:$0xff]  ;;  %v4768_v63 = vld [vmem:[#allocation2 + $0x6a] sm:$0xff]  ;;  %v1508_v54 = vpop.f32.mrf.mxu0  ;;  %v2395_v16 = vmul.f32 %v4663_v12, %v2361_v30  ;;  %v2103_v28 = vmul.f32 %v4629_v13, %v2361_v30 }
 0x10f   : > { %2810 = vst.msk [vmem:[#allocation2 + $0x71] sm:$0x1] %vm422_vm3, %v5712_v49  ;;  %v1579_v62 = vmul.f32 %v4498_v7, %v1508_v54  ;;  %v2329_v38 = vadd.f32 %v2297_v60, %v2231_v2  ;;  %v2492_v46 = vmul.f32 %v4671_v6, %v4763_v11  ;;  %v1625_v8 = vadd.f32 %v4510_v4, %v1589_v5 }
 0x110   : > { %v2493_v22 = vmul.f32 %v4671_v6, %v4768_v63  ;;  %v2037_v0 = vadd.f32 %v2005_v43, %v1939_v14  ;;  %v2200_v57 = vmul.f32 %v4634_v23, %v4763_v11  ;;  %v1745_v2 = vmul.f32 %v4583_v50, %v2263_v19 }
 0x111   : > { %v1615_v58 = vadd.f32 %v4510_v4, %v1579_v62  ;;  %v2427_v35 = vadd.f32 %v2395_v16, %v2329_v38  ;;  %v1657_v48 = vmax.f32 %v1625_v8, 0.0  ;;  %v2524_v3 = vadd.f32 %v2492_v46, %v2426_v33 }
 0x112   : > { %v2135_v55 = vadd.f32 %v2103_v28, %v2037_v0  ;;  %v1811_v60 = vmul.f32 %v4588_v61, %v2361_v30  ;;  %v2201_v56 = vmul.f32 %v4634_v23, %v4768_v63  ;;  %v2232_v54 = vadd.f32 %v2200_v57, %v2134_v29 }
 0x113   : > { %v1647_v34 = vmax.f32 %v1615_v58, 0.0  ;;  %v2525_v37 = vadd.f32 %v2493_v22, %v2427_v35  ;;  %1689 = vst.msk [vmem:[#allocation2 + $0xf9] sm:$0xff] %vm413_vm1, %v1657_v48  ;;  %v1908_v21 = vmul.f32 %v4599_v41, %v4763_v11  ;;  %v1842_v16 = vadd.f32 %v1810_v17, %v1744_v53 }
 0x114   : > { %v2264_v47 = vld [vmem:[#allocation2 + $0x78] sm:$0xff]  ;;  %v1536_v1 = vpop.f32.mrf.mxu3  ;;  %v2233_v59 = vadd.f32 %v2201_v56, %v2135_v55  ;;  %v1843_v10 = vadd.f32 %v1811_v60, %v1745_v2  ;;  %v1909_v48 = vmul.f32 %v4599_v41, %v4768_v63 }
 0x115   : > { %1679 = vst.msk [vmem:[#allocation2 + $0x81] sm:$0xff] %vm413_vm1, %v1647_v34  ;;  %v2554_v27 = vpack.c.bf16 %v2525_v37, %v2524_v3  ;;  %v1590_v26 = vmul.f32 %v4498_v7, %v1536_v1  ;;  %v2298_v45 = vmul.f32 %v4643_v9, %v2264_v47  ;;  %v2362_v20 = vld [vmem:[#allocation2 + $0x79] sm:$0xff]  ;;  %v2006_v44 = vmul.f32 %v4610_v32, %v2264_v47 }
 0x116   : > { %v1511_v15 = vpop.f32.mrf.mxu0  ;;  %2793 = vst.msk [vmem:[#allocation2 + $0x78] sm:$0x1] %vm422_vm3, %v5712_v49  ;;  %v2396_v33 = vmul.f32 %v4663_v12, %v2362_v20  ;;  %v1940_v42 = vadd.f32 %v1908_v21, %v1842_v16  ;;  %v1941_v0 = vadd.f32 %v1909_v48, %v1843_v10  ;;  %v1746_v1 = vmul.f32 %v4583_v50, %v2264_v47 }
 0x117   : > { %v1580_v24 = vmul.f32 %v4498_v7, %v1511_v15  ;;  %3314 = vmatmul.msk.bf16.gmra.mxu1 %vm413_vm1, %v2554_v27  ;;  %v1626_v40 = vadd.f32 %v4510_v4, %v1590_v26  ;;  %v2330_v30 = vadd.f32 %v2298_v45, %v2232_v54  ;;  %v1812_v15 = vmul.f32 %v4588_v61, %v2362_v20 }
 0x118   : > { %v2038_v28 = vadd.f32 %v2006_v44, %v1940_v42 }
 0x119   : > { %v1616_v18 = vadd.f32 %v4510_v4, %v1580_v24  ;;  %v1658_v39 = vmax.f32 %v1626_v40, 0.0  ;;  %v2428_v37 = vadd.f32 %v2396_v33, %v2330_v30  ;;  %v2104_v40 = vmul.f32 %v4629_v13, %v2362_v20 }
 0x11a   : > { %v1844_v56 = vadd.f32 %v1812_v15, %v1746_v1 }
 0x11b   : > { %v1648_v31 = vmax.f32 %v1616_v18, 0.0  ;;  %1690 = vst.msk [vmem:[#allocation2 + $0x109] sm:$0xff] %vm413_vm1, %v1658_v39 }
 0x11c   : > { %v2265_v52 = vld [vmem:[#allocation2 + $0x80] sm:$0xff]  ;;  %v1538_v38 = vpop.f32.mrf.mxu3 }
 0x11d   : > { %v2363_v5 = vld [vmem:[#allocation2 + $0x81] sm:$0xff]  ;;  %1680 = vst.msk [vmem:[#allocation2 + $0x91] sm:$0xff] %vm413_vm1, %v1648_v31  ;;  %v2299_v19 = vmul.f32 %v4643_v9, %v2265_v52  ;;  %v1591_v8 = vmul.f32 %v4498_v7, %v1538_v38  ;;  %v2007_v34 = vmul.f32 %v4610_v32, %v2265_v52  ;;  %v1747_v18 = vmul.f32 %v4583_v50, %v2265_v52 }
 0x11e   : > { %v2460_v51 = vld [vmem:[#allocation2 + $0x7a] sm:$0xff]  ;;  %v2461_v62 = vld [vmem:[#allocation2 + $0x82] sm:$0xff]  ;;  %v1513_v46 = vpop.f32.mrf.mxu0  ;;  %v2397_v35 = vmul.f32 %v4663_v12, %v2363_v5  ;;  %v1813_v47 = vmul.f32 %v4588_v61, %v2363_v5  ;;  %v2105_v55 = vmul.f32 %v4629_v13, %v2363_v5  ;;  %v2136_v31 = vadd.f32 %v2104_v40, %v2038_v28 }
 0x11f   : > { %2811 = vst.msk [vmem:[#allocation2 + $0x89] sm:$0x1] %vm422_vm3, %v5712_v49  ;;  %v1581_v11 = vmul.f32 %v4498_v7, %v1513_v46  ;;  %v2331_v58 = vadd.f32 %v2299_v19, %v2233_v59  ;;  %v2494_v22 = vmul.f32 %v4671_v6, %v2460_v51  ;;  %v1627_v43 = vadd.f32 %v4510_v4, %v1591_v8 }
 0x120   : > { %v2495_v27 = vmul.f32 %v4671_v6, %v2461_v62  ;;  %v2039_v63 = vadd.f32 %v2007_v34, %v1941_v0  ;;  %v2202_v45 = vmul.f32 %v4634_v23, %v2460_v51  ;;  %v1910_v2 = vmul.f32 %v4599_v41, %v2460_v51 }
 0x121   : > { %v1617_v3 = vadd.f32 %v4510_v4, %v1581_v11  ;;  %v2429_v14 = vadd.f32 %v2397_v35, %v2331_v58  ;;  %v1659_v25 = vmax.f32 %v1627_v43, 0.0  ;;  %v2526_v24 = vadd.f32 %v2494_v22, %v2428_v37 }
 0x122   : > { %v2137_v54 = vadd.f32 %v2105_v55, %v2039_v63  ;;  %v1845_v59 = vadd.f32 %v1813_v47, %v1747_v18  ;;  %v2203_v51 = vmul.f32 %v4634_v23, %v2461_v62  ;;  %v2234_v19 = vadd.f32 %v2202_v45, %v2136_v31  ;;  %v4868_v18 = vld [vmem:[#allocation2 + $0xf0] sm:$0xff] }
 0x123   : > { %v1649_v26 = vmax.f32 %v1617_v3, 0.0  ;;  %v2527_v36 = vadd.f32 %v2495_v27, %v2429_v14  ;;  %1691 = vst.msk [vmem:[#allocation2 + $0x111] sm:$0xff] %vm413_vm1, %v1659_v25  ;;  %v1942_v16 = vadd.f32 %v1910_v2, %v1844_v56  ;;  %v1911_v33 = vmul.f32 %v4599_v41, %v2461_v62 }
 0x124   : > { %v2266_v53 = vld [vmem:[#allocation2 + $0x90] sm:$0xff]  ;;  %v1541_v17 = vpop.f32.mrf.mxu3  ;;  %v2235_v8 = vadd.f32 %v2203_v51, %v2137_v54  ;;  %2798 = vst.msk [vmem:[#allocation2 + $0xf0] sm:$0x1] %vm422_vm3, %v5712_v49 }
 0x125   : > { %1681 = vst.msk [vmem:[#allocation2 + $0x99] sm:$0xff] %vm413_vm1, %v1649_v26  ;;  %v2555_v57 = vpack.c.bf16 %v2527_v36, %v2526_v24  ;;  %v1592_v39 = vmul.f32 %v4498_v7, %v1541_v17  ;;  %v2300_v20 = vmul.f32 %v4643_v9, %v2266_v53  ;;  %v2008_v5 = vmul.f32 %v4610_v32, %v2266_v53  ;;  %v2364_v30 = vld [vmem:[#allocation2 + $0x91] sm:$0xff] }
 0x126   : > { %v1516_v29 = vpop.f32.mrf.mxu0  ;;  %2794 = vst.msk [vmem:[#allocation2 + $0x90] sm:$0x1] %vm422_vm3, %v5712_v49  ;;  %v2398_v43 = vmul.f32 %v4663_v12, %v2364_v30  ;;  %v1943_v34 = vadd.f32 %v1911_v33, %v1845_v59  ;;  %v2106_v14 = vmul.f32 %v4629_v13, %v2364_v30  ;;  %v1748_v27 = vmul.f32 %v4583_v50, %v2266_v53 }
 0x127   : > { %v1582_v60 = vmul.f32 %v4498_v7, %v1516_v29  ;;  %3315 = vmatmul.msk.bf16.gmra.mxu1 %vm413_vm1, %v2555_v57  ;;  %v1628_v52 = vadd.f32 %v4510_v4, %v1592_v39  ;;  %v2332_v44 = vadd.f32 %v2300_v20, %v2234_v19  ;;  %v2040_v35 = vadd.f32 %v2008_v5, %v1942_v16  ;;  %v4891_v16 = vld [vmem:[%s5681_s3] ss:$0 sm:$0xff] }
 0x128   : > { %v1814_v25 = vmul.f32 %v4588_v61, %v2364_v30 }
 0x129   : > { %v1618_v21 = vadd.f32 %v4510_v4, %v1582_v60  ;;  %v1660_v38 = vmax.f32 %v1628_v52, 0.0  ;;  %v2430_v24 = vadd.f32 %v2398_v43, %v2332_v44  ;;  %v2138_v63 = vadd.f32 %v2106_v14, %v2040_v35 }
 0x12a   : > { %v1846_v54 = vadd.f32 %v1814_v25, %v1748_v27 }
 0x12b   : > { %v1650_v46 = vmax.f32 %v1618_v21, 0.0  ;;  %1692 = vst.msk [vmem:[#allocation2 + $0x121] sm:$0xff] %vm413_vm1, %v1660_v38  ;;  %v4886_v38 = vmul.f32 %v4583_v50, %v4868_v18 }
 0x12c   : > { %v2267_v10 = vld [vmem:[#allocation2 + $0x98] sm:$0xff]  ;;  %v1543_v42 = vpop.f32.mrf.mxu3 }
 0x12d   : > { %v2365_v11 = vld [vmem:[#allocation2 + $0x99] sm:$0xff]  ;;  %1682 = vst.msk [vmem:[#allocation2 + $0xa9] sm:$0xff] %vm413_vm1, %v1650_v46  ;;  %v2301_v22 = vmul.f32 %v4643_v9, %v2267_v10  ;;  %v2009_v3 = vmul.f32 %v4610_v32, %v2267_v10  ;;  %v1593_v37 = vmul.f32 %v4498_v7, %v1543_v42  ;;  %v1749_v29 = vmul.f32 %v4583_v50, %v2267_v10  ;;  %v4904_v42 = vld [vmem:[#allocation2 + $0xf1] sm:$0xff] }
 0x12e   : > { %v2462_v58 = vld [vmem:[#allocation2 + $0x92] sm:$0xff]  ;;  %v2463_v48 = vld [vmem:[#allocation2 + $0x9a] sm:$0xff]  ;;  %v1518_v62 = vpop.f32.mrf.mxu0  ;;  %v2399_v15 = vmul.f32 %v4663_v12, %v2365_v11  ;;  %v2107_v47 = vmul.f32 %v4629_v13, %v2365_v11  ;;  %v1815_v55 = vmul.f32 %v4588_v61, %v2365_v11  ;;  %v4923_v25 = vmul.f32 %v4629_v13, %v4904_v42 }
 0x12f   : > { %2812 = vst.msk [vmem:[#allocation2 + $0xa1] sm:$0x1] %vm422_vm3, %v5712_v49  ;;  %v1583_v0 = vmul.f32 %v4498_v7, %v1518_v62  ;;  %v2333_v1 = vadd.f32 %v2301_v22, %v2235_v8  ;;  %v2496_v26 = vmul.f32 %v4671_v6, %v2462_v58  ;;  %v1629_v36 = vadd.f32 %v4510_v4, %v1593_v37  ;;  %v1983_v11 = vld [vmem:[#allocation2 + $0xf8] sm:$0xff]  ;;  %v4915_v62 = vld [vmem:[%s5682_s4] ss:$0 sm:$0xff] }
 0x130   : > { %v2041_v28 = vadd.f32 %v2009_v3, %v1943_v34  ;;  %v2497_v53 = vmul.f32 %v4671_v6, %v2463_v48  ;;  %v2204_v17 = vmul.f32 %v4634_v23, %v2462_v58  ;;  %v1912_v2 = vmul.f32 %v4599_v41, %v2462_v58  ;;  %v4897_v58 = vld [vmem:[#allocation2 + $0xfa] sm:$0xff]  ;;  %v4906_v34 = vld [vmem:[#allocation2 + $0xf2] sm:$0xff]  ;;  %v4908_v3 = vld [vmem:[#allocation2 + $0x108] sm:$0xff] }
 0x131   : > { %v1619_v57 = vadd.f32 %v4510_v4, %v1583_v0  ;;  %v2431_v40 = vadd.f32 %v2399_v15, %v2333_v1  ;;  %v1661_v7 = vmax.f32 %v1629_v36, 0.0  ;;  %v2528_v39 = vadd.f32 %v2496_v26, %v2430_v24  ;;  %5754 = vst [vmem:[#allocation13_spill] sm:$0xff] %v4906_v34  ;;  %v4925_v0 = vld [vmem:[#allocation2 + $0x112] sm:$0xff] }
 0x132   : > { %v2139_v60 = vadd.f32 %v2107_v47, %v2041_v28  ;;  %v2205_v52 = vmul.f32 %v4634_v23, %v2463_v48  ;;  %v2236_v5 = vadd.f32 %v2204_v17, %v2138_v63  ;;  %v1847_v51 = vadd.f32 %v1815_v55, %v1749_v29  ;;  %2816 = vst.msk [vmem:[#allocation2 + $0x101] sm:$0x1] %vm422_vm3, %v5712_v49  ;;  %v4932_v36 = vld [vmem:[#allocation2 + $0xf9] sm:$0xff] }
 0x133   : > { %v1651_v45 = vmax.f32 %v1619_v57, 0.0  ;;  %v2529_v4 = vadd.f32 %v2497_v53, %v2431_v40  ;;  %1693 = vst.msk [vmem:[#allocation2 + $0x129] sm:$0xff] %vm413_vm1, %v1661_v7  ;;  %v1913_v19 = vmul.f32 %v4599_v41, %v2463_v48  ;;  %v1944_v8 = vadd.f32 %v1912_v2, %v1846_v54  ;;  %v4944_v53 = vld [vmem:[#allocation2 + $0x120] sm:$0xff] }
 0x134   : > { %v2268_v31 = vld [vmem:[#allocation2 + $0xa8] sm:$0xff]  ;;  %v2237_v35 = vadd.f32 %v2205_v52, %v2139_v60  ;;  %v4902_v48 = vmul.f32 %v4610_v32, %v4868_v18  ;;  %v4919_v27 = vmul.f32 %v4610_v32, %v1983_v11  ;;  %2799 = vst.msk [vmem:[#allocation2 + $0x108] sm:$0x1] %vm422_vm3, %v5712_v49  ;;  %v4938_v57 = vmul.f32 %v4629_v13, %v4932_v36 }
 0x135   : > { %v2366_v56 = vld [vmem:[#allocation2 + $0xa9] sm:$0xff]  ;;  %1683 = vst.msk [vmem:[#allocation2 + $0xb1] sm:$0xff] %vm413_vm1, %v1651_v45  ;;  %v2556_v20 = vpack.c.bf16 %v2529_v4, %v2528_v39  ;;  %v2302_v21 = vmul.f32 %v4643_v9, %v2268_v31  ;;  %v2010_v30 = vmul.f32 %v4610_v32, %v2268_v31  ;;  %v1546_v33 = vpop.f32.mrf.mxu3  ;;  %v1750_v10 = vmul.f32 %v4583_v50, %v2268_v31 }
 0x136   : > { %v1521_v59 = vpop.f32.mrf.mxu0  ;;  %2795 = vst.msk [vmem:[#allocation2 + $0xa8] sm:$0x1] %vm422_vm3, %v5712_v49  ;;  %v1816_v44 = vmul.f32 %v4588_v61, %v2366_v56  ;;  %v1594_v43 = vmul.f32 %v4891_v16, %v1546_v33  ;;  %v2400_v1 = vmul.f32 %v4663_v12, %v2366_v56  ;;  %v1945_v26 = vadd.f32 %v1913_v19, %v1847_v51 }
 0x137   : > { %v1584_v46 = vmul.f32 %v4891_v16, %v1521_v59  ;;  %3316 = vmatmul.msk.bf16.gmra.mxu1 %vm413_vm1, %v2556_v20  ;;  %v2334_v22 = vadd.f32 %v2302_v21, %v2236_v5  ;;  %v2042_v14 = vadd.f32 %v2010_v30, %v1944_v8  ;;  %v2108_v24 = vmul.f32 %v4629_v13, %v2366_v56 }
 0x138   : > { %v1630_v15 = vadd.f32 %v4915_v62, %v1594_v43  ;;  %2817 = vst.msk [vmem:[#allocation2 + $0x119] sm:$0x1] %vm422_vm3, %v5712_v49  ;;  %v1848_v63 = vadd.f32 %v1816_v44, %v1750_v10  ;;  %v4942_v40 = vmul.f32 %v4634_v23, %v4906_v34  ;;  %v4948_v45 = vmul.f32 %v4634_v23, %v4897_v58 }
 0x139   : > { %v1620_v37 = vadd.f32 %v4915_v62, %v1584_v46  ;;  %v2432_v47 = vadd.f32 %v2400_v1, %v2334_v22  ;;  %v4952_v39 = vmul.f32 %v4643_v9, %v4868_v18  ;;  %2800 = vst.msk [vmem:[#allocation2 + $0x120] sm:$0x1] %vm422_vm3, %v5712_v49  ;;  %v2140_v31 = vadd.f32 %v2108_v24, %v2042_v14 }
 0x13a   : > { %v1662_v55 = vmax.f32 %v1630_v15, 0.0  ;;  %v4960_v56 = vmul.f32 %v4643_v9, %v1983_v11  ;;  %v1757_v52 = vmul.f32 %v4583_v50, %v1983_v11  ;;  %v1822_v5 = vmul.f32 %v4588_v61, %v4904_v42  ;;  %v4972_v46 = vld [vmem:[#allocation2 + $0x12a] sm:$0xff] }
 0x13b   : > { %v1652_v28 = vmax.f32 %v1620_v37, 0.0  ;;  %5755 = vst [vmem:[#allocation14_spill] sm:$0xff] %v4972_v46  ;;  %v1823_v1 = vmul.f32 %v4588_v61, %v4932_v36  ;;  %v1920_v15 = vmul.f32 %v4599_v41, %v4906_v34 }
 0x13c   : > { %v2269_v17 = vld [vmem:[#allocation2 + $0xb0] sm:$0xff]  ;;  %1694 = vst.msk [vmem:[#allocation2 + $0x139] sm:$0xff] %vm413_vm1, %v1662_v55 }
 0x13d   : > { %v2367_v7 = vld [vmem:[#allocation2 + $0xb1] sm:$0xff]  ;;  %1684 = vst.msk [vmem:[#allocation2 + $0xc1] sm:$0xff] %vm413_vm1, %v1652_v28  ;;  %v2303_v4 = vmul.f32 %v4643_v9, %v2269_v17  ;;  %v2011_v60 = vmul.f32 %v4610_v32, %v2269_v17  ;;  %v1548_v19 = vpop.f32.mrf.mxu3  ;;  %v1751_v10 = vmul.f32 %v4583_v50, %v2269_v17 }
 0x13e   : > { %v2464_v29 = vld [vmem:[#allocation2 + $0xaa] sm:$0xff]  ;;  %v2465_v2 = vld [vmem:[#allocation2 + $0xb2] sm:$0xff]  ;;  %v1523_v54 = vpop.f32.mrf.mxu0  ;;  %v2401_v20 = vmul.f32 %v4663_v12, %v2367_v7  ;;  %v1595_v33 = vmul.f32 %v4891_v16, %v1548_v19  ;;  %v1817_v44 = vmul.f32 %v4588_v61, %v2367_v7  ;;  %2818 = vst.msk [vmem:[#allocation2 + $0x131] sm:$0x1] %vm422_vm3, %v5712_v49  ;;  %v2109_v22 = vmul.f32 %v4629_v13, %v2367_v7 }
 0x13f   : > { %v2498_v18 = vmul.f32 %v4671_v6, %v2464_v29  ;;  %v1585_v21 = vmul.f32 %v4891_v16, %v1523_v54  ;;  %v2335_v59 = vadd.f32 %v2303_v4, %v2237_v35  ;;  %v2499_v51 = vmul.f32 %v4671_v6, %v2465_v2  ;;  %2813 = vst.msk [vmem:[#allocation2 + $0xb9] sm:$0x1] %vm422_vm3, %v5712_v49 }
 0x140   : > { %v2043_v30 = vadd.f32 %v2011_v60, %v1945_v26  ;;  %v2206_v8 = vmul.f32 %v4634_v23, %v2464_v29  ;;  %v1914_v43 = vmul.f32 %v4599_v41, %v2464_v29  ;;  %v1631_v37 = vadd.f32 %v4915_v62, %v1595_v33 }
 0x141   : > { %v1621_v11 = vadd.f32 %v4915_v62, %v1585_v21  ;;  %v2433_v35 = vadd.f32 %v2401_v20, %v2335_v59  ;;  %v2207_v14 = vmul.f32 %v4634_v23, %v2465_v2  ;;  %v2530_v24 = vadd.f32 %v2498_v18, %v2432_v47 }
 0x142   : > { %v2141_v17 = vadd.f32 %v2109_v22, %v2043_v30  ;;  %v1663_v55 = vmax.f32 %v1631_v37, 0.0  ;;  %v2238_v4 = vadd.f32 %v2206_v8, %v2140_v31  ;;  %v1849_v7 = vadd.f32 %v1817_v44, %v1751_v10  ;;  %v5019_v22 = vld [vmem:[#allocation2 + $0x109] sm:$0xff] }
 0x143   : > { %v1653_v26 = vmax.f32 %v1621_v11, 0.0  ;;  %v2531_v28 = vadd.f32 %v2499_v51, %v2433_v35  ;;  %v1854_v29 = vadd.f32 %v1822_v5, %v4886_v38  ;;  %v1946_v59 = vadd.f32 %v1914_v43, %v1848_v63 }
 0x144   : > { %v2270_v60 = vld [vmem:[#allocation2 + $0xc0] sm:$0xff]  ;;  %1695 = vst.msk [vmem:[#allocation2 + $0x141] sm:$0xff] %vm413_vm1, %v1663_v55  ;;  %v1915_v47 = vmul.f32 %v4599_v41, %v2465_v2  ;;  %v4997_v31 = vmul.f32 %v4663_v12, %v4904_v42  ;;  %v5001_v38 = vmul.f32 %v4663_v12, %v4932_v36  ;;  %v5005_v18 = vmul.f32 %v4671_v6, %v4897_v58  ;;  %v5009_v2 = vld [vmem:[#allocation2 + $0x110] sm:$0xff] }
 0x145   : > { %1685 = vst.msk [vmem:[#allocation2 + $0xc9] sm:$0xff] %vm413_vm1, %v1653_v26  ;;  %v2557_v54 = vpack.c.bf16 %v2531_v28, %v2530_v24  ;;  %v2304_v20 = vmul.f32 %v4643_v9, %v2270_v60  ;;  %v2368_v21 = vld [vmem:[#allocation2 + $0xc1] sm:$0xff]  ;;  %v2012_v19 = vmul.f32 %v4610_v32, %v2270_v60  ;;  %v2239_v5 = vadd.f32 %v2207_v14, %v2141_v17  ;;  %v5022_v14 = vld [vmem:[#allocation2 + $0x111] sm:$0xff] }
 0x146   : > { %v1526_v33 = vpop.f32.mrf.mxu0  ;;  %5756 = vst [vmem:[#allocation15_spill] sm:$0xff] %v5005_v18  ;;  %v1752_v42 = vmul.f32 %v4583_v50, %v2270_v60  ;;  %v1818_v8 = vmul.f32 %v4588_v61, %v2368_v21  ;;  %v1855_v36 = vadd.f32 %v1823_v1, %v1757_v52  ;;  %v1921_v10 = vmul.f32 %v4599_v41, %v4897_v58  ;;  %v5037_v24 = vld [vmem:[#allocation2 + $0x10a] sm:$0xff] }
 0x147   : > { %v1586_v63 = vmul.f32 %v4891_v16, %v1526_v33  ;;  %3317 = vmatmul.msk.bf16.gmra.mxu1 %vm413_vm1, %v2557_v54  ;;  %v2336_v51 = vadd.f32 %v2304_v20, %v2238_v4  ;;  %v2044_v30 = vadd.f32 %v2012_v19, %v1946_v59  ;;  %2796 = vst.msk [vmem:[#allocation2 + $0xc0] sm:$0x1] %vm422_vm3, %v5712_v49 }
 0x148   : > { %v2402_v11 = vmul.f32 %v4663_v12, %v2368_v21  ;;  %v1947_v35 = vadd.f32 %v1915_v47, %v1849_v7  ;;  %v1952_v43 = vadd.f32 %v1920_v15, %v1854_v29  ;;  %v2110_v50 = vmul.f32 %v4629_v13, %v2368_v21 }
 0x149   : > { %v1622_v44 = vadd.f32 %v4915_v62, %v1586_v63  ;;  %v1551_v37 = vpop.f32.mrf.mxu3  ;;  %v1953_v61 = vadd.f32 %v1921_v10, %v1855_v36  ;;  %v2018_v52 = vmul.f32 %v4610_v32, %v4908_v3  ;;  %v2019_v41 = vmul.f32 %v4610_v32, %v5009_v2 }
 0x14a   : > { %v1596_v1 = vmul.f32 %v4891_v16, %v1551_v37  ;;  %v5031_v26 = vmul.f32 %v4643_v9, %v4908_v3  ;;  %v5035_v15 = vmul.f32 %v4643_v9, %v5009_v2  ;;  %v2434_v55 = vadd.f32 %v2402_v11, %v2336_v51 }
 0x14b   : > { %v1654_v58 = vmax.f32 %v1622_v44, 0.0  ;;  %v2142_v60 = vadd.f32 %v2110_v50, %v2044_v30  ;;  %v1850_v7 = vadd.f32 %v1818_v8, %v1752_v42  ;;  %v2116_v29 = vmul.f32 %v4629_v13, %v5019_v22  ;;  %v5054_v42 = vld [vmem:[#allocation2 + $0x138] sm:$0xff] }
 0x14c   : > { %v2271_v28 = vld [vmem:[#allocation2 + $0xc8] sm:$0xff]  ;;  %v1632_v21 = vadd.f32 %v4915_v62, %v1596_v1  ;;  %v2050_v59 = vadd.f32 %v2018_v52, %v1952_v43  ;;  %v2117_v19 = vmul.f32 %v4629_v13, %v5022_v14  ;;  %v2051_v51 = vadd.f32 %v2019_v41, %v1953_v61  ;;  %5757 = vst [vmem:[#allocation6_spill] sm:$0xff] %v5054_v42 }
 0x14d   : > { %v2369_v17 = vld [vmem:[#allocation2 + $0xc9] sm:$0xff]  ;;  %1686 = vst.msk [vmem:[#allocation2 + $0xd9] sm:$0xff] %vm413_vm1, %v1654_v58  ;;  %v2305_v54 = vmul.f32 %v4643_v9, %v2271_v28  ;;  %v2013_v63 = vmul.f32 %v4610_v32, %v2271_v28  ;;  %v5052_v30 = vmul.f32 %v4634_v23, %v5037_v24  ;;  %v2215_v37 = vmul.f32 %v4634_v23, %v4925_v0 }
 0x14e   : > { %v2466_v4 = vld [vmem:[#allocation2 + $0xc2] sm:$0xff]  ;;  %v2467_v20 = vld [vmem:[#allocation2 + $0xca] sm:$0xff]  ;;  %v1528_v33 = vpop.f32.mrf.mxu0  ;;  %v2403_v10 = vmul.f32 %v4663_v12, %v2369_v17  ;;  %v1664_v44 = vmax.f32 %v1632_v21, 0.0  ;;  %2801 = vst.msk [vmem:[#allocation2 + $0x138] sm:$0x1] %vm422_vm3, %v5712_v49  ;;  %v2148_v42 = vadd.f32 %v2116_v29, %v2050_v59  ;;  %v2149_v46 = vadd.f32 %v2117_v19, %v2051_v51 }
 0x14f   : > { %v2500_v47 = vmul.f32 %v4671_v6, %v2466_v4  ;;  %2814 = vst.msk [vmem:[#allocation2 + $0xd1] sm:$0x1] %vm422_vm3, %v5712_v49  ;;  %v1587_v8 = vmul.f32 %v4891_v16, %v1528_v33  ;;  %v2337_v36 = vadd.f32 %v2305_v54, %v2239_v5  ;;  %v2501_v32 = vmul.f32 %v4671_v6, %v2467_v20  ;;  %v5069_v5 = vld [vmem:[%s5683_s5] ss:$0 sm:$0xff] }
 0x150   : > { %v2045_v11 = vadd.f32 %v2013_v63, %v1947_v35  ;;  %v2208_v43 = vmul.f32 %v4634_v23, %v2466_v4  ;;  %1696 = vst.msk [vmem:[#allocation2 + $0x151] sm:$0xff] %vm413_vm1, %v1664_v44  ;;  %v1753_v52 = vmul.f32 %v5069_v5, %v2271_v28  ;;  %v5075_v35 = vld [vmem:[%s5683_s5 + $0x1] ss:$0 sm:$0xff]  ;;  %v2111_v54 = vmul.f32 %v4629_v13, %v2369_v17  ;;  %v5086_v28 = vld [vmem:[%s5683_s5 + $0x2] ss:$0 sm:$0xff] }
 0x151   : > { %v1623_v50 = vadd.f32 %v4915_v62, %v1587_v8  ;;  %v2435_v61 = vadd.f32 %v2403_v10, %v2337_v36  ;;  %5758 = vst [vmem:[#allocation8_spill] sm:$0xff] %v5069_v5  ;;  %v1819_v41 = vmul.f32 %v5075_v35, %v2369_v17  ;;  %v2532_v58 = vadd.f32 %v2500_v47, %v2434_v55  ;;  %v1553_v1 = vpop.f32.mrf.mxu3  ;;  %v3080_v33 = vld [vmem:[%s5687_s9] sm:$0x3]  ;;  %v5089_v8 = vld [vmem:[#allocation2 + $0x142] sm:$0xff] }
 0x152   : > { %5759 = vst [vmem:[#allocation7_spill] sm:$0xff] %v5075_v35  ;;  %v2209_v21 = vmul.f32 %v4634_v23, %v2467_v20  ;;  %v1916_v63 = vmul.f32 %v5086_v28, %v2466_v4  ;;  %v1597_v47 = vmul.f32 %v4891_v16, %v1553_v1  ;;  %v3094_v13 = vsel %vm1473_vm0, %v3080_v33, 0 }
 0x153   : > { %5760 = vst [vmem:[#allocation9_spill] sm:$0xff] %v5089_v8  ;;  %v1655_v36 = vmax.f32 %v1623_v50, 0.0  ;;  %v2533_v55 = vadd.f32 %v2501_v32, %v2435_v61  ;;  %v2143_v23 = vadd.f32 %v2111_v54, %v2045_v11  ;;  %v2240_v17 = vadd.f32 %v2208_v43, %v2142_v60  ;;  %3103 = vmatpush.bf16.msrb.mxu2 %v3094_v13  ;;  %v5103_v60 = vld [vmem:[%s5683_s5 + $0x3] ss:$0 sm:$0xff]  ;;  %v5114_v11 = vld [vmem:[#allocation2 + $0x128] sm:$0xff] }
 0x154   : > { %2819 = vst.msk [vmem:[#allocation2 + $0x149] sm:$0x1] %vm422_vm3, %v5712_v49  ;;  %v2272_v10 = vld [vmem:[#allocation2 + $0xd8] sm:$0xff]  ;;  %v1633_v50 = vadd.f32 %v4915_v62, %v1597_v47  ;;  %v1851_v61 = vadd.f32 %v1819_v41, %v1753_v52  ;;  %v1948_v49 = vadd.f32 %v1916_v63, %v1850_v7  ;;  %v5761_v59 = vmov -inf   ;;  %v5124_v54 = vld [vmem:[#allocation2 + $0x121] sm:$0xff]  ;;  %v5126_v63 = vld [vmem:[#allocation2 + $0x129] sm:$0xff] }
 0x155   : > { %v2370_v44 = vld [vmem:[#allocation2 + $0xd9] sm:$0xff]  ;;  %1687 = vst.msk [vmem:[#allocation2 + $0xe1] sm:$0xff] %vm413_vm1, %v1655_v36  ;;  %v2558_v4 = vpack.c.bf16 %v2533_v55, %v2532_v58  ;;  %v2306_v32 = vmul.f32 %v4643_v9, %v2272_v10  ;;  %v1754_v1 = vmul.f32 %v5069_v5, %v2272_v10  ;;  %v2014_v29 = vmul.f32 %v5103_v60, %v2272_v10 }
 0x156   : > { %v1820_v33 = vmul.f32 %v5075_v35, %v2370_v44  ;;  %2797 = vst.msk [vmem:[#allocation2 + $0xd8] sm:$0x1] %vm422_vm3, %v5761_v59  ;;  %v1665_v19 = vmax.f32 %v1633_v50, 0.0  ;;  %v5111_v51 = vmul.f32 %v4663_v12, %v5019_v22  ;;  %v1917_v7 = vmul.f32 %v5086_v28, %v2467_v20 }
 0x157   : > { %3318 = vmatmul.msk.bf16.gmra.mxu1 %vm413_vm1, %v2558_v4  ;;  %v2338_v9 = vadd.f32 %v2306_v32, %v2240_v17  ;;  %v2241_v43 = vadd.f32 %v2209_v21, %v2143_v23  ;;  %v5118_v52 = vmul.f32 %v4663_v12, %v5022_v14  ;;  %v5122_v41 = vmul.f32 %v4671_v6, %v5037_v24  ;;  %v5133_v21 = vld [vmem:[%s5683_s5 + $0x4] ss:$0 sm:$0xff] }
 0x158   : > { %v2046_v58 = vadd.f32 %v2014_v29, %v1948_v49  ;;  %1697 = vst.msk [vmem:[#allocation2 + $0x159] sm:$0xff] %vm413_vm1, %v1665_v19  ;;  %v2404_v20 = vmul.f32 %v4663_v12, %v2370_v44  ;;  %v1949_v36 = vadd.f32 %v1917_v7, %v1851_v61  ;;  %v2112_v55 = vmul.f32 %v5133_v21, %v2370_v44  ;;  %v5139_v49 = vld [vmem:[#allocation2 + $0x122] sm:$0xff] }
 0x159   : > { %5762 = vst [vmem:[#allocation10_spill] sm:$0xff] %v5122_v41  ;;  %v5137_v6 = vadd.f32 %v5052_v30, %v2148_v42  ;;  %v1556_v47 = vpop.f32.mrf.mxu3  ;;  %v1852_v13 = vadd.f32 %v1820_v33, %v1754_v1  ;;  %v5141_v23 = vadd.f32 %v2215_v37, %v2149_v46  ;;  %v5146_v12 = vld [vmem:[%s5683_s5 + $0x6] ss:$0 sm:$0xff]  ;;  %v5158_v46 = vld [vmem:[%s5683_s5 + $0x7] ss:$0 sm:$0xff]  ;;  %v1758_v29 = vmul.f32 %v5069_v5, %v4908_v3 }
 0x15a   : > { %5763 = vst [vmem:[#allocation11_spill] sm:$0xff] %v5139_v49  ;;  %v2312_v17 = vmul.f32 %v5146_v12, %v4944_v53  ;;  %v5152_v10 = vmul.f32 %v5146_v12, %v5114_v11  ;;  %v2436_v30 = vadd.f32 %v2404_v20, %v2338_v9  ;;  %v1598_v42 = vmul.f32 %v4891_v16, %v1556_v47  ;;  %v5171_v1 = vld [vmem:[%s5683_s5 + $0x8] ss:$0 sm:$0xff] }
 0x15b   : > { %5764 = vst [vmem:[#allocation12_spill] sm:$0xff] %v5146_v12  ;;  %v5162_v37 = vmul.f32 %v5158_v46, %v5124_v54  ;;  %v5166_v44 = vmul.f32 %v5158_v46, %v5126_v63  ;;  %v2144_v61 = vadd.f32 %v2112_v55, %v2046_v58  ;;  %v5175_v33 = vmul.f32 %v5171_v1, %v5139_v49 }
 0x15c   : > { %v2273_v4 = vld [vmem:[#allocation2 + $0xe0] sm:$0xff]  ;;  %v1759_v19 = vmul.f32 %v5069_v5, %v5009_v2  ;;  %v1634_v20 = vadd.f32 %v4915_v62, %v1598_v42  ;;  %v1824_v55 = vmul.f32 %v5075_v35, %v5019_v22  ;;  %v1825_v3 = vmul.f32 %v5075_v35, %v5022_v14  ;;  %v5193_v2 = vld [vmem:[#allocation2 + $0x150] sm:$0xff] }
 0x15d   : > { %5765 = vst [vmem:[#allocation16_spill] sm:$0xff] %v5166_v44  ;;  %v2371_v50 = vld [vmem:[#allocation2 + $0xe1] sm:$0xff]  ;;  %v2307_v9 = vmul.f32 %v5146_v12, %v2273_v4  ;;  %v1755_v47 = vmul.f32 %v5069_v5, %v2273_v4  ;;  %v1922_v22 = vmul.f32 %v5086_v28, %v5037_v24  ;;  %v2015_v34 = vmul.f32 %v5103_v60, %v2273_v4 }
 0x15e   : > { %v2468_v32 = vld [vmem:[#allocation2 + $0xda] sm:$0xff]  ;;  %5766 = vst [vmem:[#allocation17_spill] sm:$0xff] %v5175_v33  ;;  %v2469_v7 = vld [vmem:[#allocation2 + $0xe2] sm:$0xff]  ;;  %v1821_v8 = vmul.f32 %v5075_v35, %v2371_v50  ;;  %v2405_v42 = vmul.f32 %v5158_v46, %v2371_v50  ;;  %v1666_v44 = vmax.f32 %v1634_v20, 0.0  ;;  %v2113_v4 = vmul.f32 %v5133_v21, %v2371_v50 }
 0x15f   : > { %v2502_v58 = vmul.f32 %v5171_v1, %v2468_v32  ;;  %v1918_v33 = vmul.f32 %v5086_v28, %v2468_v32  ;;  %2815 = vst.msk [vmem:[#allocation2 + $0xe9] sm:$0x1] %vm422_vm3, %v5761_v59  ;;  %v2339_v12 = vadd.f32 %v2307_v9, %v2241_v43  ;;  %v1919_v41 = vmul.f32 %v5086_v28, %v2469_v7  ;;  %v5207_v43 = vld [vmem:[%s5683_s5 + $0x5] ss:$0 sm:$0xff] }
 0x160   : > { %2802 = vst.msk [vmem:[#allocation2 + $0x150] sm:$0x1] %vm422_vm3, %v5761_v59  ;;  %v1853_v5 = vadd.f32 %v1821_v8, %v1755_v47  ;;  %v2503_v14 = vmul.f32 %v5171_v1, %v2469_v7  ;;  %v2210_v24 = vmul.f32 %v5207_v43, %v2468_v32 }
 0x161   : > { %v1950_v18 = vadd.f32 %v1918_v33, %v1852_v13  ;;  %v2437_v49 = vadd.f32 %v2405_v42, %v2339_v12  ;;  %v2534_v35 = vadd.f32 %v2502_v58, %v2436_v30  ;;  %1698 = vst.msk [vmem:[#allocation2 + $0x169] sm:$0xff] %vm413_vm1, %v1666_v44  ;;  %v1558_v9 = vpop.f32.mrf.mxu3  ;;  %v2047_v13 = vadd.f32 %v2015_v34, %v1949_v36  ;;  %v5212_v12 = vld [vmem:[#allocation2 + $0x15a] sm:$0xff] }
 0x162   : > { %v1951_v8 = vadd.f32 %v1919_v41, %v1853_v5  ;;  %v1599_v30 = vmul.f32 %v4891_v16, %v1558_v9  ;;  %v2242_v44 = vadd.f32 %v2210_v24, %v2144_v61  ;;  %v1856_v58 = vadd.f32 %v1824_v55, %v1758_v29  ;;  %2820 = vst.msk [vmem:[#allocation2 + $0x161] sm:$0x1] %vm422_vm3, %v5761_v59 }
 0x163   : > { %v2048_v20 = vadd.f32 %v4902_v48, %v1950_v18  ;;  %v2535_v33 = vadd.f32 %v2503_v14, %v2437_v49  ;;  %v2145_v5 = vadd.f32 %v2113_v4, %v2047_v13  ;;  %v2211_v48 = vmul.f32 %v5207_v43, %v2469_v7  ;;  %v5769_v4 = vld [vmem:[#allocation15_spill] sm:$0xff] }
 0x164   : > { %v2049_v47 = vadd.f32 %v4919_v27, %v1951_v8  ;;  %v1635_v18 = vadd.f32 %v4915_v62, %v1599_v30  ;;  %v2344_v41 = vadd.f32 %v2312_v17, %v5137_v6  ;;  %v1857_v36 = vadd.f32 %v1825_v3, %v1759_v19  ;;  %v5770_v30 = vld [vmem:[#allocation14_spill] sm:$0xff] }
 0x165   : > { %v2146_v32 = vadd.f32 %v4923_v25, %v2048_v20  ;;  %v2559_v34 = vpack.c.bf16 %v2535_v33, %v2534_v35  ;;  %v2243_v61 = vadd.f32 %v2211_v48, %v2145_v5  ;;  %v1923_v29 = vmul.f32 %v5086_v28, %v4925_v0  ;;  %v5768_v20 = vld [vmem:[#allocation13_spill] sm:$0xff] }
 0x166   : > { %v2147_v49 = vadd.f32 %v4938_v57, %v2049_v47  ;;  %v1667_v27 = vmax.f32 %v1635_v18, 0.0  ;;  %v2340_v25 = vadd.f32 %v4952_v39, %v2242_v44  ;;  %v1954_v7 = vadd.f32 %v1922_v22, %v1856_v58  ;;  %v5772_v18 = vld [vmem:[#allocation16_spill] sm:$0xff] }
 0x167   : > { %v2244_v50 = vadd.f32 %v4942_v40, %v2146_v32  ;;  %3319 = vmatmul.msk.bf16.gmra.mxu1 %vm413_vm1, %v2559_v34  ;;  %v2020_v35 = vmul.f32 %v5103_v60, %v4944_v53  ;;  %v2341_v57 = vadd.f32 %v4960_v56, %v2243_v61  ;;  %v1955_v40 = vadd.f32 %v1923_v29, %v1857_v36  ;;  %v5266_v32 = vld [vmem:[#allocation2 + $0x140] sm:$0xff]  ;;  %v5773_v36 = vld [vmem:[#allocation17_spill] sm:$0xff] }
 0x168   : > { %v2245_v6 = vadd.f32 %v4948_v45, %v2147_v49  ;;  %1699 = vst.msk [vmem:[#allocation2 + $0x171] sm:$0xff] %vm413_vm1, %v1667_v27  ;;  %v2345_v19 = vadd.f32 %v5152_v10, %v5141_v23  ;;  %v2021_v55 = vmul.f32 %v5103_v60, %v5114_v11  ;;  %v2118_v3 = vmul.f32 %v5133_v21, %v5124_v54  ;;  %v5268_v5 = vld [vmem:[#allocation2 + $0x168] sm:$0xff]  ;;  %v5774_v27 = vld [vmem:[#allocation6_spill] sm:$0xff] }
 0x169   : > { %v2342_v17 = vadd.f32 %v5031_v26, %v2244_v50  ;;  %v2052_v39 = vadd.f32 %v2020_v35, %v1954_v7  ;;  %v2439_v26 = vadd.f32 %v5001_v38, %v2341_v57  ;;  %v1561_v56 = vpop.f32.mrf.mxu3  ;;  %v2119_v22 = vmul.f32 %v5133_v21, %v5126_v63  ;;  %v5274_v50 = vld [vmem:[#allocation2 + $0x139] sm:$0xff]  ;;  %2803 = vst.msk [vmem:[#allocation2 + $0x168] sm:$0x1] %vm422_vm3, %v5761_v59  ;;  %v5280_v35 = vld [vmem:[#allocation2 + $0x141] sm:$0xff] }
 0x16a   : > { %v2343_v42 = vadd.f32 %v5035_v15, %v2245_v6  ;;  %v2438_v14 = vadd.f32 %v4997_v31, %v2340_v25  ;;  %v1600_v23 = vmul.f32 %v4891_v16, %v1561_v56  ;;  %v2442_v10 = vadd.f32 %v5162_v37, %v2344_v41  ;;  %v5775_v25 = vld [vmem:[#allocation12_spill] sm:$0xff]  ;;  %v5282_v6 = vld [vmem:[#allocation2 + $0x158] sm:$0xff] }
 0x16b   : > { %v2440_v45 = vadd.f32 %v5111_v51, %v2342_v17  ;;  %v2053_v24 = vadd.f32 %v2021_v55, %v1955_v40  ;;  %v2507_v15 = vmul.f32 %v5171_v1, %v4925_v0  ;;  %v2150_v8 = vadd.f32 %v2118_v3, %v2052_v39  ;;  %v5767_v51 = vld [vmem:[#allocation11_spill] sm:$0xff]  ;;  %v5776_v17 = vld [vmem:[#allocation8_spill] sm:$0xff] }
 0x16c   : > { %v2441_v9 = vadd.f32 %v5118_v52, %v2343_v42  ;;  %v2216_v38 = vmul.f32 %v5207_v43, %v5767_v51  ;;  %v2504_v13 = vmul.f32 %v5171_v1, %v5768_v20  ;;  %v5256_v33 = vadd.f32 %v5769_v4, %v2439_v26  ;;  %v5771_v52 = vld [vmem:[#allocation10_spill] sm:$0xff]  ;;  %v5299_v42 = vld [vmem:[#allocation2 + $0x159] sm:$0xff] }
 0x16d   : > { %v1636_v31 = vadd.f32 %v4915_v62, %v1600_v23  ;;  %v5261_v37 = vmul.f32 %v5171_v1, %v5770_v30  ;;  %v2538_v44 = vadd.f32 %v5771_v52, %v2440_v45  ;;  %v2151_v0 = vadd.f32 %v2119_v22, %v2053_v24  ;;  %v5286_v40 = vld [vmem:[#allocation2 + $0x151] sm:$0xff] }
 0x16e   : > { %v2539_v58 = vadd.f32 %v2507_v15, %v2441_v9  ;;  %v2217_v47 = vmul.f32 %v5207_v43, %v5770_v30  ;;  %v2536_v48 = vadd.f32 %v2504_v13, %v2438_v14  ;;  %v2443_v41 = vadd.f32 %v5772_v18, %v2345_v19  ;;  %v5291_v19 = vld [vmem:[%s5685_s7] ss:$0 sm:$0xff]  ;;  %v5777_v45 = vld [vmem:[#allocation7_spill] sm:$0xff] }
 0x16f   : > { %v1668_v34 = vmax.f32 %v1636_v31, 0.0  ;;  %v5272_v49 = vadd.f32 %v5773_v36, %v2442_v10  ;;  %v2248_v29 = vadd.f32 %v2216_v38, %v2150_v8  ;;  %v2314_v7 = vmul.f32 %v5775_v25, %v5774_v27  ;;  %v5303_v56 = vld [vmem:[#allocation2 + $0x152] sm:$0xff]  ;;  %v5317_v15 = vld [vmem:[%s5686_s8] ss:$0 sm:$0xff] }
 0x170   : > { %v2561_v61 = vpack.c.bf16 %v2539_v58, %v2538_v44  ;;  %v1764_v57 = vmul.f32 %v5776_v17, %v5193_v2  ;;  %v2560_v55 = vpack.c.bf16 %v5256_v33, %v2536_v48  ;;  %v2315_v39 = vmul.f32 %v5775_v25, %v5266_v32  ;;  %v5312_v9 = vld [vmem:[#allocation2 + $0x172] sm:$0xff]  ;;  %v5332_v58 = vld [vmem:[#allocation2 + $0x169] sm:$0xff] }
 0x171   : > { %1700 = vst.msk [vmem:[#allocation2 + $0x181] sm:$0xff] %vm413_vm1, %v1668_v34  ;;  %v1765_v3 = vmul.f32 %v5776_v17, %v5282_v6  ;;  %v1830_v26 = vmul.f32 %v5777_v45, %v5286_v40  ;;  %v1563_v22 = vpop.f32.mrf.mxu3  ;;  %v2249_v14 = vadd.f32 %v2217_v47, %v2151_v0  ;;  %v1831_v23 = vmul.f32 %v5777_v45, %v5299_v42  ;;  %v5322_v13 = vld [vmem:[#allocation2 + $0x170] sm:$0xff] }
 0x172   : > { %3321 = vmatmul.msk.bf16.vlgmr.msra.gmra.mxu2 %vm413_vm1, %v2561_v61  ;;  %v1928_v10 = vmul.f32 %v5086_v28, %v5303_v56  ;;  %v1929_v24 = vmul.f32 %v5086_v28, %v5212_v12  ;;  %5778 = vst [vmem:[#allocation11_spill] sm:$0xff] %v5312_v9  ;;  %v1601_v8 = vmul.f32 %v4891_v16, %v1563_v22  ;;  %v5336_v34 = vld [vmem:[#allocation2 + $0x171] sm:$0xff]  ;;  %v5340_v61 = vld [vmem:[#allocation2 + $0x13a] sm:$0xff] }
 0x173   : > { %v2412_v38 = vmul.f32 %v5158_v46, %v5274_v50  ;;  %v1862_v20 = vadd.f32 %v1830_v26, %v1764_v57  ;;  %v2026_v4 = vmul.f32 %v5103_v60, %v5268_v5  ;;  %2821 = vst.msk [vmem:[#allocation2 + $0x179] sm:$0x1] %vm422_vm3, %v5761_v59  ;;  %v2630_v33 = vpop.f32.mrf.mxu1  ;;  %v2346_v31 = vadd.f32 %v2314_v7, %v2248_v29  ;;  %v5344_v57 = vld [vmem:[#allocation2 + $0x16a] sm:$0xff] }
 0x174   : > { %v2413_v52 = vmul.f32 %v5158_v46, %v5280_v35  ;;  %v1863_v44 = vadd.f32 %v1831_v23, %v1765_v3  ;;  %v2027_v16 = vmul.f32 %v5103_v60, %v5322_v13  ;;  %v2714_v0 = vmul.f32 %v5291_v19, %v2630_v33  ;;  %5779 = vst [vmem:[#allocation13_spill] sm:$0xff] %v5344_v57  ;;  %v5780_v33 = vld [vmem:[#allocation9_spill] sm:$0xff] }
 0x175   : > { %v1637_v47 = vadd.f32 %v4915_v62, %v1601_v8  ;;  %v1960_v48 = vadd.f32 %v1928_v10, %v1862_v20  ;;  %v2124_v18 = vmul.f32 %v5133_v21, %v5332_v58  ;;  %v2347_v36 = vadd.f32 %v2315_v39, %v2249_v14 }
 0x176   : > { %v1961_v29 = vadd.f32 %v1929_v24, %v1863_v44  ;;  %v2125_v7 = vmul.f32 %v5133_v21, %v5336_v34  ;;  %v1760_v3 = vmul.f32 %v5776_v17, %v4944_v53  ;;  %v2750_v62 = vadd.f32 %v5317_v15, %v2714_v0 }
 0x177   : > { %3320 = vmatmul.msk.bf16.gmra.mxu1 %vm413_vm1, %v2560_v55  ;;  %v1669_v26 = vmax.f32 %v1637_v47, 0.0  ;;  %v2058_v22 = vadd.f32 %v2026_v4, %v1960_v48  ;;  %v2222_v39 = vmul.f32 %v5207_v43, %v5344_v57  ;;  %v1761_v10 = vmul.f32 %v5776_v17, %v5114_v11 }
 0x178   : > { %v2059_v14 = vadd.f32 %v2027_v16, %v1961_v29  ;;  %v5352_v23 = vld [vmem:[#allocation2 + $0x180] sm:$0xff]  ;;  %v1826_v24 = vmul.f32 %v5777_v45, %v5124_v54  ;;  %v1827_v53 = vmul.f32 %v5777_v45, %v5126_v63  ;;  %2824 = vst.msk [vmem:[#allocation2 + $0x19] sm:$0xff] %vm413_vm1, %v2750_v62  ;;  %v2541_v55 = vadd.f32 %v5261_v37, %v2443_v41 }
 0x179   : > { %v2510_v8 = vmul.f32 %v5171_v1, %v5340_v61  ;;  %v2156_v20 = vadd.f32 %v2124_v18, %v2058_v22  ;;  %v1924_v4 = vmul.f32 %v5086_v28, %v5767_v51  ;;  %1701 = vst.msk [vmem:[#allocation2 + $0x189] sm:$0xff] %vm413_vm1, %v1669_v26  ;;  %v2444_v11 = vadd.f32 %v2412_v38, %v2346_v31  ;;  %v2384_v37 = vld [vmem:[#allocation2 + $0x181] sm:$0xff] }
 0x17a   : > { %v2511_v54 = vmul.f32 %v5171_v1, %v5780_v33  ;;  %v2320_v63 = vmul.f32 %v5775_v25, %v5352_v23  ;;  %v1858_v44 = vadd.f32 %v1826_v24, %v1760_v3  ;;  %v2445_v16 = vadd.f32 %v2413_v52, %v2347_v36  ;;  %2804 = vst.msk [vmem:[#allocation2 + $0x180] sm:$0x1] %vm422_vm3, %v5761_v59 }
 0x17b   : > { %v2254_v0 = vadd.f32 %v2222_v39, %v2156_v20  ;;  %v1859_v41 = vadd.f32 %v1827_v53, %v1761_v10  ;;  %v1925_v47 = vmul.f32 %v5086_v28, %v5770_v30  ;;  %v2632_v51 = vpop.f32.mrf.mxu1  ;;  %v2157_v48 = vadd.f32 %v2125_v7, %v2059_v14 }
 0x17c   : > { %v2223_v38 = vmul.f32 %v5207_v43, %v5312_v9  ;;  %v1956_v31 = vadd.f32 %v1924_v4, %v1858_v44  ;;  %v2022_v18 = vmul.f32 %v5103_v60, %v5774_v27  ;;  %v2715_v52 = vmul.f32 %v5291_v19, %v2632_v51 }
 0x17d   : > { %v2562_v36 = vpack.c.bf16 %v2541_v55, %v5272_v49  ;;  %v5381_v29 = vadd.f32 %v2510_v8, %v2444_v11  ;;  %v2352_v3 = vadd.f32 %v2320_v63, %v2254_v0  ;;  %v2418_v30 = vmul.f32 %v5158_v46, %v2384_v37 }
 0x17e   : > { %v2751_v62 = vadd.f32 %v5317_v15, %v2715_v52  ;;  %v5385_v26 = vadd.f32 %v2511_v54, %v2445_v16  ;;  %v1957_v7 = vadd.f32 %v1925_v47, %v1859_v41  ;;  %v2023_v22 = vmul.f32 %v5103_v60, %v5266_v32 }
 0x17f   : > { %v2255_v39 = vadd.f32 %v2223_v38, %v2157_v48  ;;  %v2054_v14 = vadd.f32 %v2022_v18, %v1956_v31  ;;  %v2120_v10 = vmul.f32 %v5133_v21, %v5274_v50  ;;  %v2121_v49 = vmul.f32 %v5133_v21, %v5280_v35 }
 0x180   : > { %2825 = vst.msk [vmem:[#allocation2 + $0x21] sm:$0xff] %vm413_vm1, %v2751_v62  ;;  %v2287_v24 = vld [vmem:[#allocation2 + $0x188] sm:$0xff]  ;;  %v1766_v8 = vmul.f32 %v5776_v17, %v5268_v5  ;;  %v1767_v20 = vmul.f32 %v5776_v17, %v5322_v13  ;;  %v1832_v4 = vmul.f32 %v5777_v45, %v5332_v58  ;;  %v1833_v11 = vmul.f32 %v5777_v45, %v5336_v34 }
 0x181   : > { %v2385_v53 = vld [vmem:[#allocation2 + $0x189] sm:$0xff]  ;;  %v2321_v54 = vmul.f32 %v5775_v25, %v2287_v24  ;;  %v2450_v44 = vadd.f32 %v2418_v30, %v2352_v3  ;;  %v2055_v41 = vadd.f32 %v2023_v22, %v1957_v7  ;;  %v2218_v47 = vmul.f32 %v5207_v43, %v5340_v61 }
 0x182   : > { %v2482_v55 = vld [vmem:[#allocation2 + $0x182] sm:$0xff]  ;;  %3322 = vmatmul.msk.bf16.gmra.mxu2 %vm413_vm1, %v2562_v36  ;;  %v2419_v63 = vmul.f32 %v5158_v46, %v2385_v53  ;;  %v2483_v16 = vld [vmem:[#allocation2 + $0x18a] sm:$0xff]  ;;  %v1864_v51 = vadd.f32 %v1832_v4, %v1766_v8  ;;  %v1865_v48 = vadd.f32 %v1833_v11, %v1767_v20  ;;  %v2219_v52 = vmul.f32 %v5207_v43, %v5780_v33 }
 0x183   : > { %v2516_v0 = vmul.f32 %v5171_v1, %v2482_v55  ;;  %2822 = vst.msk [vmem:[#allocation2 + $0x191] sm:$0x1] %vm422_vm3, %v5761_v59  ;;  %v2635_v38 = vpop.f32.mrf.mxu1  ;;  %v2353_v31 = vadd.f32 %v2321_v54, %v2255_v39  ;;  %v2517_v18 = vmul.f32 %v5171_v1, %v2483_v16  ;;  %v1930_v36 = vmul.f32 %v5086_v28, %v5344_v57 }
 0x184   : > { %v2716_v3 = vmul.f32 %v5291_v19, %v2635_v38  ;;  %v2152_v30 = vadd.f32 %v2120_v10, %v2054_v14  ;;  %v1931_v62 = vmul.f32 %v5086_v28, %v5312_v9  ;;  %v2028_v7 = vmul.f32 %v5103_v60, %v5352_v23 }
 0x185   : > { %v2451_v22 = vadd.f32 %v2419_v63, %v2353_v31  ;;  %v2548_v8 = vadd.f32 %v2516_v0, %v2450_v44  ;;  %v1962_v39 = vadd.f32 %v1930_v36, %v1864_v51  ;;  %v2029_v20 = vmul.f32 %v5103_v60, %v2287_v24  ;;  %v2288_v44 = vld [vmem:[#allocation2 + $0x198] sm:$0xff]  ;;  %v2289_v0 = vld [vmem:[#allocation2 + $0x1a0] sm:$0xff] }
 0x186   : > { %v2752_v4 = vadd.f32 %v5317_v15, %v2716_v3  ;;  %v2153_v11 = vadd.f32 %v2121_v49, %v2055_v41  ;;  %v1963_v54 = vadd.f32 %v1931_v62, %v1865_v48  ;;  %v2126_v57 = vmul.f32 %v5133_v21, %v2384_v37  ;;  %v2386_v37 = vld [vmem:[#allocation2 + $0x199] sm:$0xff]  ;;  %v2387_v51 = vld [vmem:[#allocation2 + $0x1a1] sm:$0xff] }
 0x187   : > { %v2563_v14 = vpack.c.bf16 %v5385_v26, %v5381_v29  ;;  %v2549_v10 = vadd.f32 %v2517_v18, %v2451_v22  ;;  %v2060_v38 = vadd.f32 %v2028_v7, %v1962_v39  ;;  %v2127_v9 = vmul.f32 %v5133_v21, %v2385_v53  ;;  %v2484_v48 = vld [vmem:[#allocation2 + $0x19a] sm:$0xff] }
 0x188   : > { %2826 = vst.msk [vmem:[#allocation2 + $0x31] sm:$0xff] %vm413_vm1, %v2752_v4  ;;  %v2316_v23 = vmul.f32 %v5775_v25, %v5193_v2  ;;  %v2061_v63 = vadd.f32 %v2029_v20, %v1963_v54  ;;  %v2224_v24 = vmul.f32 %v5207_v43, %v2482_v55  ;;  %v2225_v49 = vmul.f32 %v5207_v43, %v2483_v16  ;;  %v2485_v55 = vld [vmem:[#allocation2 + $0x1a2] sm:$0xff] }
 0x189   : > { %v2566_v41 = vpack.c.bf16 %v2549_v10, %v2548_v8  ;;  %v2317_v29 = vmul.f32 %v5775_v25, %v5282_v6  ;;  %v2158_v26 = vadd.f32 %v2126_v57, %v2060_v38  ;;  %v2322_v53 = vmul.f32 %v5775_v25, %v2288_v44  ;;  %2785 = vst.msk [vmem:[#allocation2 + $0x198] sm:$0xff] %vm413_vm1, %v5761_v59 }
 0x18a   : > { %v2250_v31 = vadd.f32 %v2218_v47, %v2152_v30  ;;  %v2251_v18 = vadd.f32 %v2219_v52, %v2153_v11  ;;  %v2159_v36 = vadd.f32 %v2127_v9, %v2061_v63  ;;  %v2323_v3 = vmul.f32 %v5775_v25, %v2289_v0  ;;  %2786 = vst.msk [vmem:[#allocation2 + $0x1a0] sm:$0xff] %vm413_vm1, %v5761_v59 }
 0x18b   : > { %v2637_v16 = vpop.f32.mrf.mxu1  ;;  %3326 = vmatmul.msk.bf16.vlgmr.msrb.gmra.mxu3 %vm413_vm1, %v2566_v41  ;;  %v2256_v62 = vadd.f32 %v2224_v24, %v2158_v26  ;;  %v2420_v7 = vmul.f32 %v5158_v46, %v2386_v37  ;;  %v2421_v57 = vmul.f32 %v5158_v46, %v2387_v51  ;;  %2787 = vst.msk [vmem:[#allocation2 + $0x1a8] sm:$0x3] %vm416_vm2, %v5761_v59 }
 0x18c   : > { %v2717_v47 = vmul.f32 %v5291_v19, %v2637_v16  ;;  %v2257_v9 = vadd.f32 %v2225_v49, %v2159_v36  ;;  %v1762_v52 = vmul.f32 %v5776_v17, %v5774_v27  ;;  %v1763_v30 = vmul.f32 %v5776_v17, %v5266_v32  ;;  %2805 = vst.msk [vmem:[#allocation2 + $0x198] sm:$0x1] %vm422_vm3, %v5761_v59 }
 0x18d   : > { %v2354_v22 = vadd.f32 %v2322_v53, %v2256_v62  ;;  %v2518_v8 = vmul.f32 %v5171_v1, %v2484_v48  ;;  %v1828_v39 = vmul.f32 %v5777_v45, %v5274_v50  ;;  %v1829_v20 = vmul.f32 %v5777_v45, %v5280_v35  ;;  %2823 = vst.msk [vmem:[#allocation2 + $0x1a9] sm:$0x1] %vm422_vm3, %v5761_v59 }
 0x18e   : > { %v2753_v4 = vadd.f32 %v5317_v15, %v2717_v47  ;;  %v2355_v11 = vadd.f32 %v2323_v3, %v2257_v9  ;;  %v2519_v27 = vmul.f32 %v5171_v1, %v2485_v55  ;;  %v1926_v32 = vmul.f32 %v5086_v28, %v5340_v61 }
 0x18f   : > { %v2452_v17 = vadd.f32 %v2420_v7, %v2354_v22  ;;  %v1860_v54 = vadd.f32 %v1828_v39, %v1762_v52  ;;  %v1861_v10 = vadd.f32 %v1829_v20, %v1763_v30  ;;  %v1927_v50 = vmul.f32 %v5086_v28, %v5780_v33  ;;  %v5782_v39 = vld [vmem:[#allocation11_spill] sm:$0xff] }
 0x190   : > { %2827 = vst.msk [vmem:[#allocation2 + $0x39] sm:$0xff] %vm413_vm1, %v2753_v4  ;;  %v2453_v35 = vadd.f32 %v2421_v57, %v2355_v11  ;;  %v2414_v45 = vmul.f32 %v5158_v46, %v5286_v40  ;;  %v2415_v59 = vmul.f32 %v5158_v46, %v5299_v42  ;;  %v2348_v38 = vadd.f32 %v2316_v23, %v2250_v31 }
 0x191   : > { %v2349_v63 = vadd.f32 %v2317_v29, %v2251_v18  ;;  %v2024_v61 = vmul.f32 %v5103_v60, %v5193_v2  ;;  %v2025_v24 = vmul.f32 %v5103_v60, %v5282_v6  ;;  %v2550_v33 = vadd.f32 %v2518_v8, %v2452_v17 }
 0x192   : > { %3323 = vmatmul.msk.bf16.gmra.mxu2 %vm413_vm1, %v2563_v14  ;;  %v2551_v49 = vadd.f32 %v2519_v27, %v2453_v35  ;;  %v1958_v44 = vadd.f32 %v1926_v32, %v1860_v54  ;;  %v1959_v0 = vadd.f32 %v1927_v50, %v1861_v10  ;;  %v2512_v37 = vmul.f32 %v5171_v1, %v5303_v56  ;;  %v3061_v54 = vld [vmem:[%s3639_s29] ss:$2 sm:$0xff] }
 0x193   : > { %v2513_v23 = vmul.f32 %v5171_v1, %v5212_v12  ;;  %v2446_v29 = vadd.f32 %v2414_v45, %v2348_v38  ;;  %v2447_v2 = vadd.f32 %v2415_v59, %v2349_v63  ;;  %v2122_v60 = vmul.f32 %v5133_v21, %v5286_v40  ;;  %v3328_v10 = vld [vmem:[%s3639_s29 + $0x20] ss:$2 sm:$0xff] }
 0x194   : > { %v2640_v28 = vpop.f32.mrf.mxu1  ;;  %v2567_v6 = vpack.c.bf16 %v2551_v49, %v2550_v33  ;;  %v2056_v26 = vadd.f32 %v2024_v61, %v1958_v44  ;;  %v2057_v53 = vadd.f32 %v2025_v24, %v1959_v0  ;;  %v2123_v51 = vmul.f32 %v5133_v21, %v5299_v42  ;;  %v3329_v24 = vld [vmem:[%s3639_s29 + $0x40] ss:$2 sm:$0xff] }
 0x195   : > { %v2718_v14 = vmul.f32 %v5291_v19, %v2640_v28  ;;  %v2544_v48 = vadd.f32 %v2512_v37, %v2446_v29  ;;  %v2545_v31 = vadd.f32 %v2513_v23, %v2447_v2  ;;  %v2220_v55 = vmul.f32 %v5207_v43, %v5303_v56  ;;  %v3330_v28 = vld [vmem:[%s3639_s29 + $0x60] ss:$2 sm:$0xff] }
 0x196   : > { %v2154_v36 = vadd.f32 %v2122_v60, %v2056_v26  ;;  %v2155_v3 = vadd.f32 %v2123_v51, %v2057_v53  ;;  %v2221_v40 = vmul.f32 %v5207_v43, %v5212_v12  ;;  %v2318_v57 = vmul.f32 %v5775_v25, %v5268_v5  ;;  %v3332_v29 = vld [vmem:[%s3639_s29 + $0xa0] ss:$2 sm:$0xff] }
 0x197   : > { %v2754_v41 = vadd.f32 %v5317_v15, %v2718_v14  ;;  %v2564_v21 = vpack.c.bf16 %v2545_v31, %v2544_v48  ;;  %v2319_v47 = vmul.f32 %v5775_v25, %v5322_v13  ;;  %v2416_v12 = vmul.f32 %v5158_v46, %v5332_v58  ;;  %v5781_v25 = vld [vmem:[#allocation13_spill] sm:$0xff] }
 0x198   : > { %v2252_v42 = vadd.f32 %v2220_v55, %v2154_v36  ;;  %v2253_v7 = vadd.f32 %v2221_v40, %v2155_v3  ;;  %v2417_v52 = vmul.f32 %v5158_v46, %v5336_v34  ;;  %v2514_v13 = vmul.f32 %v5171_v1, %v5781_v25  ;;  %v3333_v31 = vld [vmem:[%s3639_s29 + $0xc0] ss:$2 sm:$0xff] }
 0x199   : > { %2828 = vst.msk [vmem:[#allocation2 + $0x49] sm:$0xff] %vm413_vm1, %v2754_v41  ;;  %v2515_v20 = vmul.f32 %v5171_v1, %v5782_v39  ;;  %v3076_v45 = vpack.c.bf16 %v3328_v10, %v3061_v54  ;;  %v3077_v44 = vpack.c.bf16 %v3330_v28, %v3329_v24  ;;  %v3331_v41 = vld [vmem:[%s3639_s29 + $0x80] ss:$2 sm:$0xff] }
 0x19a   : > { %v2350_v9 = vadd.f32 %v2318_v57, %v2252_v42  ;;  %v2351_v43 = vadd.f32 %v2319_v47, %v2253_v7  ;;  %v2856_v28 = vld [vmem:[#allocation2] ss:$2 sm:$0xff] }
 0x19b   : > { %3327 = vmatmul.msk.bf16.gmra.mxu3 %vm413_vm1, %v2567_v6  ;;  %v3078_v6 = vpack.c.bf16 %v3332_v29, %v3331_v41  ;;  %v2919_v41 = vld [vmem:[#allocation2 + $0x18] ss:$2 sm:$0xff] }
 0x19c   : > { %v2642_v18 = vpop.f32.mrf.mxu1  ;;  %v2448_v22 = vadd.f32 %v2416_v12, %v2350_v9  ;;  %v2449_v8 = vadd.f32 %v2417_v52, %v2351_v43 }
 0x19d   : > { %v2719_v16 = vmul.f32 %v5291_v19, %v2642_v18  ;;  %v3334_v18 = vld [vmem:[%s3639_s29 + $0xe0] ss:$2 sm:$0xff] }
 0x19e   : > { %v2546_v4 = vadd.f32 %v2514_v13, %v2448_v22  ;;  %v2547_v11 = vadd.f32 %v2515_v20, %v2449_v8  ;;  %v3079_v55 = vpack.c.bf16 %v3334_v18, %v3333_v31  ;;  %v2898_v18 = vld [vmem:[#allocation2 + $0x32] ss:$2 sm:$0xff] }
 0x19f   : > { %v2755_v62 = vadd.f32 %v5317_v15, %v2719_v16 }
 0x1a0   : > { %v2565_v27 = vpack.c.bf16 %v2547_v11, %v2546_v4 }
 0x1a1   : > { %2829 = vst.msk [vmem:[#allocation2 + $0x51] sm:$0xff] %vm413_vm1, %v2755_v62 }
 0x1a2   : > { %3324 = vmatmul.msk.bf16.gmra.mxu2 %vm413_vm1, %v2564_v21 }
 0x1a4   : > { %v2645_v56 = vpop.f32.mrf.mxu1 }
 0x1a5   : > { %v2720_v30 = vmul.f32 %v5291_v19, %v2645_v56 }
 0x1a7   : > { %v2756_v5 = vadd.f32 %v5317_v15, %v2720_v30 }
 0x1a9   : > { %2830 = vst.msk [vmem:[#allocation2 + $0x61] sm:$0xff] %vm413_vm1, %v2756_v5 }
 0x1ac   : > { %v2647_v58 = vpop.f32.mrf.mxu1 }
 0x1ad   : > { %v2721_v46 = vmul.f32 %v5291_v19, %v2647_v58 }
 0x1af   : > { %v2757_v34 = vadd.f32 %v5317_v15, %v2721_v46 }
 0x1b1   : > { %2831 = vst.msk [vmem:[#allocation2 + $0x69] sm:$0xff] %vm413_vm1, %v2757_v34 }
 0x1b2   : > { %3325 = vmatmul.msk.bf16.gmra.mxu2 %vm413_vm1, %v2565_v27 }
 0x1b4   : > { %v2650_v32 = vpop.f32.mrf.mxu1 }
 0x1b5   : > { %v2722_v17 = vmul.f32 %v5291_v19, %v2650_v32 }
 0x1b7   : > { %v2758_v1 = vadd.f32 %v5317_v15, %v2722_v17 }
 0x1b9   : > { %2832 = vst.msk [vmem:[#allocation2 + $0x79] sm:$0xff] %vm413_vm1, %v2758_v1 }
 0x1bc   : > { %v2652_v50 = vpop.f32.mrf.mxu1 }
 0x1bd   : > { %v2723_v35 = vmul.f32 %v5291_v19, %v2652_v50 }
 0x1bf   : > { %v2759_v59 = vadd.f32 %v5317_v15, %v2723_v35 }
 0x1c1   : > { %2833 = vst.msk [vmem:[#allocation2 + $0x81] sm:$0xff] %vm413_vm1, %v2759_v59 }
 0x1c2   : > { %3335 = vmatmul.msk.bf16.vlgmr.msrb.gmra.mxu2 %vm524_vm4, %v3076_v45 }
 0x1c4   : > { %v2655_v38 = vpop.f32.mrf.mxu1 }
 0x1c5   : > { %v2724_v63 = vmul.f32 %v5291_v19, %v2655_v38 }
 0x1c7   : > { %v2760_v61 = vadd.f32 %v5317_v15, %v2724_v63 }
 0x1c9   : > { %2834 = vst.msk [vmem:[#allocation2 + $0x91] sm:$0xff] %vm413_vm1, %v2760_v61 }
 0x1cc   : > { %v2657_v33 = vpop.f32.mrf.mxu1 }
 0x1cd   : > { %v2725_v49 = vmul.f32 %v5291_v19, %v2657_v33  ;;  %v2872_v33 = vld [vmem:[#allocation2 + $0x1] ss:$2 sm:$0xff] }
 0x1cf   : > { %v2761_v0 = vadd.f32 %v5317_v15, %v2725_v49 }
 0x1d1   : > { %2835 = vst.msk [vmem:[#allocation2 + $0x99] sm:$0xff] %vm413_vm1, %v2761_v0  ;;  %v2887_v0 = vmax.f32 %v2856_v28, %v2872_v33 }
 0x1d2   : > { %3336 = vmatmul.msk.bf16.gmra.mxu2 %vm524_vm4, %v3077_v44 }
 0x1d4   : > { %v2660_v14 = vpop.f32.mrf.mxu1 }
 0x1d5   : > { %v2726_v37 = vmul.f32 %v5291_v19, %v2660_v14  ;;  %v2896_v14 = vld [vmem:[#allocation2 + $0x2] ss:$2 sm:$0xff] }
 0x1d7   : > { %v2762_v23 = vadd.f32 %v5317_v15, %v2726_v37 }
 0x1d8   : > { %v2994_v28 = vld [vmem:[#allocation2 + $0x90] ss:$2 sm:$0xff] }
 0x1d9   : > { %2836 = vst.msk [vmem:[#allocation2 + $0xa9] sm:$0xff] %vm413_vm1, %v2762_v23  ;;  %v2911_v23 = vmax.f32 %v2887_v0, %v2896_v14 }
 0x1dc   : > { %v2662_v2 = vpop.f32.mrf.mxu1 }
 0x1dd   : > { %v2727_v60 = vmul.f32 %v5291_v19, %v2662_v2  ;;  %v2858_v2 = vld [vmem:[#allocation2 + $0x30] ss:$2 sm:$0xff] }
 0x1df   : > { %v2763_v26 = vadd.f32 %v5317_v15, %v2727_v60  ;;  %v2874_v60 = vld [vmem:[#allocation2 + $0x31] ss:$2 sm:$0xff] }
 0x1e1   : > { %2837 = vst.msk [vmem:[#allocation2 + $0xb1] sm:$0xff] %vm413_vm1, %v2763_v26  ;;  %v2934_v26 = vmax.f32 %v2911_v23, %v2919_v41  ;;  %v3040_v23 = vld [vmem:[#allocation2 + $0x62] ss:$2 sm:$0xff] }
 0x1e2   : > { %3337 = vmatmul.msk.bf16.gmra.mxu2 %vm524_vm4, %v3078_v6 }
 0x1e4   : > { %v2665_v53 = vpop.f32.mrf.mxu1 }
 0x1e5   : > { %v2728_v51 = vmul.f32 %v5291_v19, %v2665_v53 }
 0x1e7   : > { %v2764_v48 = vadd.f32 %v5317_v15, %v2728_v51  ;;  %v2888_v51 = vmax.f32 %v2858_v2, %v2874_v60 }
 0x1e8   : > { %v2949_v60 = vld [vmem:[#allocation2 + $0xa9] ss:$2 sm:$0xff] }
 0x1e9   : > { %2838 = vst.msk [vmem:[#allocation2 + $0xc1] sm:$0xff] %vm413_vm1, %v2764_v48  ;;  %v2943_v48 = vld [vmem:[#allocation2 + $0x19] ss:$2 sm:$0xff] }
 0x1ea   : > { %v2958_v31 = vmax.f32 %v2934_v26, %v2943_v48 }
 0x1ec   : > { %v2667_v36 = vpop.f32.mrf.mxu1 }
 0x1ed   : > { %v2729_v3 = vmul.f32 %v5291_v19, %v2667_v36  ;;  %v2921_v36 = vld [vmem:[#allocation2 + $0x48] ss:$2 sm:$0xff] }
 0x1ef   : > { %v2765_v40 = vadd.f32 %v5317_v15, %v2729_v3  ;;  %v2912_v3 = vmax.f32 %v2888_v51, %v2898_v18  ;;  %v3018_v51 = vld [vmem:[#allocation2 + $0x91] ss:$2 sm:$0xff] }
 0x1f1   : > { %2839 = vst.msk [vmem:[#allocation2 + $0xc9] sm:$0xff] %vm413_vm1, %v2765_v40  ;;  %v2876_v40 = vld [vmem:[#allocation2 + $0x61] ss:$2 sm:$0xff] }
 0x1f2   : > { %3338 = vmatmul.msk.bf16.gmra.mxu2 %vm524_vm4, %v3079_v55  ;;  %v2860_v55 = vld [vmem:[#allocation2 + $0x60] ss:$2 sm:$0xff] }
 0x1f4   : > { %v2670_v16 = vpop.f32.mrf.mxu1 }
 0x1f5   : > { %v2730_v62 = vmul.f32 %v5291_v19, %v2670_v16  ;;  %v2675_v21 = vpop.f32.mrf.mxu2 }
 0x1f6   : > { %v2732_v42 = vmul.f32 %v5291_v19, %v2675_v21  ;;  %v2990_v21 = vld [vmem:[#allocation2 + $0x30] ss:$2 sm:$0xff] }
 0x1f7   : > { %v2766_v7 = vadd.f32 %v5317_v15, %v2730_v62  ;;  %v2967_v62 = vld [vmem:[#allocation2 + $0x1a] ss:$2 sm:$0xff] }
 0x1f8   : > { %v2768_v57 = vadd.f32 %v5317_v15, %v2732_v42 }
 0x1f9   : > { %2840 = vst.msk [vmem:[#allocation2 + $0xd9] sm:$0xff] %vm413_vm1, %v2766_v7  ;;  %v2982_v7 = vmax.f32 %v2958_v31, %v2967_v62 }
 0x1fa   : > { %2842 = vst.msk [vmem:[#allocation2 + $0xf1] sm:$0xff] %vm413_vm1, %v2768_v57  ;;  %v2935_v57 = vmax.f32 %v2912_v3, %v2921_v36  ;;  %v2973_v36 = vld [vmem:[#allocation2 + $0xaa] ss:$2 sm:$0xff] }
 0x1fc   : > { %v2672_v47 = vpop.f32.mrf.mxu1 }
 0x1fd   : > { %v2731_v56 = vmul.f32 %v5291_v19, %v2672_v47  ;;  %v2677_v9 = vpop.f32.mrf.mxu2  ;;  %v2889_v47 = vmax.f32 %v2860_v55, %v2876_v40  ;;  %v2996_v40 = vld [vmem:[#allocation2 + $0xc0] ss:$2 sm:$0xff] }
 0x1fe   : > { %v2733_v43 = vmul.f32 %v5291_v19, %v2677_v9  ;;  %v3005_v9 = vmax.f32 %v2982_v7, %v2990_v21  ;;  %v3042_v21 = vld [vmem:[#allocation2 + $0x92] ss:$2 sm:$0xff] }
 0x1ff   : > { %v2767_v12 = vadd.f32 %v5317_v15, %v2731_v56 }
 0x200   : > { %v2769_v52 = vadd.f32 %v5317_v15, %v2733_v43  ;;  %v2945_v43 = vld [vmem:[#allocation2 + $0x49] ss:$2 sm:$0xff] }
 0x201   : > { %2841 = vst.msk [vmem:[#allocation2 + $0xe1] sm:$0xff] %vm413_vm1, %v2767_v12  ;;  %v2900_v12 = vld [vmem:[#allocation2 + $0x62] ss:$2 sm:$0xff] }
 0x202   : > { %2843 = vst.msk [vmem:[#allocation2 + $0xf9] sm:$0xff] %vm413_vm1, %v2769_v52  ;;  %v5600_v52 = vld [vmem:[%s5688_s10] ss:$0 sm:$0xff] }
 0x205   : > { %v2680_v30 = vpop.f32.mrf.mxu2 }
 0x206   : > { %v2734_v5 = vmul.f32 %v5291_v19, %v2680_v30  ;;  %v2959_v30 = vmax.f32 %v2935_v57, %v2945_v43 }
 0x208   : > { %v2770_v22 = vadd.f32 %v5317_v15, %v2734_v5  ;;  %v2923_v5 = vld [vmem:[#allocation2 + $0x78] ss:$2 sm:$0xff] }
 0x209   : > { %v2927_v26 = vld [vmem:[#allocation2 + $0xd8] ss:$2 sm:$0xff]  ;;  %v2882_v62 = vld [vmem:[#allocation2 + $0xf1] ss:$2 sm:$0xff] }
 0x20a   : > { %2844 = vst.msk [vmem:[#allocation2 + $0x109] sm:$0xff] %vm413_vm1, %v2770_v22  ;;  %v2913_v22 = vmax.f32 %v2889_v47, %v2900_v12  ;;  %v2951_v47 = vld [vmem:[#allocation2 + $0xd9] ss:$2 sm:$0xff] }
 0x20d   : > { %v2682_v8 = vpop.f32.mrf.mxu2 }
 0x20e   : > { %v2735_v25 = vmul.f32 %v5291_v19, %v2682_v8  ;;  %v2700_v13 = vpop.f32.mrf.mxu3 }
 0x20f   : > { %v2742_v20 = vmul.f32 %v5291_v19, %v2700_v13 }
 0x210   : > { %v2771_v39 = vadd.f32 %v5317_v15, %v2735_v25  ;;  %v2969_v25 = vld [vmem:[#allocation2 + $0x4a] ss:$2 sm:$0xff] }
 0x211   : > { %v2778_v58 = vadd.f32 %v5317_v15, %v2742_v20  ;;  %v2936_v20 = vmax.f32 %v2913_v22, %v2923_v5  ;;  %v3020_v5 = vld [vmem:[#allocation2 + $0xc1] ss:$2 sm:$0xff]  ;;  %v2906_v22 = vld [vmem:[#allocation2 + $0xf2] ss:$2 sm:$0xff] }
 0x212   : > { %2845 = vst.msk [vmem:[#allocation2 + $0x111] sm:$0xff] %vm413_vm1, %v2771_v39  ;;  %v2992_v39 = vld [vmem:[#allocation2 + $0x60] ss:$2 sm:$0xff] }
 0x213   : > { %2852 = vst.msk [vmem:[#allocation2 + $0x169] sm:$0xff] %vm413_vm1, %v2778_v58  ;;  %v2862_v58 = vld [vmem:[#allocation2 + $0x90] ss:$2 sm:$0xff] }
 0x215   : > { %v2685_v4 = vpop.f32.mrf.mxu2 }
 0x216   : > { %v2736_v11 = vmul.f32 %v5291_v19, %v2685_v4  ;;  %v2702_v46 = vpop.f32.mrf.mxu3  ;;  %v2878_v4 = vld [vmem:[#allocation2 + $0x91] ss:$2 sm:$0xff] }
 0x217   : > { %v2743_v27 = vmul.f32 %v5291_v19, %v2702_v46  ;;  %v2983_v46 = vmax.f32 %v2959_v30, %v2969_v25 }
 0x218   : > { %v2772_v34 = vadd.f32 %v5317_v15, %v2736_v11 }
 0x219   : > { %v2779_v32 = vadd.f32 %v5317_v15, %v2743_v27 }
 0x21a   : > { %2846 = vst.msk [vmem:[#allocation2 + $0x121] sm:$0xff] %vm413_vm1, %v2772_v34  ;;  %v3038_v34 = vld [vmem:[#allocation2 + $0x32] ss:$2 sm:$0xff] }
 0x21b   : > { %2853 = vst.msk [vmem:[#allocation2 + $0x171] sm:$0xff] %vm413_vm1, %v2779_v32 }
 0x21d   : > { %v2687_v17 = vpop.f32.mrf.mxu2 }
 0x21e   : > { %v2737_v1 = vmul.f32 %v5291_v19, %v2687_v17  ;;  %v2705_v54 = vpop.f32.mrf.mxu3  ;;  %v3006_v17 = vmax.f32 %v2983_v46, %v2992_v39 }
 0x21f   : > { %v2744_v50 = vmul.f32 %v5291_v19, %v2705_v54  ;;  %v2890_v54 = vmax.f32 %v2862_v58, %v2878_v4 }
 0x220   : > { %v2773_v10 = vadd.f32 %v5317_v15, %v2737_v1  ;;  %v2947_v1 = vld [vmem:[#allocation2 + $0x79] ss:$2 sm:$0xff] }
 0x221   : > { %v2780_v35 = vadd.f32 %v5317_v15, %v2744_v50 }
 0x222   : > { %2847 = vst.msk [vmem:[#allocation2 + $0x129] sm:$0xff] %vm413_vm1, %v2773_v10  ;;  %v2960_v10 = vmax.f32 %v2936_v20, %v2947_v1 }
 0x223   : > { %2854 = vst.msk [vmem:[#allocation2 + $0x181] sm:$0xff] %vm413_vm1, %v2780_v35  ;;  %v3016_v35 = vld [vmem:[#allocation2 + $0x61] ss:$2 sm:$0xff] }
 0x225   : > { %v2690_v45 = vpop.f32.mrf.mxu2 }
 0x226   : > { %v2738_v59 = vmul.f32 %v5291_v19, %v2690_v45  ;;  %v2707_v38 = vpop.f32.mrf.mxu3  ;;  %v2902_v45 = vld [vmem:[#allocation2 + $0x92] ss:$2 sm:$0xff] }
 0x227   : > { %v2745_v61 = vmul.f32 %v5291_v19, %v2707_v38  ;;  %v2864_v38 = vld [vmem:[#allocation2 + $0xc0] ss:$2 sm:$0xff]  ;;  %v2914_v33 = vmax.f32 %v2890_v54, %v2902_v45 }
 0x228   : > { %v2774_v63 = vadd.f32 %v5317_v15, %v2738_v59  ;;  %v2925_v59 = vld [vmem:[#allocation2 + $0xa8] ss:$2 sm:$0xff] }
 0x229   : > { %v2781_v24 = vadd.f32 %v5317_v15, %v2745_v61  ;;  %v3030_v61 = vmax.f32 %v3006_v17, %v3016_v35  ;;  %v2937_v14 = vmax.f32 %v2914_v33, %v2925_v59  ;;  %v2868_v58 = vld [vmem:[#allocation2 + $0x120] ss:$2 sm:$0xff]  ;;  %v2884_v4 = vld [vmem:[#allocation2 + $0x121] ss:$2 sm:$0xff] }
 0x22a   : > { %2848 = vst.msk [vmem:[#allocation2 + $0x139] sm:$0xff] %vm413_vm1, %v2774_v63  ;;  %v2880_v63 = vld [vmem:[#allocation2 + $0xc1] ss:$2 sm:$0xff]  ;;  %v2893_v54 = vmax.f32 %v2868_v58, %v2884_v4 }
 0x22b   : > { %2855 = vst.msk [vmem:[#allocation2 + $0x189] sm:$0xff] %vm413_vm1, %v2781_v24  ;;  %v2971_v24 = vld [vmem:[#allocation2 + $0x7a] ss:$2 sm:$0xff]  ;;  %v2961_v48 = vmax.f32 %v2937_v14, %v2949_v60 }
 0x22d   : > { %v2692_v49 = vpop.f32.mrf.mxu2  ;;  %v2985_v7 = vmax.f32 %v2961_v48, %v2973_v36 }
 0x22e   : > { %v2739_v44 = vmul.f32 %v5291_v19, %v2692_v49 }
 0x230   : > { %v2775_v37 = vadd.f32 %v5317_v15, %v2739_v44  ;;  %v2984_v44 = vmax.f32 %v2960_v10, %v2971_v24  ;;  %v2953_v10 = vld [vmem:[#allocation2 + $0x109] ss:$2 sm:$0xff] }
 0x232   : > { %2849 = vst.msk [vmem:[#allocation2 + $0x141] sm:$0xff] %vm413_vm1, %v2775_v37  ;;  %v2891_v37 = vmax.f32 %v2864_v38, %v2880_v63  ;;  %v3007_v41 = vmax.f32 %v2984_v44, %v2994_v28  ;;  %v3022_v38 = vld [vmem:[#allocation2 + $0xf1] ss:$2 sm:$0xff]  ;;  %v2908_v63 = vld [vmem:[#allocation2 + $0x122] ss:$2 sm:$0xff] }
 0x233   : > { %v2917_v28 = vmax.f32 %v2893_v54, %v2908_v63  ;;  %v2977_v44 = vld [vmem:[#allocation2 + $0x10a] ss:$2 sm:$0xff] }
 0x234   : > { %v3031_v18 = vmax.f32 %v3007_v41, %v3018_v51  ;;  %v3046_v41 = vld [vmem:[#allocation2 + $0xf2] ss:$2 sm:$0xff] }
 0x235   : > { %v2695_v29 = vpop.f32.mrf.mxu2 }
 0x236   : > { %v2740_v6 = vmul.f32 %v5291_v19, %v2695_v29  ;;  %v3054_v29 = vmax.f32 %v3030_v61, %v3040_v23  ;;  %v3055_v57 = vmax.f32 %v3031_v18, %v3042_v21  ;;  %v2933_v18 = vld [vmem:[#allocation2 + $0x168] ss:$2 sm:$0xff] }
 0x238   : > { %v2776_v53 = vadd.f32 %v5317_v15, %v2740_v6  ;;  %v2904_v6 = vld [vmem:[#allocation2 + $0xc2] ss:$2 sm:$0xff] }
 0x239   : > { %v2915_v31 = vmax.f32 %v2891_v37, %v2904_v6  ;;  %v2931_v61 = vld [vmem:[#allocation2 + $0x138] ss:$2 sm:$0xff] }
 0x23a   : > { %2850 = vst.msk [vmem:[#allocation2 + $0x151] sm:$0xff] %vm413_vm1, %v2776_v53  ;;  %v2940_v23 = vmax.f32 %v2917_v28, %v2931_v61 }
 0x23b   : > { %v2938_v3 = vmax.f32 %v2915_v31, %v2927_v26  ;;  %v3024_v31 = vld [vmem:[#allocation2 + $0x121] ss:$2 sm:$0xff] }
 0x23d   : > { %v2697_v16 = vpop.f32.mrf.mxu2  ;;  %v2962_v43 = vmax.f32 %v2938_v3, %v2951_v47 }
 0x23e   : > { %v2741_v42 = vmul.f32 %v5291_v19, %v2697_v16  ;;  %v3014_v19 = vld [vmem:[#allocation2 + $0x31] ss:$2 sm:$0xff]  ;;  %v2866_v16 = vld [vmem:[#allocation2 + $0xf0] ss:$2 sm:$0xff] }
 0x23f   : > { %v3029_v8 = vmax.f32 %v3005_v9, %v3014_v19  ;;  %v3008_v9 = vmax.f32 %v2985_v7, %v2996_v40  ;;  %v2892_v12 = vmax.f32 %v2866_v16, %v2882_v62  ;;  %v2975_v19 = vld [vmem:[#allocation2 + $0xda] ss:$2 sm:$0xff]  ;;  %v2957_v7 = vld [vmem:[#allocation2 + $0x169] ss:$2 sm:$0xff] }
 0x240   : > { %v2777_v56 = vadd.f32 %v5317_v15, %v2741_v42  ;;  %v5606_v15 = vld [vmem:[%s5689_s11] ss:$0 sm:$0xff] }
 0x241   : > { %v3053_v27 = vmax.f32 %v3029_v8, %v3038_v34  ;;  %v2929_v8 = vld [vmem:[#allocation2 + $0x108] ss:$2 sm:$0xff]  ;;  %v3032_v25 = vmax.f32 %v3008_v9, %v3020_v5  ;;  %v2916_v39 = vmax.f32 %v2892_v12, %v2906_v22 }
 0x242   : > { %2851 = vst.msk [vmem:[#allocation2 + $0x159] sm:$0xff] %vm413_vm1, %v2777_v56  ;;  %v3044_v34 = vld [vmem:[#allocation2 + $0xc2] ss:$2 sm:$0xff] }
 0x243   : > { %v2939_v46 = vmax.f32 %v2916_v39, %v2929_v8  ;;  %v2979_v40 = vld [vmem:[#allocation2 + $0x13a] ss:$2 sm:$0xff] }
 0x245   : > { %v3105_v13 = vpop.f32.mrf.mxu2  ;;  %v2963_v59 = vmax.f32 %v2939_v46, %v2953_v10 }
 0x246   : > { %v3129_v11 = vmul.f32 %v5600_v52, %v3105_v13  ;;  %v2986_v13 = vmax.f32 %v2962_v43, %v2975_v19 }
 0x247   : > { %v2987_v37 = vmax.f32 %v2963_v59, %v2977_v44 }
 0x248   : > { %v3141_v32 = vadd.f32 %v5606_v15, %v3129_v11 }
 0x249   : > { %v2886_v35 = vld [vmem:[#allocation2 + $0x151] ss:$2 sm:$0xff]  ;;  %v3002_v16 = vld [vmem:[#allocation2 + $0x150] ss:$2 sm:$0xff] }
 0x24a   : > { %v3149_v50 = vadd.f32 %v3141_v32, %v3053_v27  ;;  %v2998_v27 = vld [vmem:[#allocation2 + $0xf0] ss:$2 sm:$0xff]  ;;  %v3056_v32 = vmax.f32 %v3032_v25, %v3044_v34  ;;  %v3026_v12 = vld [vmem:[#allocation2 + $0x151] ss:$2 sm:$0xff] }
 0x24b   : > { %v3009_v1 = vmax.f32 %v2986_v13, %v2998_v27  ;;  %v3050_v25 = vld [vmem:[#allocation2 + $0x152] ss:$2 sm:$0xff] }
 0x24c   : > { %3157 = vst.msk [vmem:[%s5612_s18] sm:$0xff] %vm413_vm1, %v3149_v50  ;;  %v2870_v50 = vld [vmem:[#allocation2 + $0x150] ss:$2 sm:$0xff]  ;;  %v3004_v13 = vld [vmem:[#allocation2 + $0x180] ss:$2 sm:$0xff] }
 0x24d   : > { %v3107_v49 = vpop.f32.mrf.mxu2  ;;  %v3033_v24 = vmax.f32 %v3009_v1, %v3022_v38  ;;  %v2894_v33 = vmax.f32 %v2870_v50, %v2886_v35 }
 0x24e   : > { %v3130_v0 = vmul.f32 %v5600_v52, %v3107_v49 }
 0x250   : > { %v3142_v2 = vadd.f32 %v5606_v15, %v3130_v0  ;;  %v3000_v0 = vld [vmem:[#allocation2 + $0x120] ss:$2 sm:$0xff] }
 0x251   : > { %v3010_v6 = vmax.f32 %v2987_v37, %v3000_v0 }
 0x252   : > { %v3150_v53 = vadd.f32 %v3142_v2, %v3054_v29  ;;  %v2910_v29 = vld [vmem:[#allocation2 + $0x152] ss:$2 sm:$0xff]  ;;  %v3057_v2 = vmax.f32 %v3033_v24, %v3046_v41 }
 0x253   : > { %v2918_v26 = vmax.f32 %v2894_v33, %v2910_v29  ;;  %v3034_v36 = vmax.f32 %v3010_v6, %v3024_v31 }
 0x254   : > { %3158 = vst.msk [vmem:[%s5612_s18 + $0x8] sm:$0xff] %vm413_vm1, %v3150_v53  ;;  %v2955_v53 = vld [vmem:[#allocation2 + $0x139] ss:$2 sm:$0xff] }
 0x255   : > { %v3110_v55 = vpop.f32.mrf.mxu2  ;;  %v2964_v48 = vmax.f32 %v2940_v23, %v2955_v53  ;;  %v2941_v3 = vmax.f32 %v2918_v26, %v2933_v18 }
 0x256   : > { %v3131_v42 = vmul.f32 %v5600_v52, %v3110_v55 }
 0x257   : > { %v2988_v21 = vmax.f32 %v2964_v48, %v2979_v40  ;;  %v2965_v9 = vmax.f32 %v2941_v3, %v2957_v7 }
 0x258   : > { %v3143_v56 = vadd.f32 %v5606_v15, %v3131_v42  ;;  %v3048_v42 = vld [vmem:[#allocation2 + $0x122] ss:$2 sm:$0xff] }
 0x25a   : > { %v3151_v30 = vadd.f32 %v3143_v56, %v3055_v57  ;;  %v3058_v57 = vmax.f32 %v3034_v36, %v3048_v42  ;;  %v3011_v56 = vmax.f32 %v2988_v21, %v3002_v16 }
 0x25c   : > { %3159 = vst.msk [vmem:[%s5612_s18 + $0x10] sm:$0xff] %vm413_vm1, %v3151_v30  ;;  %v2981_v30 = vld [vmem:[#allocation2 + $0x16a] ss:$2 sm:$0xff]  ;;  %v3035_v5 = vmax.f32 %v3011_v56, %v3026_v12 }
 0x25d   : > { %v3112_v20 = vpop.f32.mrf.mxu2  ;;  %v2989_v19 = vmax.f32 %v2965_v9, %v2981_v30 }
 0x25e   : > { %v3132_v11 = vmul.f32 %v5600_v52, %v3112_v20  ;;  %v3059_v39 = vmax.f32 %v3035_v5, %v3050_v25 }
 0x25f   : > { %v3012_v58 = vmax.f32 %v2989_v19, %v3004_v13 }
 0x260   : > { %v3144_v17 = vadd.f32 %v5606_v15, %v3132_v11  ;;  %v3028_v11 = vld [vmem:[#allocation2 + $0x181] ss:$2 sm:$0xff] }
 0x261   : > { %v3036_v46 = vmax.f32 %v3012_v58, %v3028_v11 }
 0x262   : > { %v3152_v45 = vadd.f32 %v3144_v17, %v3056_v32  ;;  %v3052_v32 = vld [vmem:[#allocation2 + $0x182] ss:$2 sm:$0xff] }
 0x263   : > { %v3060_v17 = vmax.f32 %v3036_v46, %v3052_v32 }
 0x264   : > { %3160 = vst.msk [vmem:[%s5612_s18 + $0x18] sm:$0xff] %vm413_vm1, %v3152_v45 }
 0x265   : > { %v3115_v49 = vpop.f32.mrf.mxu2 }
 0x266   : > { %v3133_v14 = vmul.f32 %v5600_v52, %v3115_v49 }
 0x268   : > { %v3145_v60 = vadd.f32 %v5606_v15, %v3133_v14 }
 0x26a   : > { %v3153_v51 = vadd.f32 %v3145_v60, %v3057_v2 }
 0x26c   : > { %3161 = vst.msk [vmem:[%s5612_s18 + $0x20] sm:$0xff] %vm413_vm1, %v3153_v51 }
 0x26d   : > { %v3117_v55 = vpop.f32.mrf.mxu2 }
 0x26e   : > { %v3134_v62 = vmul.f32 %v5600_v52, %v3117_v55 }
 0x270   : > { %v3146_v47 = vadd.f32 %v5606_v15, %v3134_v62 }
 0x272   : > { %v3154_v43 = vadd.f32 %v3146_v47, %v3058_v57 }
 0x274   : > { %3162 = vst.msk [vmem:[%s5612_s18 + $0x28] sm:$0xff] %vm413_vm1, %v3154_v43 }
 0x275   : > { %v3120_v22 = vpop.f32.mrf.mxu2 }
 0x276   : > { %v3135_v8 = vmul.f32 %v5600_v52, %v3120_v22 }
 0x278   : > { %v3147_v20 = vadd.f32 %v5606_v15, %v3135_v8 }
 0x27a   : > { %v3155_v4 = vadd.f32 %v3147_v20, %v3059_v39 }
 0x27c   : > { %3163 = vst.msk [vmem:[%s5612_s18 + $0x30] sm:$0xff] %vm413_vm1, %v3155_v4 }
 0x27d   : > { %v3122_v34 = vpop.f32.mrf.mxu2 }
 0x27e   : > { %v3136_v27 = vmul.f32 %v5600_v52, %v3122_v34 }
 0x280   : > { %v3148_v1 = vadd.f32 %v5606_v15, %v3136_v27 }
 0x282   : > { %v3156_v54 = vadd.f32 %v3148_v1, %v3060_v17 }
 0x284   : > { %3164 = vst.msk [vmem:[%s5612_s18 + $0x38] sm:$0xff] %vm413_vm1, %v3156_v54 }
 0x285   : > { %3463 = shalt.err (!%p3460_p3)
}
 0x286   : > { %s3502_s28 = smov 128   ;;  %s3503_s18 = smov 8  }
 0x287   : > { %3349 = dma.vmem_to_hbm [thread:$0]  (%p3607_p5), %s3179_s15, 1024, %s3181_s16, %s3166_s25, %s3502_s28, %s3502_s28, %s3503_s18  }
 0x288 PF: > { %p3355_p4 = scmp.ge.s32.totalorder %s3498_s24, 2  ;;  %s3195_s20 = sand.u32 1, %s3486_s21  }
 0x289   : > { %s3196_s0 = scalar_lea.sflag [#allocation4], %s3195_s20 }
 0x28a   : > { %p3352_p7 = pnand %p3355_p4, %p3611_p6 }
 0x28c   : > { %p3353_p8 = pneg %p3352_p7 }
 0x28e   : > { %3481 = dma.done.wait (%p3353_p8), %s3196_s0, 1024  }
 0x28f   : > { %3483 = vsyncadd (%p3353_p8), %s3196_s0, 4294966272  ;;  %p22_p9 = scmp.ge.s32.totalorder %s3594_s27, 4   ;;  %s5783_s21 = smov %s3490_s22 }
 0x290   : > { %s5784_s22 = smov %s3494_s23  ;;  %s5785_s23 = smov %s3605_s30 }
 0x291   : > { %s5786_s24 = smov %s3594_s27  ;;  %24 = sbr.rel (!%p22_p9) target bundleno = 6 (0x6), region = 182 }
 0x296   :  { %3202 = vsyncpa [#allocation4], 1 }
 0x297   :  { %3204 = vsyncpa [#allocation4 + $0x1], 1 }

</bundles_post_ra>
